<compile_context>
chip_gen: v7x
topology: tpu7x:2x2x1
jax: 0.10.0
libtpu: 0.0.40
codegen_flags: <defaults>
</compile_context>

<pallas_src>
import jax
import jax.numpy as jnp
import numpy as np
from jax.experimental import pallas as pl
from jax.experimental.pallas import tpu as pltpu


def _ui2vec_predictor_kernel(text_ref, lab_ref, mask_ref,
                             w1t_ref, s1_ref, ftab_ref,
                             w2m_ref, s2m_ref, w2r_ref, s2r_ref,
                             bias_ref, out_ref):
    """One grid step = one context element k (grid=(n,), output resident in VMEM)."""
    k = pl.program_id(0)
    B = text_ref.shape[1]
    C = ftab_ref.shape[0]
    main = w2m_ref.shape[1]          # lane-dense width (== bert, multiple of 128)

    # Initialize the resident output with the folded bias b_eff = b2 + b1 @ sum_i W2_i.
    @pl.when(k == 0)
    def _():
        out_ref[...] = jnp.broadcast_to(bias_ref[...], out_ref.shape)

    # --- UIEmbedder + UI2Vec.lin for context k -------------------------------------
    text = text_ref[0].astype(jnp.bfloat16)                       # [B, bert]
    labs = lab_ref[0]                                              # [B, 1] int32
    iota = jax.lax.broadcasted_iota(jnp.int32, (B, C), 1)
    onehot = (labs == iota).astype(jnp.bfloat16)                   # [B, C]

    # int8 weights -> bf16 (exact), MXU matmul with f32 accumulation, per-output-column
    # dequant scale applied on the f32 accumulator.
    z = (jnp.dot(text, w1t_ref[...].astype(jnp.bfloat16),
                 preferred_element_type=jnp.float32) * s1_ref[...]
         + jnp.dot(onehot, ftab_ref[...],
                   preferred_element_type=jnp.float32))            # [B, bert] f32

    # Empty-text rows: the original module zeroes x_i (text AND class parts) before
    # the linear; b1 is added unmasked (it lives in bias_ref).
    y = (z * mask_ref[0]).astype(jnp.bfloat16)                     # [B, bert]

    # --- HiddenLabelPredictor.lin, chunk k of the virtual concat -------------------
    # Lane-dense main slab (unmasked stores) + 6-wide remainder (masked, cold path).
    out_ref[:, :main] = out_ref[:, :main] + jnp.dot(
        y, w2m_ref[...].astype(jnp.bfloat16),
        preferred_element_type=jnp.float32) * s2m_ref[...]
    out_ref[:, main:] = out_ref[:, main:] + jnp.dot(
        y, w2r_ref[...].astype(jnp.bfloat16),
        preferred_element_type=jnp.float32) * s2r_ref[...]


def hidden_label_predictor(text_emb, labels, mask, params):
    """text_emb: [n, B, bert] f32 (precomputed BERT encodings);
       labels:   [n, B, 1] int;   mask: [n, B, 1] f32 (1.0 = non-empty text).
       Returns [B, bert + class_emb] f32."""
    n, B, bert = text_emb.shape
    assert bert % 128 == 0, "lane-dense W2 split assumes bert is a multiple of 128"

    w1t_q = params["w1t_q"]          # [bert, bert]        int8
    s1 = params["s1"]                # [1, bert]           f32
    ftab = params["fused_table"]     # [num_classes, bert] bf16
    w2m_q = params["w2_main_q"]      # [n*bert, bert]      int8
    s2m = params["s2_main"]          # [1, bert]           f32
    w2r_q = params["w2_rem_q"]       # [n*bert, rem]       int8
    s2r = params["s2_rem"]           # [1, rem]            f32
    bias = params["b_eff"]           # [1, bert+rem]       f32
    rem = w2r_q.shape[1]
    out_dim = bert + rem
    C = ftab.shape[0]

    # No wrapper-side HBM passes: only fix dtypes if they differ (tiny arrays anyway).
    if text_emb.dtype != jnp.float32:
        text_emb = text_emb.astype(jnp.float32)
    if labels.dtype != jnp.int32:
        labels = labels.astype(jnp.int32)
    if mask.dtype != jnp.float32:
        mask = mask.astype(jnp.float32)

    flops = 2 * n * B * (bert * bert + C * bert + bert * out_dim)
    bytes_accessed = (w1t_q.size + w2m_q.size + w2r_q.size            # int8 weights
                      + ftab.size * 2                                  # bf16
                      + (text_emb.size + labels.size + mask.size) * 4
                      + (s1.size + s2m.size + s2r.size + bias.size) * 4
                      + B * out_dim * 4)
    cost = pl.CostEstimate(flops=flops, transcendentals=0,
                           bytes_accessed=bytes_accessed)

    grid_spec = pltpu.PrefetchScalarGridSpec(
        num_scalar_prefetch=0,
        grid=(n,),
        in_specs=[
            pl.BlockSpec((1, B, bert), lambda k: (k, 0, 0)),        # text, context k
            pl.BlockSpec((1, B, 1), lambda k: (k, 0, 0)),           # labels, context k
            pl.BlockSpec((1, B, 1), lambda k: (k, 0, 0)),           # mask, context k
            pl.BlockSpec((bert, bert), lambda k: (0, 0)),           # W1_text^T int8 (fetched once)
            pl.BlockSpec((1, bert), lambda k: (0, 0)),              # W1 dequant scale
            pl.BlockSpec((C, bert), lambda k: (0, 0)),              # emb_table @ W1_class^T (bf16)
            pl.BlockSpec((bert, bert), lambda k: (k, 0)),           # W2 main slab, chunk k (int8)
            pl.BlockSpec((1, bert), lambda k: (0, 0)),              # W2 main dequant scale
            pl.BlockSpec((bert, rem), lambda k: (k, 0)),            # W2 remainder, chunk k (int8)
            pl.BlockSpec((1, rem), lambda k: (0, 0)),               # W2 remainder dequant scale
            pl.BlockSpec((1, out_dim), lambda k: (0, 0)),           # b_eff (b1/b2 fold)
        ],
        out_specs=pl.BlockSpec((B, out_dim), lambda k: (0, 0)),     # resident accumulator
    )

    return pl.pallas_call(
        _ui2vec_predictor_kernel,
        out_shape=jax.ShapeDtypeStruct((B, out_dim), jnp.float32),
        grid_spec=grid_spec,
        compiler_params=pltpu.CompilerParams(
            # Output index_map is constant across the n axis -> reduction/accumulator.
            dimension_semantics=("arbitrary",),
        ),
        cost_estimate=cost,
    )(text_emb, labels, mask, w1t_q, s1, ftab, w2m_q, s2m, w2r_q, s2r, bias)


def _quantize_per_column(w):
    """Symmetric per-output-column int8 quantization: w ~= q * s (q int8, s [1,N] f32)."""
    s = jnp.max(jnp.abs(w), axis=0, keepdims=True) / 127.0
    s = jnp.where(s == 0.0, 1.0, s)
    q = jnp.clip(jnp.round(w / s), -127.0, 127.0).astype(jnp.int8)
    return q, s.astype(jnp.float32)


def init_params(key, bert_size, class_emb_size, num_classes, n):
    """Synthetic PyTorch-style parameters plus kernel-ready views (transposed, fused,
    int8-quantized with per-column scales). All folds are done in f32 pre-quantization."""
    k = jax.random.split(key, 5)
    in1 = bert_size + class_emb_size          # UI2Vec.lin in / final-linear out
    in2 = bert_size * n                       # final-linear in
    lim1 = 1.0 / np.sqrt(in1)
    lim2 = 1.0 / np.sqrt(in2)

    emb_table = jax.random.normal(k[0], (num_classes, class_emb_size), jnp.float32)
    W1 = jax.random.uniform(k[1], (bert_size, in1), jnp.float32, -lim1, lim1)   # [out, in]
    b1 = jax.random.uniform(k[2], (bert_size,), jnp.float32, -lim1, lim1)
    W2 = jax.random.uniform(k[3], (in1, in2), jnp.float32, -lim2, lim2)          # [out, in]
    b2 = jax.random.uniform(k[4], (in1,), jnp.float32, -lim2, lim2)

    w1t = W1[:, :bert_size].T                                   # [bert, bert]
    w1c = W1[:, bert_size:].T                                   # [class_emb, bert]
    fused_table = emb_table @ w1c                               # [num_classes, bert]
    w2T = W2.T                                                  # [n*bert, in1]
    chunk_sum = w2T.reshape(n, bert_size, in1).sum(axis=0)      # [bert, in1]
    b_eff = b2[None, :] + b1[None, :] @ chunk_sum               # [1, in1]  (b1 folded thru W2)

    w1t_q, s1 = _quantize_per_column(w1t)
    w2m_q, s2m = _quantize_per_column(w2T[:, :bert_size])       # lane-dense 768-wide slab
    w2r_q, s2r = _quantize_per_column(w2T[:, bert_size:])       # 6-wide remainder

    return {
        # raw params (f32) for the reference forward
        "emb_table": emb_table, "W1": W1, "b1_vec": b1, "W2": W2, "b2_vec": b2,
        # kernel operands
        "w1t_q": w1t_q, "s1": s1,
        "fused_table": fused_table.astype(jnp.bfloat16),
        "w2_main_q": w2m_q, "s2_main": s2m,
        "w2_rem_q": w2r_q, "s2_rem": s2r,
        "b_eff": b_eff.astype(jnp.float32),
    }


def reference_forward(text_emb, labels, mask, params):
    """Plain-JAX f32 mirror of the PyTorch forward (correctness oracle)."""
    n = text_emb.shape[0]
    W1, b1 = params["W1"], params["b1_vec"]
    W2, b2 = params["W2"], params["b2_vec"]
    outs = []
    for i in range(n):
        te = text_emb[i] * mask[i]
        ce = params["emb_table"][labels[i, :, 0]] * mask[i]
        x = jnp.concatenate([te, ce], axis=1)
        outs.append(x @ W1.T + b1)
    cat = jnp.concatenate(outs, axis=1)
    return cat @ W2.T + b2


if __name__ == "__main__":
    # bert_size=768 is the only value for which the original module is self-consistent
    # (HiddenLabelPredictorModel builds UI2Vec(bert) with its 768 default internally).
    bert_size = 768
    class_emb_size = 6
    num_classes = 26
    n = 3          # number of context UI elements
    B = 4          # batch (screens); larger B amortizes the fixed weight stream

    key = jax.random.PRNGKey(0)
    kp, kt, kl = jax.random.split(key, 3)
    params = init_params(kp, bert_size, class_emb_size, num_classes, n)

    # Synthetic "BERT" text embeddings, class labels, and empty-text mask.
    text_emb = jax.random.normal(kt, (n, B, bert_size), jnp.float32)
    labels = jax.random.randint(kl, (n, B, 1), 0, num_classes, jnp.int32)
    mask = jnp.ones((n, B, 1), jnp.float32).at[1, 2, 0].set(0.0)   # one empty-text row

    out = hidden_label_predictor(text_emb, labels, mask, params)
    out = jax.block_until_ready(out)

    ref = reference_forward(text_emb, labels, mask, params)
    # int8 weight stream + bf16 activations with f32 accumulation -> ~1% error budget.
    np.testing.assert_allclose(np.asarray(out), np.asarray(ref), rtol=5e-2, atol=2e-2)
    rel = np.linalg.norm(np.asarray(out) - np.asarray(ref)) / np.linalg.norm(np.asarray(ref))
    assert rel < 3e-2, f"relative error too large: {rel}"
    assert out.shape == (B, bert_size + class_emb_size)
    print("KERNEL_OK")
</pallas_src>

<mosaic_0001>
module attributes {stable_mosaic.version = 11 : i64} {
  func.func @_ui2vec_predictor_kernel(%arg0: i32, %arg1: memref<1x4x768xf32, #tpu.memory_space<vmem>>, %arg2: memref<1x4x1xi32, #tpu.memory_space<vmem>>, %arg3: memref<1x4x1xf32, #tpu.memory_space<vmem>>, %arg4: memref<768x768xi8, #tpu.memory_space<vmem>>, %arg5: memref<1x768xf32, #tpu.memory_space<vmem>>, %arg6: memref<26x768xbf16, #tpu.memory_space<vmem>>, %arg7: memref<768x768xi8, #tpu.memory_space<vmem>>, %arg8: memref<1x768xf32, #tpu.memory_space<vmem>>, %arg9: memref<768x6xi8, #tpu.memory_space<vmem>>, %arg10: memref<1x6xf32, #tpu.memory_space<vmem>>, %arg11: memref<1x774xf32, #tpu.memory_space<vmem>>, %arg12: memref<4x774xf32, #tpu.memory_space<vmem>>) attributes {dimension_semantics = [#tpu.dimension_semantics<arbitrary>], iteration_bounds = array<i64: 3>, scalar_prefetch = 0 : i64, scratch_operands = 0 : i64, tpu.core_type = #tpu.core_type<tc>, window_params = [{transform_indices = @transform_0, window_bounds = array<i64: 1, 4, 768>}, {transform_indices = @transform_1, window_bounds = array<i64: 1, 4, 1>}, {transform_indices = @transform_2, window_bounds = array<i64: 1, 4, 1>}, {pipeline_mode = #tpu.pipeline_mode<synchronous>, transform_indices = @transform_3, window_bounds = array<i64: 768, 768>}, {pipeline_mode = #tpu.pipeline_mode<synchronous>, transform_indices = @transform_4, window_bounds = array<i64: 1, 768>}, {pipeline_mode = #tpu.pipeline_mode<synchronous>, transform_indices = @transform_5, window_bounds = array<i64: 26, 768>}, {transform_indices = @transform_6, window_bounds = array<i64: 768, 768>}, {pipeline_mode = #tpu.pipeline_mode<synchronous>, transform_indices = @transform_7, window_bounds = array<i64: 1, 768>}, {transform_indices = @transform_8, window_bounds = array<i64: 768, 6>}, {pipeline_mode = #tpu.pipeline_mode<synchronous>, transform_indices = @transform_9, window_bounds = array<i64: 1, 6>}, {pipeline_mode = #tpu.pipeline_mode<synchronous>, transform_indices = @transform_10, window_bounds = array<i64: 1, 774>}, {pipeline_mode = #tpu.pipeline_mode<synchronous>, transform_indices = @transform_11, window_bounds = array<i64: 4, 774>}]} {
    %c0_i32 = arith.constant 0 : i32
    %0 = arith.cmpi eq, %arg0, %c0_i32 : i32
    %1 = arith.extui %0 : i1 to i32
    %c0_i32_0 = arith.constant 0 : i32
    %2 = arith.cmpi ne, %1, %c0_i32_0 : i32
    scf.if %2 {
      %c0_33 = arith.constant 0 : index
      %c0_34 = arith.constant 0 : index
      %46 = vector.load %arg11[%c0_33, %c0_34] : memref<1x774xf32, #tpu.memory_space<vmem>>, vector<1x774xf32>
      %47 = vector.shape_cast %46 : vector<1x774xf32> to vector<1x774xf32>
      %48 = vector.broadcast %47 : vector<1x774xf32> to vector<4x774xf32>
      %c0_35 = arith.constant 0 : index
      %c0_36 = arith.constant 0 : index
      %49 = vector.load %arg12[%c0_35, %c0_36] : memref<4x774xf32, #tpu.memory_space<vmem>>, vector<4x774xf32>
      tpu.vector_store %arg12[%c0_35, %c0_36], %48 {strides = array<i32>} : memref<4x774xf32, #tpu.memory_space<vmem>>, vector<4x774xf32>,
    } else {
    }
    %c0 = arith.constant 0 : index
    %c0_1 = arith.constant 0 : index
    %c0_2 = arith.constant 0 : index
    %3 = vector.load %arg1[%c0, %c0_1, %c0_2] : memref<1x4x768xf32, #tpu.memory_space<vmem>>, vector<1x4x768xf32>
    %4 = vector.shape_cast %3 : vector<1x4x768xf32> to vector<4x768xf32>
    %5 = arith.truncf %4 : vector<4x768xf32> to vector<4x768xbf16>
    %c0_3 = arith.constant 0 : index
    %c0_4 = arith.constant 0 : index
    %c0_5 = arith.constant 0 : index
    %6 = vector.load %arg2[%c0_3, %c0_4, %c0_5] : memref<1x4x1xi32, #tpu.memory_space<vmem>>, vector<1x4x1xi32>
    %7 = vector.shape_cast %6 : vector<1x4x1xi32> to vector<4x1xi32>
    %8 = tpu.iota {dimensions = array<i32: 1>} : vector<4x26xi32>
    %9 = vector.broadcast %7 : vector<4x1xi32> to vector<4x26xi32>
    %10 = arith.cmpi eq, %9, %8 : vector<4x26xi32>
    %11 = arith.extui %10 : vector<4x26xi1> to vector<4x26xi32>
    %12 = arith.sitofp %11 : vector<4x26xi32> to vector<4x26xf32>
    %13 = arith.truncf %12 : vector<4x26xf32> to vector<4x26xbf16>
    %c0_6 = arith.constant 0 : index
    %c0_7 = arith.constant 0 : index
    %14 = vector.load %arg4[%c0_6, %c0_7] : memref<768x768xi8, #tpu.memory_space<vmem>>, vector<768x768xi8>
    %15 = arith.sitofp %14 : vector<768x768xi8> to vector<768x768xbf16>
    %cst = arith.constant dense<0.000000e+00> : vector<4x768xf32>
    %16 = tpu.matmul %5, %15, %cst {dimension_numbers = #tpu.dot_dimension_numbers<[1], [0], [0], [1], [0, 0, 1, 1], [], []>} : vector<4x768xbf16>, vector<768x768xbf16>, vector<4x768xf32> -> vector<4x768xf32>
    %c0_8 = arith.constant 0 : index
    %c0_9 = arith.constant 0 : index
    %17 = vector.load %arg5[%c0_8, %c0_9] : memref<1x768xf32, #tpu.memory_space<vmem>>, vector<1x768xf32>
    %18 = vector.broadcast %17 : vector<1x768xf32> to vector<4x768xf32>
    %19 = arith.mulf %16, %18 : vector<4x768xf32>
    %c0_10 = arith.constant 0 : index
    %c0_11 = arith.constant 0 : index
    %20 = vector.load %arg6[%c0_10, %c0_11] : memref<26x768xbf16, #tpu.memory_space<vmem>>, vector<26x768xbf16>
    %cst_12 = arith.constant dense<0.000000e+00> : vector<4x768xf32>
    %21 = tpu.matmul %13, %20, %cst_12 {dimension_numbers = #tpu.dot_dimension_numbers<[1], [0], [0], [1], [0, 0, 1, 1], [], []>} : vector<4x26xbf16>, vector<26x768xbf16>, vector<4x768xf32> -> vector<4x768xf32>
    %22 = arith.addf %19, %21 : vector<4x768xf32>
    %c0_13 = arith.constant 0 : index
    %c0_14 = arith.constant 0 : index
    %c0_15 = arith.constant 0 : index
    %23 = vector.load %arg3[%c0_13, %c0_14, %c0_15] : memref<1x4x1xf32, #tpu.memory_space<vmem>>, vector<1x4x1xf32>
    %24 = vector.shape_cast %23 : vector<1x4x1xf32> to vector<4x1xf32>
    %25 = vector.broadcast %24 : vector<4x1xf32> to vector<4x768xf32>
    %26 = arith.mulf %22, %25 : vector<4x768xf32>
    %27 = arith.truncf %26 : vector<4x768xf32> to vector<4x768xbf16>
    %c0_16 = arith.constant 0 : index
    %c0_17 = arith.constant 0 : index
    %28 = vector.load %arg12[%c0_16, %c0_17] : memref<4x774xf32, #tpu.memory_space<vmem>>, vector<4x768xf32>
    %c0_18 = arith.constant 0 : index
    %c0_19 = arith.constant 0 : index
    %29 = vector.load %arg7[%c0_18, %c0_19] : memref<768x768xi8, #tpu.memory_space<vmem>>, vector<768x768xi8>
    %30 = arith.sitofp %29 : vector<768x768xi8> to vector<768x768xbf16>
    %cst_20 = arith.constant dense<0.000000e+00> : vector<4x768xf32>
    %31 = tpu.matmul %27, %30, %cst_20 {dimension_numbers = #tpu.dot_dimension_numbers<[1], [0], [0], [1], [0, 0, 1, 1], [], []>} : vector<4x768xbf16>, vector<768x768xbf16>, vector<4x768xf32> -> vector<4x768xf32>
    %c0_21 = arith.constant 0 : index
    %c0_22 = arith.constant 0 : index
    %32 = vector.load %arg8[%c0_21, %c0_22] : memref<1x768xf32, #tpu.memory_space<vmem>>, vector<1x768xf32>
    %33 = vector.broadcast %32 : vector<1x768xf32> to vector<4x768xf32>
    %34 = arith.mulf %31, %33 : vector<4x768xf32>
    %35 = arith.addf %28, %34 : vector<4x768xf32>
    %c0_23 = arith.constant 0 : index
    %c0_24 = arith.constant 0 : index
    %36 = vector.load %arg12[%c0_23, %c0_24] : memref<4x774xf32, #tpu.memory_space<vmem>>, vector<4x768xf32>
    tpu.vector_store %arg12[%c0_23, %c0_24], %35 {strides = array<i32>} : memref<4x774xf32, #tpu.memory_space<vmem>>, vector<4x768xf32>,
    %c0_25 = arith.constant 0 : index
    %c768 = arith.constant 768 : index
    %37 = vector.load %arg12[%c0_25, %c768] : memref<4x774xf32, #tpu.memory_space<vmem>>, vector<4x6xf32>
    %c0_26 = arith.constant 0 : index
    %c0_27 = arith.constant 0 : index
    %38 = vector.load %arg9[%c0_26, %c0_27] : memref<768x6xi8, #tpu.memory_space<vmem>>, vector<768x6xi8>
    %39 = arith.sitofp %38 : vector<768x6xi8> to vector<768x6xbf16>
    %cst_28 = arith.constant dense<0.000000e+00> : vector<4x6xf32>
    %40 = tpu.matmul %27, %39, %cst_28 {dimension_numbers = #tpu.dot_dimension_numbers<[1], [0], [0], [1], [0, 0, 1, 1], [], []>} : vector<4x768xbf16>, vector<768x6xbf16>, vector<4x6xf32> -> vector<4x6xf32>
    %c0_29 = arith.constant 0 : index
    %c0_30 = arith.constant 0 : index
    %41 = vector.load %arg10[%c0_29, %c0_30] : memref<1x6xf32, #tpu.memory_space<vmem>>, vector<1x6xf32>
    %42 = vector.broadcast %41 : vector<1x6xf32> to vector<4x6xf32>
    %43 = arith.mulf %40, %42 : vector<4x6xf32>
    %44 = arith.addf %37, %43 : vector<4x6xf32>
    %c0_31 = arith.constant 0 : index
    %c768_32 = arith.constant 768 : index
    %45 = vector.load %arg12[%c0_31, %c768_32] : memref<4x774xf32, #tpu.memory_space<vmem>>, vector<4x6xf32>
    tpu.vector_store %arg12[%c0_31, %c768_32], %44 {strides = array<i32>} : memref<4x774xf32, #tpu.memory_space<vmem>>, vector<4x6xf32>,
    return
  }
  func.func @transform_0(%arg0: i32) -> (i32, i32, i32) {
    %c0_i32 = arith.constant 0 : i32
    %c0_i32_0 = arith.constant 0 : i32
    %c0_i32_1 = arith.constant 0 : i32
    return %arg0, %c0_i32, %c0_i32_0 : i32, i32, i32
  }
  func.func @transform_1(%arg0: i32) -> (i32, i32, i32) {
    %c0_i32 = arith.constant 0 : i32
    %c0_i32_0 = arith.constant 0 : i32
    %c0_i32_1 = arith.constant 0 : i32
    return %arg0, %c0_i32, %c0_i32_0 : i32, i32, i32
  }
  func.func @transform_2(%arg0: i32) -> (i32, i32, i32) {
    %c0_i32 = arith.constant 0 : i32
    %c0_i32_0 = arith.constant 0 : i32
    %c0_i32_1 = arith.constant 0 : i32
    return %arg0, %c0_i32, %c0_i32_0 : i32, i32, i32
  }
  func.func @transform_3(%arg0: i32) -> (i32, i32) {
    %c0_i32 = arith.constant 0 : i32
    %c0_i32_0 = arith.constant 0 : i32
    %c0_i32_1 = arith.constant 0 : i32
    return %c0_i32, %c0_i32_0 : i32, i32
  }
  func.func @transform_4(%arg0: i32) -> (i32, i32) {
    %c0_i32 = arith.constant 0 : i32
    %c0_i32_0 = arith.constant 0 : i32
    %c0_i32_1 = arith.constant 0 : i32
    return %c0_i32, %c0_i32_0 : i32, i32
  }
  func.func @transform_5(%arg0: i32) -> (i32, i32) {
    %c0_i32 = arith.constant 0 : i32
    %c0_i32_0 = arith.constant 0 : i32
    %c0_i32_1 = arith.constant 0 : i32
    return %c0_i32, %c0_i32_0 : i32, i32
  }
  func.func @transform_6(%arg0: i32) -> (i32, i32) {
    %c0_i32 = arith.constant 0 : i32
    %c0_i32_0 = arith.constant 0 : i32
    return %arg0, %c0_i32 : i32, i32
  }
  func.func @transform_7(%arg0: i32) -> (i32, i32) {
    %c0_i32 = arith.constant 0 : i32
    %c0_i32_0 = arith.constant 0 : i32
    %c0_i32_1 = arith.constant 0 : i32
    return %c0_i32, %c0_i32_0 : i32, i32
  }
  func.func @transform_8(%arg0: i32) -> (i32, i32) {
    %c0_i32 = arith.constant 0 : i32
    %c0_i32_0 = arith.constant 0 : i32
    return %arg0, %c0_i32 : i32, i32
  }
  func.func @transform_9(%arg0: i32) -> (i32, i32) {
    %c0_i32 = arith.constant 0 : i32
    %c0_i32_0 = arith.constant 0 : i32
    %c0_i32_1 = arith.constant 0 : i32
    return %c0_i32, %c0_i32_0 : i32, i32
  }
  func.func @transform_10(%arg0: i32) -> (i32, i32) {
    %c0_i32 = arith.constant 0 : i32
    %c0_i32_0 = arith.constant 0 : i32
    %c0_i32_1 = arith.constant 0 : i32
    return %c0_i32, %c0_i32_0 : i32, i32
  }
  func.func @transform_11(%arg0: i32) -> (i32, i32) {
    %c0_i32 = arith.constant 0 : i32
    %c0_i32_0 = arith.constant 0 : i32
    %c0_i32_1 = arith.constant 0 : i32
    return %c0_i32, %c0_i32_0 : i32, i32
  }
}

</mosaic_0001>

<bundles_post_ra>
// kernel: tpu_custom_call.1
= control target key start
LH: loop header
LB: loop body
LE: loop exit
PB: predicated region body
PF: predicated region fallthrough
CT: control target
= control target key end

     0   :  { %s4903_s0 = inlined_call_operand.hbm [shape: f32[3,4,768], index: 0, kind: input, shape index: {}]   ;;  %s4904_s1 = inlined_call_operand.vmem [shape: s32[3,4,1], index: 1, kind: input, shape index: {}]   ;;  %s4905_s2 = inlined_call_operand.vmem [shape: f32[3,4,1], index: 2, kind: input, shape index: {}]   ;;  %s4906_s3 = inlined_call_operand.hbm [shape: s8[768,768], index: 3, kind: input, shape index: {}]   ;;  %s4907_s4 = inlined_call_operand.hbm [shape: f32[1,768], index: 4, kind: input, shape index: {}]   ;;  %s4908_s5 = inlined_call_operand.hbm [shape: bf16[26,768], index: 5, kind: input, shape index: {}]   ;;  %s4909_s6 = inlined_call_operand.hbm [shape: s8[2304,768], index: 6, kind: input, shape index: {}]   ;;  %s4910_s7 = inlined_call_operand.hbm [shape: f32[1,768], index: 7, kind: input, shape index: {}]   ;;  %s4911_s8 = inlined_call_operand.vmem [shape: s8[2304,6], index: 8, kind: input, shape index: {}]   ;;  %s4912_s9 = inlined_call_operand.hbm [shape: f32[1,6], index: 9, kind: input, shape index: {}]   ;;  %s4913_s10 = inlined_call_operand.hbm [shape: f32[1,774], index: 10, kind: input, shape index: {}]   ;;  %s4914_s11 = inlined_call_operand.hbm [shape: f32[4,774], index: 11, kind: output, shape index: {}]  }
   0x1   :  { %4926 = sst [smem:[#allocation24_spill]] %s4903_s0 }
   0x2   :  { %4927 = sst [smem:[#allocation25_spill]] %s4905_s2 }
   0x3   :  { %4928 = sst [smem:[#allocation26_spill]] %s4906_s3 }
   0x4   :  { %4929 = sst [smem:[#allocation27_spill]] %s4907_s4 }
   0x5   :  { %4930 = sst [smem:[#allocation28_spill]] %s4908_s5 }
   0x6   :  { %4931 = sst [smem:[#allocation29_spill]] %s4911_s8 }
   0x7   :  { %4932 = sst [smem:[#allocation30_spill]] %s4914_s11 }
   0x8   :  { %16 = vsyncpa [#allocation3], 0 }
   0x9   :  { %18 = vsyncpa [#allocation3 + $0x1], 0 }
   0xa   :  { %19 = vsyncpa [#allocation6], 0 }
   0xb   :  { %20 = vsyncpa [#allocation9], 0 }
   0xc   :  { %21 = vsyncpa [#allocation14], 0 }
   0xd   :  { %22 = vsyncpa [#allocation4], 0  ;;  %s4105_s17 = smov 0   ;;  %s4107_s18 = smov 0  }
   0xe   :  { %s4109_s19 = smov 0   ;;  %s4111_s20 = smov 0  }
   0xf LB: > { %s4030_s21 = smov [#allocation5]   ;;  %s4126_s23 = sadd.s32 4294967295, %s4028_s20   ;;  %s4028_s20 = sphi %s4111_s20, %s4967_s20   ;;  %s4024_s19 = sphi %s4109_s19, %s4966_s19   ;;  %s4020_s18 = sphi %s4107_s18, %s4965_s18   ;;  %s4016_s17 = sphi %s4105_s17, %s4964_s17  }
  0x10   : > { %s322_s22 = sshll.u32 %s4030_s21, 4  ;;  %p3358_p0 = scmp.ge.s32.totalorder %s4028_s20, 1  ;;  %s4132_s22 = int_to_ptr.vmem [resolvable:$true] %s322_s22 }
  0x11   : > { %p4918_p1 = scmp.eq.s32.totalorder %s4126_s23, 0  ;;  %p310_p2 = scmp.lt.s32.totalorder %s4028_s20, 4 }
  0x12   : > { %s4031_s26 = smov [#allocation7]   ;;  %s4032_s28 = smov [#allocation8]  }
  0x13   : > { %p4134_p4 = pnand %p3358_p0, %p310_p2  ;;  %s336_s27 = sshll.u32 %s4031_s26, 4  ;;  %s4146_s27 = int_to_ptr.vmem [resolvable:$true] %s336_s27 }
  0x14   : > { %s346_s29 = sshll.u32 %s4032_s28, 4  ;;  %s4935_s3 = sld [smem:[#allocation26_spill]]  ;;  %s4148_s29 = int_to_ptr.vmem [resolvable:$true] %s346_s29 }
  0x15   : > { %s4933_s24 = scalar_select %p4134_p4, 1, 0 }
  0x16   : > { %p3603_p5 = pneg %p4134_p4 }
  0x18   : > { %p4142_p6 = pnand %p3603_p5, %p4918_p1 }
  0x1a   : > { %s4934_s25 = scalar_select %p4142_p6, 1, 0 }
  0x1b   : > { %s3712_s13 = scalar_lea.hbm %s4935_s3, 18432  ;;  %p4158_p8 = pneg %p4142_p6 }
  0x1c   : > { %p3713_p7 = scmp.ne.s32.totalorder %s4935_s3, %s3712_s13  ;;  %p3719_p11 = scmp.lt.u32.totalorder %s3712_s13, %s4935_s3 }
  0x1e   : > { %p3715_p9 = pnand %p4158_p8, %p3713_p7 }
  0x20   : > { %p3716_p10 = pneg %p3715_p9 }
  0x22   : > { %p3721_p12 = pnand %p3719_p11, %p3716_p10 }
  0x24   : > { %3724 = shalt.err (!%p3721_p12)
}
  0x25   : > { %s3725_s28 = scalar_lea.vmem %s4132_s22, 18432  ;;  %p3733_p5 = scmp.lt.s32.totalorder %s4132_s22, %s4132_s22 }
  0x26   : > { %p3726_p13 = scmp.ne.s32.totalorder %s4132_s22, %s3725_s28  ;;  %p3734_p3 = scmp.lt.s32.totalorder %s3725_s28, %s3725_s28 }
  0x28   : > { %p3728_p0 = pnand %p3726_p13, %p4158_p8  ;;  %p3735_p7 = por %p3734_p3, %p3733_p5 }
  0x2a   : > { %p3729_p2 = pneg %p3728_p0 }
  0x2c   : > { %p3736_p9 = pnand %p3735_p7, %p3729_p2 }
  0x2e   : > { %3739 = shalt.err (!%p3736_p9)
}
  0x2f   : > { %s4916_s30 = smov 768   ;;  %s4917_s12 = smov 48  }
  0x30   : > { %3606 = dma.hbm_to_vmem [thread:$0]  (!%p4142_p6), %s4935_s3, 18432, %s4132_s22, [#allocation6], %s4916_s30, %s4916_s30, %s4917_s12  }
  0x31   : > { %s4937_s4 = sld [smem:[#allocation27_spill]] }
  0x37   : > { %s3740_s26 = scalar_lea.hbm %s4937_s4, 96 }
  0x38   : > { %p3741_p3 = scmp.ne.s32.totalorder %s4937_s4, %s3740_s26  ;;  %p3747_p12 = scmp.lt.u32.totalorder %s3740_s26, %s4937_s4 }
  0x3a   : > { %p3743_p10 = pnand %p3741_p3, %p4158_p8 }
  0x3c   : > { %p3744_p11 = pneg %p3743_p10 }
  0x3e   : > { %p3749_p13 = pnand %p3747_p12, %p3744_p11 }
  0x40   : > { %3752 = shalt.err (!%p3749_p13)
}
  0x41   : > { %s3753_s22 = scalar_lea.vmem %s4146_s27, 96  ;;  %p3761_p7 = scmp.lt.s32.totalorder %s4146_s27, %s4146_s27 }
  0x42   : > { %p3754_p0 = scmp.ne.s32.totalorder %s4146_s27, %s3753_s22  ;;  %p3762_p9 = scmp.lt.s32.totalorder %s3753_s22, %s3753_s22 }
  0x44   : > { %p3756_p2 = pnand %p3754_p0, %p4158_p8  ;;  %p3763_p3 = por %p3762_p9, %p3761_p7 }
  0x46   : > { %p3757_p5 = pneg %p3756_p2 }
  0x48   : > { %p3764_p10 = pnand %p3763_p3, %p3757_p5 }
  0x4a   : > { %3767 = shalt.err (!%p3764_p10)
}
  0x4b   : > { %3609 = dma.hbm_to_vmem [thread:$0]  (!%p4142_p6), %s4937_s4, 96, %s4146_s27, [#allocation6]  }
  0x4c   : > { %s4938_s5 = sld [smem:[#allocation28_spill]] }
  0x52   : > { %s3768_s14 = scalar_lea.hbm %s4938_s5, 1536 }
  0x53   : > { %p3769_p11 = scmp.ne.s32.totalorder %s4938_s5, %s3768_s14  ;;  %p3775_p0 = scmp.lt.u32.totalorder %s3768_s14, %s4938_s5 }
  0x55   : > { %p3771_p12 = pnand %p3769_p11, %p4158_p8 }
  0x57   : > { %p3772_p13 = pneg %p3771_p12 }
  0x59   : > { %p3777_p2 = pnand %p3775_p0, %p3772_p13 }
  0x5b   : > { %3780 = shalt.err (!%p3777_p2)
}
  0x5c   : > { %s3781_s27 = scalar_lea.vmem %s4148_s29, 1536  ;;  %p3789_p3 = scmp.lt.s32.totalorder %s4148_s29, %s4148_s29 }
  0x5d   : > { %p3782_p5 = scmp.ne.s32.totalorder %s4148_s29, %s3781_s27  ;;  %p3790_p10 = scmp.lt.s32.totalorder %s3781_s27, %s3781_s27 }
  0x5f   : > { %p3784_p7 = pnand %p3782_p5, %p4158_p8  ;;  %p3791_p11 = por %p3790_p10, %p3789_p3 }
  0x61   : > { %p3785_p9 = pneg %p3784_p7 }
  0x63   : > { %p3792_p12 = pnand %p3791_p11, %p3785_p9 }
  0x65   : > { %3795 = shalt.err (!%p3792_p12)
}
  0x66   : > { %s4035_s22 = smov 384   ;;  %s4036_s2 = smov 24  }
  0x67   : > { %3612 = dma.hbm_to_vmem [thread:$0]  (!%p4142_p6), %s4938_s5, 1536, %s4148_s29, [#allocation9], %s4035_s22, %s4035_s22, %s4036_s2  }
  0x68   : > { %s4229_s13 = sadd.s32 1, %s4028_s20   ;;  %s35_s14 = sadd.s32 1, %s4024_s19 }
  0x69   : > { %s32_s15 = ssub.s32 %s4028_s20, %s4229_s13  ;;  %p42_p13 = scmp.ne.s32.totalorder %s4024_s19, %s4020_s18 }
  0x6a   : > { %p33_p0 = scmp.eq.s32.totalorder %s32_s15, 0  ;;  %p43_p2 = scmp.eq.s32.totalorder %s4028_s20, 0 }
  0x6b   : > { %p48_p5 = scmp.ne.s32.totalorder %s4020_s18, %s4016_s17  ;;  %p3635_p7 = scmp.lt.s32.totalorder %s4028_s20, 3 }
  0x6c   : > { %s4241_s21 = scalar_select %p33_p0, %s4024_s19, %s35_s14  }
  0x6d   : > { %p44_p9 = por %p43_p2, %p42_p13  ;;  %p4245_p3 = por %p4918_p1, %p48_p5 }
  0x6e   : > { %s393_s28 = sand.u32 1, %s4028_s20   ;;  %s395_s29 = sand.u32 1, %s4024_s19  }
  0x6f   : > { %s4939_s26 = scalar_select %p4245_p3, 1, 0 }
  0x70   : > { %s3565_s27 = smul.u32 24, %s395_s29  ;;  %p4252_p10 = pnand %p3635_p7, %p44_p9 }
  0x71   : > { %s3566_s22 = smul.u32 384, %s4028_s20  ;;  %s4941_s0 = sld [smem:[#allocation24_spill]] }
  0x72   : > { %s4940_s2 = scalar_select %p4252_p10, 1, 0 }
  0x73   : > { %s4256_s17 = smul.u32 1152, %s395_s29  ;;  %s397_s15 = scalar_lea.vmem [#allocation2], %s3565_s27 }
  0x74   : > { %s405_s30 = sshll.u32 %s397_s15, 4  ;;  %s4265_s12 = scalar_lea.sflag [#allocation3], %s393_s28  ;;  %s4263_s30 = int_to_ptr.vmem [resolvable:$true] %s405_s30 }
  0x75   : > { %p4923_p12 = pneg %p4252_p10 }
  0x77   : > { %s4261_s14 = scalar_lea.hbm %s4941_s0, %s3566_s22  ;;  %s3801_s8 = scalar_lea.hbm %s4941_s0, 1152 }
  0x78   : > { %s3796_s3 = scalar_lea.hbm %s4261_s14, 384  ;;  %p3802_p2 = scmp.lt.u32.totalorder %s4261_s14, %s4941_s0 }
  0x79   : > { %p3797_p11 = scmp.ne.s32.totalorder %s4261_s14, %s3796_s3  ;;  %p3803_p5 = scmp.lt.u32.totalorder %s3801_s8, %s3796_s3 }
  0x7a   : > { %p3805_p9 = scmp.lt.u32.totalorder %s3796_s3, %s4261_s14 }
  0x7b   : > { %p3799_p13 = pnand %p4923_p12, %p3797_p11  ;;  %p3804_p7 = por %p3803_p5, %p3802_p2 }
  0x7d   : > { %p3800_p0 = pneg %p3799_p13  ;;  %p3806_p1 = por %p3805_p9, %p3804_p7 }
  0x7f   : > { %p3807_p3 = pnand %p3806_p1, %p3800_p0 }
  0x81   : > { %3810 = shalt.err (!%p3807_p3)
}
  0x82   : > { %s3811_s28 = scalar_lea.vmem %s4263_s30, 384  ;;  %s4037_s27 = smov [#allocation2]  }
  0x83   : > { %p3812_p11 = scmp.ne.s32.totalorder %s4263_s30, %s3811_s28  ;;  %s3816_s15 = sshll.u32 %s4037_s27, 4  ;;  %s3817_s15 = int_to_ptr.vmem [resolvable:$false] %s3816_s15 }
  0x84   : > { %s3818_s4 = scalar_lea.vmem %s3817_s15, 768  ;;  %p3819_p6 = scmp.lt.s32.totalorder %s4263_s30, %s3817_s15 }
  0x85   : > { %p3814_p13 = pnand %p3812_p11, %p4923_p12  ;;  %p3820_p2 = scmp.lt.s32.totalorder %s3818_s4, %s3811_s28 }
  0x87   : > { %p3815_p4 = pneg %p3814_p13  ;;  %p3821_p5 = por %p3820_p2, %p3819_p6 }
  0x89   : > { %p3822_p7 = pnand %p3821_p5, %p3815_p4 }
  0x8b   : > { %3825 = shalt.err (!%p3822_p7)
}
  0x8c   : > { %3625 = dma.hbm_to_vmem [thread:$0]  (!%p4252_p10), %s4261_s14, 384, %s4263_s30, %s4265_s12  }
  0x8d   : > { %s4038_s3 = smov [#allocation11]   ;;  %s430_s22 = scalar_lea.vmem [#allocation10], %s4256_s17 }
  0x8e   : > { %s360_s29 = sshll.u32 %s4038_s3, 4  ;;  %s4294_s8 = sshll.u32 %s430_s22, 4  ;;  %s361_s29 = int_to_ptr.vmem [resolvable:$true] %s360_s29  ;;  %s4359_s8 = int_to_ptr.vmem [resolvable:$true] %s4294_s8 }
  0x8f   : > { %s3826_s28 = scalar_lea.hbm %s4910_s7, 96 }
  0x90   : > { %p3827_p1 = scmp.ne.s32.totalorder %s4910_s7, %s3826_s28  ;;  %p3833_p3 = scmp.lt.u32.totalorder %s3826_s28, %s4910_s7 }
  0x92   : > { %p3829_p4 = pnand %p3827_p1, %p4158_p8 }
  0x94   : > { %p3830_p6 = pneg %p3829_p4 }
  0x96   : > { %p3835_p0 = pnand %p3833_p3, %p3830_p6 }
  0x98   : > { %3838 = shalt.err (!%p3835_p0)
}
  0x99   : > { %s3839_s30 = scalar_lea.vmem %s361_s29, 96  ;;  %p3847_p2 = scmp.lt.s32.totalorder %s361_s29, %s361_s29 }
  0x9a   : > { %p3840_p9 = scmp.ne.s32.totalorder %s361_s29, %s3839_s30  ;;  %p3848_p5 = scmp.lt.s32.totalorder %s3839_s30, %s3839_s30 }
  0x9c   : > { %p3842_p11 = pnand %p3840_p9, %p4158_p8  ;;  %p3849_p7 = por %p3848_p5, %p3847_p2 }
  0x9e   : > { %p3843_p13 = pneg %p3842_p11 }
  0xa0   : > { %p3850_p12 = pnand %p3849_p7, %p3843_p13 }
  0xa2   : > { %3853 = shalt.err (!%p3850_p12)
}
  0xa3   : > { %p4942_p1 = scmp.ne.s32.totalorder %s4934_s25, 0  ;;  %s4039_s0 = smov [#allocation12]  }
  0xa4   : > { %s371_s5 = sshll.u32 %s4039_s0, 4  ;;  %s4040_s3 = smov [#allocation13]   ;;  %s372_s5 = int_to_ptr.vmem [resolvable:$true] %s371_s5 }
  0xa5   : > { %3615 = dma.hbm_to_vmem [thread:$0]  (!%p4942_p1), %s4910_s7, 96, %s361_s29, [#allocation6]  }
  0xa6   : > { %s382_s22 = sshll.u32 %s4040_s3, 4  ;;  %s3854_s28 = scalar_lea.hbm %s4912_s9, 16  ;;  %s4314_s22 = int_to_ptr.vmem [resolvable:$true] %s382_s22 }
  0xa7   : > { %p3855_p12 = scmp.ne.s32.totalorder %s4912_s9, %s3854_s28  ;;  %p3861_p3 = scmp.lt.u32.totalorder %s3854_s28, %s4912_s9 }
  0xa9   : > { %p3857_p4 = pnand %p3855_p12, %p4158_p8 }
  0xab   : > { %p3858_p6 = pneg %p3857_p4 }
  0xad   : > { %p3863_p0 = pnand %p3861_p3, %p3858_p6 }
  0xaf   : > { %3866 = shalt.err (!%p3863_p0)
}
  0xb0   : > { %s3867_s17 = scalar_lea.vmem %s372_s5, 16  ;;  %s3874_s14 = scalar_lea.vmem %s372_s5, 32 }
  0xb1   : > { %p3868_p9 = scmp.ne.s32.totalorder %s372_s5, %s3867_s17  ;;  %p3875_p2 = scmp.lt.s32.totalorder %s372_s5, %s372_s5 }
  0xb2   : > { %p3876_p5 = scmp.lt.s32.totalorder %s3874_s14, %s3867_s17 }
  0xb3   : > { %p3870_p11 = pnand %p3868_p9, %p4158_p8 }
  0xb4   : > { %p3877_p7 = por %p3876_p5, %p3875_p2 }
  0xb5   : > { %p3871_p13 = pneg %p3870_p11 }
  0xb7   : > { %p3878_p10 = pnand %p3877_p7, %p3871_p13 }
  0xb9   : > { %3881 = shalt.err (!%p3878_p10)
}
  0xba   : > { %3618 = dma.hbm_to_vmem [thread:$0]  (!%p4942_p1), %s4912_s9, 16, %s372_s5, [#allocation9]  }
  0xbb   : > { %s3882_s28 = scalar_lea.hbm %s4913_s10, 112 }
  0xbc   : > { %p3883_p12 = scmp.ne.s32.totalorder %s4913_s10, %s3882_s28  ;;  %p3889_p10 = scmp.lt.u32.totalorder %s3882_s28, %s4913_s10 }
  0xbe   : > { %p3885_p4 = pnand %p3883_p12, %p4158_p8 }
  0xc0   : > { %p3886_p6 = pneg %p3885_p4 }
  0xc2   : > { %p3891_p3 = pnand %p3889_p10, %p3886_p6 }
  0xc4   : > { %3894 = shalt.err (!%p3891_p3)
}
  0xc5   : > { %s3895_s5 = scalar_lea.vmem %s4314_s22, 112  ;;  %s3902_s17 = scalar_lea.vmem %s4314_s22, 128 }
  0xc6   : > { %p3896_p0 = scmp.ne.s32.totalorder %s4314_s22, %s3895_s5  ;;  %p3903_p13 = scmp.lt.s32.totalorder %s4314_s22, %s4314_s22 }
  0xc7   : > { %p3904_p2 = scmp.lt.s32.totalorder %s3902_s17, %s3895_s5 }
  0xc8   : > { %p3898_p9 = pnand %p3896_p0, %p4158_p8 }
  0xc9   : > { %p3905_p5 = por %p3904_p2, %p3903_p13 }
  0xca   : > { %p3899_p11 = pneg %p3898_p9 }
  0xcc   : > { %p3906_p7 = pnand %p3905_p5, %p3899_p11 }
  0xce   : > { %3909 = shalt.err (!%p3906_p7)
}
  0xcf   : > { %3621 = dma.hbm_to_vmem [thread:$0]  (!%p4942_p1), %s4913_s10, 112, %s4314_s22, [#allocation14]  }
  0xd0   : > { %s3636_s16 = smul.u32 18432, %s4028_s20  ;;  %p4943_p12 = scmp.ne.s32.totalorder %s4940_s2, 0 }
  0xd1   : > { %s3915_s15 = scalar_lea.hbm %s4909_s6, 55296 }
  0xd2   : > { %s4365_s27 = scalar_lea.hbm %s4909_s6, %s3636_s16  ;;  %p4944_p4 = pneg %p4943_p12 }
  0xd3   : > { %s3910_s25 = scalar_lea.hbm %s4365_s27, 18432  ;;  %p3916_p1 = scmp.lt.u32.totalorder %s4365_s27, %s4909_s6 }
  0xd4   : > { %p3911_p8 = scmp.ne.s32.totalorder %s4365_s27, %s3910_s25  ;;  %p3917_p3 = scmp.lt.u32.totalorder %s3915_s15, %s3910_s25 }
  0xd5   : > { %p3919_p9 = scmp.lt.u32.totalorder %s3910_s25, %s4365_s27 }
  0xd6   : > { %p3913_p6 = pnand %p3911_p8, %p4944_p4  ;;  %p3918_p0 = por %p3917_p3, %p3916_p1 }
  0xd8   : > { %p3914_p10 = pneg %p3913_p6  ;;  %p3920_p11 = por %p3919_p9, %p3918_p0 }
  0xda   : > { %p3921_p13 = pnand %p3920_p11, %p3914_p10 }
  0xdc   : > { %3924 = shalt.err (!%p3921_p13)
}
  0xdd   : > { %s3925_s30 = scalar_lea.vmem %s4359_s8, 18432  ;;  %p4945_p5 = pmov %p4944_p4 }
  0xde   : > { %p3926_p2 = scmp.ne.s32.totalorder %s4359_s8, %s3925_s30  ;;  %s4041_s29 = smov [#allocation10]  }
  0xdf   : > { %s3930_s5 = sshll.u32 %s4041_s29, 4  ;;  %s3931_s5 = int_to_ptr.vmem [resolvable:$false] %s3930_s5 }
  0xe0   : > { %p3928_p7 = pnand %p3926_p2, %p4945_p5  ;;  %s3932_s17 = scalar_lea.vmem %s3931_s5, 36864 }
  0xe1   : > { %p3933_p4 = scmp.lt.s32.totalorder %s4359_s8, %s3931_s5  ;;  %p3934_p6 = scmp.lt.s32.totalorder %s3932_s17, %s3925_s30 }
  0xe2   : > { %p3929_p8 = pneg %p3928_p7 }
  0xe3   : > { %p3935_p1 = por %p3934_p6, %p3933_p4 }
  0xe5   : > { %p3936_p3 = pnand %p3935_p1, %p3929_p8 }
  0xe7   : > { %3939 = shalt.err (!%p3936_p3)
}
  0xe8   : > { %s4946_s14 = smov 48   ;;  %s4947_s0 = smov 768  }
  0xe9   : > { %3628 = dma.hbm_to_vmem [thread:$0]  (!%p4943_p12), %s4365_s27, 18432, %s4359_s8, %s4265_s12, %s4947_s0, %s4947_s0, %s4946_s14  }
  0xea   : > { %p4948_p10 = scmp.ne.s32.totalorder %s4933_s24, 0 }
  0xeb   : > { %s461_s16 = sand.u32 (!%p4948_p10), 1, %s4126_s23   ;;  %s463_s3 = sand.u32 (!%p4948_p10), 1, %s4020_s18  }
  0xec   : > { %459 = sbr.rel (%p4948_p10) target bundleno = 1356 (0x54c), region = 64  ;;  %s462_s25 = scalar_lea.sflag (!%p4948_p10), [#allocation3], %s461_s16 }
  0xed   : > { %s3569_s11 = smul.u32 (!%p4948_p10), 24, %s463_s3  ;;  %p4949_p0 = scmp.ne.s32.totalorder (!%p4948_p10), %s4939_s26, 0 }
  0xef   : > { %s4398_s28 = scalar_lea.vmem (!%p4948_p10), [#allocation2], %s3569_s11 }
  0xf3   : > { %3983 = dma.done.wait (%p4949_p0), %s462_s25, 384  }
  0xf4   : > { %3985 = vsyncadd (%p4949_p0), %s462_s25, 4294966912  ;;  %p4950_p9 = scmp.eq.s32.totalorder %s4126_s23, 0 }
  0xf6   : > { %3987 = dma.done.wait (%p4950_p9), [#allocation6], 18528   ;;  %p4951_p12 = pmov %p4950_p9 }
  0xf7   : > { %p4952_p11 = pmov %p4950_p9 }
  0xf8   : > { %3989 = vsyncadd (%p4951_p12), [#allocation6], 4294948768 }
  0xf9   : > { %3991 = dma.done.wait (%p4952_p11), [#allocation9], 1536   ;;  %p4953_p13 = pmov %p4950_p9 }
  0xfa   : > { %s3570_s24 = smul.u32 1152, %s463_s3 }
  0xfb   : > { %3993 = vsyncadd (%p4953_p13), [#allocation9], 4294965760 }
  0xfc   : > { %s4412_s12 = scalar_lea.vmem [#allocation10], %s3570_s24 }
  0xfd   : > { %3995 = dma.done.wait (%p4949_p0), %s462_s25, 18432  }
  0xfe   : > { %3997 = vsyncadd (%p4949_p0), %s462_s25, 4294948864  ;;  %p4954_p2 = pmov %p4950_p9 }
 0x100   : > { %3999 = dma.done.wait (%p4954_p2), [#allocation6], 96   ;;  %p4955_p5 = pmov %p4954_p2 }
 0x101   : > { %p4956_p7 = pmov %p4954_p2 }
 0x102   : > { %4001 = vsyncadd (%p4955_p5), [#allocation6], 4294967200 }
 0x103   : > { %4003 = dma.done.wait (%p4956_p7), [#allocation9], 16   ;;  %p4957_p8 = pmov %p4954_p2 }
 0x104   : > { %p4958_p4 = pmov %p4954_p2 }
 0x105   : > { %4005 = vsyncadd (%p4957_p8), [#allocation9], 4294967280 }
 0x106   : > { %4007 = dma.done.wait (%p4958_p4), [#allocation14], 112   ;;  %p4959_p6 = pmov %p4954_p2 }
 0x107   : > { %p550_p1 = scmp.lt.s32.totalorder %s4126_s23, 2  ;;  %s559_s26 = smul.u32 96, %s4126_s23 }
 0x108   : > { %4009 = vsyncadd (%p4959_p6), [#allocation14], 4294967184  ;;  %s4960_s30 = sld [smem:[#allocation25_spill]]  ;;  %s4961_s0 = sld [smem:[#allocation29_spill]] }
 0x109   : > { %s551_s2 = scalar_select %p550_p1, %s4126_s23, 2 }
 0x10a   : > { %p560_p3 = scmp.lt.s32.totalorder %s559_s26, 287  ;;  %p4962_p10 = scmp.ne.s32.totalorder %s4126_s23, 0 }
 0x10b   : > { %s3375_s8 = sshll.u32 %s551_s2, 2  ;;  %v572_v0 = vlaneseq (!%p4962_p10)  ;;  %v570_v2 = vld [vmem:[#allocation13] sm:$0x7f] (!%p4962_p10)  ;;  %vm610_vm0 = vcmask (!%p4962_p10), 44032  }
 0x10c   : > { %s4436_s15 = scalar_lea.vmem %s4904_s1, %s3375_s8  ;;  %s4969_s26 = smov (!%p560_p3, %s559_s26), 287 }
 0x10d   : > { %s3377_s5 = sshll.u32 %s4969_s26, 1  ;;  %569 = sbr.rel (%p4962_p10) target bundleno = 279 (0x117), region = 100  ;;  %v573_v1 = vshrl.u32 (!%p4962_p10), %v572_v0, 7 }
 0x10e   : > { %s4441_s29 = scalar_lea.vmem %s4960_s30, %s3375_s8  ;;  %s4446_s16 = scalar_lea.vmem %s4961_s0, %s3377_s5 }
 0x10f   : > { %v574_v3 = vsub.s32 (!%p4962_p10), 0, %v573_v1  ;;  %v578_v4 = vsub.s32 (!%p4962_p10), 1, %v573_v1  ;;  %v582_v5 = vsub.s32 (!%p4962_p10), 2, %v573_v1  ;;  %v586_v6 = vsub.s32 (!%p4962_p10), 3, %v573_v1 }
 0x110   : > { %v590_v7 = vsub.s32 (!%p4962_p10), 4, %v573_v1  ;;  %v594_v8 = vsub.s32 (!%p4962_p10), 5, %v573_v1  ;;  %v598_v9 = vsub.s32 (!%p4962_p10), 6, %v573_v1 }
 0x111   : > { %v575_v10 = vrot.slane (!%p4962_p10), %v570_v2, %v574_v3  ;;  %v579_v11 = vrot.slane (!%p4962_p10), %v570_v2, %v578_v4  ;;  %v583_v12 = vrot.slane (!%p4962_p10), %v570_v2, %v582_v5  ;;  %v587_v13 = vrot.slane (!%p4962_p10), %v570_v2, %v586_v6 }
 0x112   : > { %v591_v14 = vrot.slane (!%p4962_p10), %v570_v2, %v590_v7  ;;  %v595_v15 = vrot.slane (!%p4962_p10), %v570_v2, %v594_v8  ;;  %v599_v16 = vrot.slane (!%p4962_p10), %v570_v2, %v598_v9 }
 0x113   : > { %v601_v17 = vcombine.low (!%p4962_p10), %v575_v10, %v579_v11  ;;  %v602_v18 = vcombine.low (!%p4962_p10), %v583_v12, %v587_v13 }
 0x114   : > { %v603_v19 = vcombine.low %v591_v14, %v595_v15  ;;  %611 = vst.msk [vmem:[#allocation15 + $0x18] sm:$0xf] %vm610_vm0, %v599_v16 }
 0x115   : > { %607 = vst [vmem:[#allocation15] sm:$0xff] %v601_v17  ;;  %608 = vst [vmem:[#allocation15 + $0x8] sm:$0xff] %v602_v18 }
 0x116   : > { %609 = vst [vmem:[#allocation15 + $0x10] sm:$0xff] %v603_v19 }
 0x117 PF: > { %v641_v20 = vld [vmem:[#allocation5 + $0x8] sm:$0xff]  ;;  %v643_v21 = vld [vmem:[#allocation5 + $0x18] sm:$0xff]  ;;  %v640_v22 = vld [vmem:[#allocation5] sm:$0xff]  ;;  %v4042_v28 = vmov 0   ;;  %vm1549_vm2 = vcmask 1044480   ;;  %vm1545_vm3 = vcmask 211968  }
 0x118   : > { %v785_v23 = vunpack.c.l.s8.bf16 %v641_v20  ;;  %v791_v24 = vunpack.c.h.s8.bf16 %v641_v20  ;;  %v787_v25 = vunpack.c.l.s8.bf16 %v643_v21  ;;  %v793_v26 = vunpack.c.h.s8.bf16 %v643_v21  ;;  %v642_v27 = vld [vmem:[#allocation5 + $0x10] sm:$0xff]  ;;  %3690 = vset.pattern.permute.xlu0 %v4042_v28  ;;  %v647_v31 = vld [vmem:[#allocation5 + $0x38] sm:$0xff]  ;;  %v649_v32 = vld [vmem:[#allocation5 + $0x48] sm:$0xff]  ;;  %s4044_s3 = smov [#allocation15]   ;;  %p3643_p0 = scmp.eq.s32.totalorder %s4126_s23, 2 }
 0x119   : > { %v784_v29 = vunpack.c.l.s8.bf16 %v640_v22  ;;  %v786_v30 = vunpack.c.l.s8.bf16 %v642_v27  ;;  %v790_v33 = vunpack.c.h.s8.bf16 %v640_v22  ;;  %v792_v34 = vunpack.c.h.s8.bf16 %v642_v27  ;;  %v646_v37 = vld [vmem:[#allocation5 + $0x30] sm:$0xff]  ;;  %v648_v38 = vld [vmem:[#allocation5 + $0x40] sm:$0xff]  ;;  %v653_v43 = vld [vmem:[#allocation5 + $0x68] sm:$0xff]  ;;  %s3194_s11 = sshll.u32 %s4044_s3, 4  ;;  %s3195_s11 = int_to_ptr.vmem [resolvable:$true] %s3194_s11 }
 0x11a   : > { %1072 = vmatprep.subr.bf16.mxu0 %v785_v23  ;;  %1195 = vmatprep.subr.bf16.mxu1 %v787_v25  ;;  %v797_v35 = vunpack.c.l.s8.bf16 %v647_v31  ;;  %v799_v36 = vunpack.c.l.s8.bf16 %v649_v32  ;;  %v796_v39 = vunpack.c.l.s8.bf16 %v646_v37  ;;  %v798_v40 = vunpack.c.l.s8.bf16 %v648_v38  ;;  %v655_v44 = vld [vmem:[#allocation5 + $0x78] sm:$0xff]  ;;  %v630_v47 = vld [vmem:[%s4436_s15] sm:$0xf]  ;;  %v652_v50 = vld [vmem:[#allocation5 + $0x60] sm:$0xff]  ;;  %s3940_s25 = scalar_lea.vmem %s3195_s11, 448  ;;  %p3947_p13 = scmp.lt.s32.totalorder %s3195_s11, %s3195_s11 }
 0x11b   : > { %1073 = vmatpush1.bf16.msra.mxu0 %v784_v29  ;;  %1196 = vmatpush1.bf16.msra.mxu1 %v786_v30  ;;  %v803_v41 = vunpack.c.h.s8.bf16 %v647_v31  ;;  %v805_v42 = vunpack.c.h.s8.bf16 %v649_v32  ;;  %v802_v45 = vunpack.c.h.s8.bf16 %v646_v37  ;;  %v804_v46 = vunpack.c.h.s8.bf16 %v648_v38  ;;  %v654_v51 = vld [vmem:[#allocation5 + $0x70] sm:$0xff]  ;;  %v659_v58 = vld [vmem:[#allocation5 + $0x98] sm:$0xff]  ;;  %v661_v59 = vld [vmem:[#allocation5 + $0xa8] sm:$0xff]  ;;  %p3941_p9 = scmp.ne.s32.totalorder %s3195_s11, %s3940_s25  ;;  %p3948_p2 = scmp.lt.s32.totalorder %s3940_s25, %s3940_s25 }
 0x11c   : > { %1074 = vmatprep.subr.bf16.mxu0 %v791_v24  ;;  %1197 = vmatprep.subr.bf16.mxu1 %v793_v26  ;;  %v809_v48 = vunpack.c.l.s8.bf16 %v653_v43  ;;  %v811_v49 = vunpack.c.l.s8.bf16 %v655_v44  ;;  %v4453_v52 = vld [vmem:[%s4398_s28] sm:$0xff]  ;;  %v808_v53 = vunpack.c.l.s8.bf16 %v652_v50  ;;  %v810_v54 = vunpack.c.l.s8.bf16 %v654_v51  ;;  %v660_v2 = vld [vmem:[#allocation5 + $0xa0] sm:$0xff]  ;;  %v667_v9 = vld [vmem:[#allocation5 + $0xd8] sm:$0xff] }
 0x11d   : > { %634 = vperm.xlu0 %3690, %v630_v47   ;;  %v815_v55 = vunpack.c.h.s8.bf16 %v653_v43  ;;  %v817_v56 = vunpack.c.h.s8.bf16 %v655_v44  ;;  %v618_v57 = vcombine.high %v4453_v52, %v4453_v52  ;;  %v814_v61 = vunpack.c.h.s8.bf16 %v652_v50  ;;  %v658_v1 = vld [vmem:[#allocation5 + $0x90] sm:$0xff]  ;;  %v665_v8 = vld [vmem:[#allocation5 + $0xc8] sm:$0xff]  ;;  %v664_v10 = vld [vmem:[#allocation5 + $0xc0] sm:$0xff]  ;;  %p3942_p12 = pnand %p3941_p9, %p3643_p0  ;;  %p3949_p5 = por %p3948_p2, %p3947_p13 }
 0x11e   : > { %v816_v62 = vunpack.c.h.s8.bf16 %v654_v51  ;;  %v821_v63 = vunpack.c.l.s8.bf16 %v659_v58  ;;  %v823_v0 = vunpack.c.l.s8.bf16 %v661_v59  ;;  %v1697_v3 = vld [vmem:[%s4441_s29] sm:$0xf]  ;;  %v820_v4 = vunpack.c.l.s8.bf16 %v658_v1  ;;  %v671_v20 = vld [vmem:[#allocation5 + $0xf8] sm:$0xff]  ;;  %v673_v21 = vld [vmem:[#allocation5 + $0x108] sm:$0xff] }
 0x11f   : > { %1075 = vmatpush1.bf16.msra.mxu0 %v790_v33  ;;  %1198 = vmatpush1.bf16.msra.mxu1 %v792_v34  ;;  %v4457_v60 = vpack.c.bf16 %v618_v57, %v618_v57  ;;  %v822_v5 = vunpack.c.l.s8.bf16 %v660_v2  ;;  %v827_v6 = vunpack.c.h.s8.bf16 %v659_v58  ;;  %v829_v7 = vunpack.c.h.s8.bf16 %v661_v59  ;;  %v666_v11 = vld [vmem:[#allocation5 + $0xd0] sm:$0xff]  ;;  %v672_v27 = vld [vmem:[#allocation5 + $0x100] sm:$0xff]  ;;  %v677_v33 = vld [vmem:[#allocation5 + $0x128] sm:$0xff]  ;;  %p3943_p11 = pneg %p3942_p12 }
 0x120   : > { %1076 = vmatprep.subr.bf16.mxu0 %v797_v35  ;;  %1199 = vmatprep.subr.bf16.mxu1 %v799_v36  ;;  %v826_v12 = vunpack.c.h.s8.bf16 %v658_v1  ;;  %v828_v13 = vunpack.c.h.s8.bf16 %v660_v2  ;;  %v833_v14 = vunpack.c.l.s8.bf16 %v665_v8  ;;  %v835_v15 = vunpack.c.l.s8.bf16 %v667_v9  ;;  %v670_v26 = vld [vmem:[#allocation5 + $0xf0] sm:$0xff]  ;;  %v679_v34 = vld [vmem:[#allocation5 + $0x138] sm:$0xff]  ;;  %v689_v58 = vld [vmem:[#allocation5 + $0x188] sm:$0xff] }
 0x121   : > { %1104 = vmatprep.mubr.bf16.mxu0 %v4457_v60  ;;  %1227 = vmatprep.mubr.bf16.mxu1 %v4457_v60  ;;  %v832_v16 = vunpack.c.l.s8.bf16 %v664_v10  ;;  %v834_v17 = vunpack.c.l.s8.bf16 %v666_v11  ;;  %v839_v18 = vunpack.c.h.s8.bf16 %v665_v8  ;;  %v841_v19 = vunpack.c.h.s8.bf16 %v667_v9  ;;  %v682_v51 = vld [vmem:[#allocation5 + $0x150] sm:$0xff]  ;;  %v691_v59 = vld [vmem:[#allocation5 + $0x198] sm:$0xff]  ;;  %v688_v2 = vld [vmem:[#allocation5 + $0x180] sm:$0xff]  ;;  %p3950_p7 = pnand %p3949_p5, %p3943_p11 }
 0x122   : > { %1700 = vperm.xlu0 %3690, %v1697_v3   ;;  %v838_v22 = vunpack.c.h.s8.bf16 %v664_v10  ;;  %v840_v23 = vunpack.c.h.s8.bf16 %v666_v11  ;;  %v845_v24 = vunpack.c.l.s8.bf16 %v671_v20  ;;  %v847_v25 = vunpack.c.l.s8.bf16 %v673_v21  ;;  %v690_v3 = vld [vmem:[#allocation5 + $0x190] sm:$0xff]  ;;  %v695_v10 = vld [vmem:[#allocation5 + $0x1b8] sm:$0xff]  ;;  %v697_v11 = vld [vmem:[#allocation5 + $0x1c8] sm:$0xff] }
 0x123   : > { %1077 = vmatpush1.bf16.msra.mxu0 %v796_v39  ;;  %1200 = vmatpush1.bf16.msra.mxu1 %v798_v40  ;;  %v844_v29 = vunpack.c.l.s8.bf16 %v670_v26  ;;  %v846_v30 = vunpack.c.l.s8.bf16 %v672_v27  ;;  %v851_v31 = vunpack.c.h.s8.bf16 %v671_v20  ;;  %v853_v32 = vunpack.c.h.s8.bf16 %v673_v21  ;;  %v676_v39 = vld [vmem:[#allocation5 + $0x120] sm:$0xff]  ;;  %v678_v40 = vld [vmem:[#allocation5 + $0x130] sm:$0xff] }
 0x124   : > { %1078 = vmatprep.subr.bf16.mxu0 %v803_v41  ;;  %1201 = vmatprep.subr.bf16.mxu1 %v805_v42  ;;  %v850_v35 = vunpack.c.h.s8.bf16 %v670_v26  ;;  %v852_v36 = vunpack.c.h.s8.bf16 %v672_v27  ;;  %v857_v37 = vunpack.c.l.s8.bf16 %v677_v33  ;;  %v859_v38 = vunpack.c.l.s8.bf16 %v679_v34 }
 0x125   : > { %v856_v41 = vunpack.c.l.s8.bf16 %v676_v39  ;;  %v858_v42 = vunpack.c.l.s8.bf16 %v678_v40  ;;  %v863_v43 = vunpack.c.h.s8.bf16 %v677_v33  ;;  %v865_v44 = vunpack.c.h.s8.bf16 %v679_v34 }
 0x126   : > { %v862_v47 = vunpack.c.h.s8.bf16 %v676_v39  ;;  %v883_v1 = vunpack.c.l.s8.bf16 %v691_v59  ;;  %v887_v8 = vunpack.c.h.s8.bf16 %v689_v58  ;;  %v889_v9 = vunpack.c.h.s8.bf16 %v691_v59 }
 0x127   : > { %1079 = vmatpush1.bf16.msra.mxu0 %v802_v45  ;;  %1202 = vmatpush1.bf16.msra.mxu1 %v804_v46  ;;  %v683_v45 = vld [vmem:[#allocation5 + $0x158] sm:$0xff]  ;;  %v685_v46 = vld [vmem:[#allocation5 + $0x168] sm:$0xff]  ;;  %v899_v20 = vunpack.c.h.s8.bf16 %v695_v10  ;;  %v901_v21 = vunpack.c.h.s8.bf16 %v697_v11  ;;  %vm3185_vm4 = vcmask 44032  }
 0x128   : > { %1080 = vmatprep.subr.bf16.mxu0 %v809_v48  ;;  %1203 = vmatprep.subr.bf16.mxu1 %v811_v49  ;;  %v864_v48 = vunpack.c.h.s8.bf16 %v678_v40  ;;  %v869_v49 = vunpack.c.l.s8.bf16 %v683_v45  ;;  %v871_v50 = vunpack.c.l.s8.bf16 %v685_v46  ;;  %v877_v57 = vunpack.c.h.s8.bf16 %v685_v46 }
 0x12b   : > { %1081 = vmatpush1.bf16.msra.mxu0 %v808_v53  ;;  %1204 = vmatpush1.bf16.msra.mxu1 %v810_v54  ;;  %v684_v53 = vld [vmem:[#allocation5 + $0x160] sm:$0xff]  ;;  %v868_v54 = vunpack.c.l.s8.bf16 %v682_v51 }
 0x12c   : > { %1082 = vmatprep.subr.bf16.mxu0 %v815_v55  ;;  %1205 = vmatprep.subr.bf16.mxu1 %v817_v56  ;;  %v870_v55 = vunpack.c.l.s8.bf16 %v684_v53  ;;  %v875_v56 = vunpack.c.h.s8.bf16 %v683_v45 }
 0x12f   : > { %1083 = vmatpush1.bf16.msra.mxu0 %v814_v61  ;;  %1206 = vmatpush1.bf16.msra.mxu1 %v816_v62  ;;  %v4463_v61 = vld [vmem:[%s4398_s28 + $0x8] sm:$0xff]  ;;  %v874_v62 = vunpack.c.h.s8.bf16 %v682_v51 }
 0x130   : > { %1084 = vmatprep.subr.bf16.mxu0 %v821_v63  ;;  %1207 = vmatprep.subr.bf16.mxu1 %v823_v0  ;;  %v876_v63 = vunpack.c.h.s8.bf16 %v684_v53  ;;  %v881_v0 = vunpack.c.l.s8.bf16 %v689_v58 }
 0x133   : > { %1085 = vmatpush1.bf16.msra.mxu0 %v820_v4  ;;  %1208 = vmatpush1.bf16.msra.mxu1 %v822_v5  ;;  %v619_v4 = vcombine.high %v4463_v61, %v4463_v61  ;;  %v4469_v5 = vpack.c.bf16 %v4453_v52, %v4453_v52  ;;  %v886_v52 = vunpack.c.h.s8.bf16 %v688_v2 }
 0x134   : > { %1086 = vmatprep.subr.bf16.mxu0 %v827_v6  ;;  %1209 = vmatprep.subr.bf16.mxu1 %v829_v7  ;;  %v880_v6 = vunpack.c.l.s8.bf16 %v688_v2  ;;  %v882_v7 = vunpack.c.l.s8.bf16 %v690_v3 }
 0x137   : > { %1087 = vmatpush1.bf16.msra.mxu0 %v826_v12  ;;  %1210 = vmatpush1.bf16.msra.mxu1 %v828_v13  ;;  %v4471_v12 = vpack.c.bf16 %v619_v4, %v619_v4  ;;  %v888_v13 = vunpack.c.h.s8.bf16 %v690_v3  ;;  %v718_v4 = vld [vmem:[#allocation5 + $0x270] sm:$0xff] }
 0x138   : > { %1088 = vmatprep.subr.bf16.mxu0 %v833_v14  ;;  %1211 = vmatprep.subr.bf16.mxu1 %v835_v15  ;;  %v893_v14 = vunpack.c.l.s8.bf16 %v695_v10  ;;  %v895_v15 = vunpack.c.l.s8.bf16 %v697_v11  ;;  %v725_v11 = vld [vmem:[#allocation5 + $0x2a8] sm:$0xff] }
 0x13b   : > { %1089 = vmatpush1.bf16.msra.mxu0 %v832_v16  ;;  %1212 = vmatpush1.bf16.msra.mxu1 %v834_v17  ;;  %v694_v16 = vld [vmem:[#allocation5 + $0x1b0] sm:$0xff]  ;;  %v696_v17 = vld [vmem:[#allocation5 + $0x1c0] sm:$0xff] }
 0x13c   : > { %1090 = vmatprep.subr.bf16.mxu0 %v839_v18  ;;  %1213 = vmatprep.subr.bf16.mxu1 %v841_v19  ;;  %v892_v18 = vunpack.c.l.s8.bf16 %v694_v16  ;;  %v894_v19 = vunpack.c.l.s8.bf16 %v696_v17 }
 0x13f   : > { %1091 = vmatpush1.bf16.msra.mxu0 %v838_v22  ;;  %1214 = vmatpush1.bf16.msra.mxu1 %v840_v23  ;;  %v701_v22 = vld [vmem:[#allocation5 + $0x1e8] sm:$0xff]  ;;  %v703_v23 = vld [vmem:[#allocation5 + $0x1f8] sm:$0xff] }
 0x140   : > { %1092 = vmatprep.subr.bf16.mxu0 %v845_v24  ;;  %1215 = vmatprep.subr.bf16.mxu1 %v847_v25  ;;  %v898_v24 = vunpack.c.h.s8.bf16 %v694_v16  ;;  %v900_v25 = vunpack.c.h.s8.bf16 %v696_v17  ;;  %v905_v26 = vunpack.c.l.s8.bf16 %v701_v22  ;;  %v907_v27 = vunpack.c.l.s8.bf16 %v703_v23  ;;  %v724_v17 = vld [vmem:[#allocation5 + $0x2a0] sm:$0xff] }
 0x141   : > { %v911_v33 = vunpack.c.h.s8.bf16 %v701_v22  ;;  %v913_v34 = vunpack.c.h.s8.bf16 %v703_v23  ;;  %v731_v23 = vld [vmem:[#allocation5 + $0x2d8] sm:$0xff] }
 0x143   : > { %1093 = vmatpush1.bf16.msra.mxu0 %v844_v29  ;;  %1216 = vmatpush1.bf16.msra.mxu1 %v846_v30  ;;  %v700_v29 = vld [vmem:[#allocation5 + $0x1e0] sm:$0xff]  ;;  %v702_v30 = vld [vmem:[#allocation5 + $0x1f0] sm:$0xff] }
 0x144   : > { %1094 = vmatprep.subr.bf16.mxu0 %v851_v31  ;;  %1217 = vmatprep.subr.bf16.mxu1 %v853_v32  ;;  %v904_v31 = vunpack.c.l.s8.bf16 %v700_v29  ;;  %v906_v32 = vunpack.c.l.s8.bf16 %v702_v30 }
 0x147   : > { %1095 = vmatpush1.bf16.msra.mxu0 %v850_v35  ;;  %1218 = vmatpush1.bf16.msra.mxu1 %v852_v36  ;;  %v707_v35 = vld [vmem:[#allocation5 + $0x218] sm:$0xff]  ;;  %v709_v36 = vld [vmem:[#allocation5 + $0x228] sm:$0xff] }
 0x148   : > { %1096 = vmatprep.subr.bf16.mxu0 %v857_v37  ;;  %1219 = vmatprep.subr.bf16.mxu1 %v859_v38  ;;  %v910_v37 = vunpack.c.h.s8.bf16 %v700_v29  ;;  %v912_v38 = vunpack.c.h.s8.bf16 %v702_v30  ;;  %v917_v39 = vunpack.c.l.s8.bf16 %v707_v35  ;;  %v919_v40 = vunpack.c.l.s8.bf16 %v709_v36  ;;  %v730_v30 = vld [vmem:[#allocation5 + $0x2d0] sm:$0xff] }
 0x149   : > { %v923_v45 = vunpack.c.h.s8.bf16 %v707_v35  ;;  %v925_v46 = vunpack.c.h.s8.bf16 %v709_v36  ;;  %v737_v36 = vld [vmem:[#allocation5 + $0x308] sm:$0xff] }
 0x14b   : > { %1097 = vmatpush1.bf16.msra.mxu0 %v856_v41  ;;  %1220 = vmatpush1.bf16.msra.mxu1 %v858_v42  ;;  %v706_v41 = vld [vmem:[#allocation5 + $0x210] sm:$0xff]  ;;  %v708_v42 = vld [vmem:[#allocation5 + $0x220] sm:$0xff] }
 0x14c   : > { %1098 = vmatprep.subr.bf16.mxu0 %v863_v43  ;;  %1221 = vmatprep.subr.bf16.mxu1 %v865_v44  ;;  %v916_v43 = vunpack.c.l.s8.bf16 %v706_v41  ;;  %v918_v44 = vunpack.c.l.s8.bf16 %v708_v42 }
 0x14f   : > { %1099 = vmatpush1.bf16.msra.mxu0 %v862_v47  ;;  %1222 = vmatpush1.bf16.msra.mxu1 %v864_v48  ;;  %v713_v47 = vld [vmem:[#allocation5 + $0x248] sm:$0xff]  ;;  %v715_v48 = vld [vmem:[#allocation5 + $0x258] sm:$0xff] }
 0x150   : > { %1100 = vmatprep.subr.bf16.mxu0 %v869_v49  ;;  %1223 = vmatprep.subr.bf16.mxu1 %v871_v50  ;;  %v922_v49 = vunpack.c.h.s8.bf16 %v706_v41  ;;  %v924_v50 = vunpack.c.h.s8.bf16 %v708_v42  ;;  %v929_v51 = vunpack.c.l.s8.bf16 %v713_v47  ;;  %v931_v53 = vunpack.c.l.s8.bf16 %v715_v48 }
 0x151   : > { %v935_v58 = vunpack.c.h.s8.bf16 %v713_v47  ;;  %v937_v59 = vunpack.c.h.s8.bf16 %v715_v48  ;;  %v977_v41 = vunpack.c.l.s8.bf16 %v737_v36 }
 0x153   : > { %1101 = vmatpush1.bf16.msra.mxu0 %v868_v54  ;;  %1224 = vmatpush1.bf16.msra.mxu1 %v870_v55  ;;  %v712_v54 = vld [vmem:[#allocation5 + $0x240] sm:$0xff]  ;;  %v714_v55 = vld [vmem:[#allocation5 + $0x250] sm:$0xff] }
 0x154   : > { %1102 = vmatprep.subr.bf16.mxu0 %v875_v56  ;;  %1225 = vmatprep.subr.bf16.mxu1 %v877_v57  ;;  %v928_v56 = vunpack.c.l.s8.bf16 %v712_v54  ;;  %v930_v57 = vunpack.c.l.s8.bf16 %v714_v55 }
 0x157   : > { %1103 = vmatpush1.bf16.msra.mxu0 %v874_v62  ;;  %1226 = vmatpush1.bf16.msra.mxu1 %v876_v63  ;;  %v719_v62 = vld [vmem:[#allocation5 + $0x278] sm:$0xff]  ;;  %v721_v63 = vld [vmem:[#allocation5 + $0x288] sm:$0xff] }
 0x158   : > { %1113 = vmatprep.subr.bf16.mxu0 %v881_v0  ;;  %1236 = vmatprep.subr.bf16.mxu1 %v883_v1  ;;  %v934_v0 = vunpack.c.h.s8.bf16 %v712_v54  ;;  %v936_v1 = vunpack.c.h.s8.bf16 %v714_v55  ;;  %v941_v2 = vunpack.c.l.s8.bf16 %v719_v62  ;;  %v943_v3 = vunpack.c.l.s8.bf16 %v721_v63 }
 0x159   : > { %v949_v10 = vunpack.c.h.s8.bf16 %v721_v63 }
 0x15a   : > { %1105 = vmatmul.mubr.bf16.vlgmr.msra.gmra.mrb[0].mxu0 %v4469_v5  ;;  %1228 = vmatmul.mubr.bf16.vlgmr.msra.gmra.mrb[0].mxu1 %v4469_v5 }
 0x15b   : > { %1114 = vmatpush1.bf16.msra.mxu0 %v880_v6  ;;  %1237 = vmatpush1.bf16.msra.mxu1 %v882_v7  ;;  %v720_v6 = vld [vmem:[#allocation5 + $0x280] sm:$0xff]  ;;  %v940_v7 = vunpack.c.l.s8.bf16 %v718_v4 }
 0x15c   : > { %1115 = vmatprep.subr.bf16.mxu0 %v887_v8  ;;  %1238 = vmatprep.subr.bf16.mxu1 %v889_v9  ;;  %v942_v8 = vunpack.c.l.s8.bf16 %v720_v6  ;;  %v947_v9 = vunpack.c.h.s8.bf16 %v719_v62 }
 0x15d   : > { %1145 = vmatprep.mubr.bf16.mxu0 %v4471_v12  ;;  %1268 = vmatprep.mubr.bf16.mxu1 %v4471_v12 }
 0x15f   : > { %1116 = vmatpush1.bf16.msra.mxu0 %v886_v52  ;;  %1239 = vmatpush1.bf16.msra.mxu1 %v888_v13  ;;  %v727_v52 = vld [vmem:[#allocation5 + $0x2b8] sm:$0xff]  ;;  %v946_v13 = vunpack.c.h.s8.bf16 %v718_v4 }
 0x160   : > { %1117 = vmatprep.subr.bf16.mxu0 %v893_v14  ;;  %1240 = vmatprep.subr.bf16.mxu1 %v895_v15  ;;  %v948_v14 = vunpack.c.h.s8.bf16 %v720_v6  ;;  %v953_v15 = vunpack.c.l.s8.bf16 %v725_v11  ;;  %v955_v16 = vunpack.c.l.s8.bf16 %v727_v52  ;;  %v961_v22 = vunpack.c.h.s8.bf16 %v727_v52 }
 0x163   : > { %1118 = vmatpush1.bf16.msra.mxu0 %v892_v18  ;;  %1241 = vmatpush1.bf16.msra.mxu1 %v894_v19  ;;  %v726_v18 = vld [vmem:[#allocation5 + $0x2b0] sm:$0xff]  ;;  %v952_v19 = vunpack.c.l.s8.bf16 %v724_v17 }
 0x164   : > { %1119 = vmatprep.subr.bf16.mxu0 %v899_v20  ;;  %1242 = vmatprep.subr.bf16.mxu1 %v901_v21  ;;  %v954_v20 = vunpack.c.l.s8.bf16 %v726_v18  ;;  %v959_v21 = vunpack.c.h.s8.bf16 %v725_v11 }
 0x167   : > { %1120 = vmatpush1.bf16.msra.mxu0 %v898_v24  ;;  %1243 = vmatpush1.bf16.msra.mxu1 %v900_v25  ;;  %v733_v24 = vld [vmem:[#allocation5 + $0x2e8] sm:$0xff]  ;;  %v958_v25 = vunpack.c.h.s8.bf16 %v724_v17 }
 0x168   : > { %1121 = vmatprep.subr.bf16.mxu0 %v905_v26  ;;  %1244 = vmatprep.subr.bf16.mxu1 %v907_v27  ;;  %v960_v26 = vunpack.c.h.s8.bf16 %v726_v18  ;;  %v965_v27 = vunpack.c.l.s8.bf16 %v731_v23  ;;  %v967_v29 = vunpack.c.l.s8.bf16 %v733_v24  ;;  %v973_v35 = vunpack.c.h.s8.bf16 %v733_v24 }
 0x16b   : > { %1122 = vmatpush1.bf16.msra.mxu0 %v904_v31  ;;  %1245 = vmatpush1.bf16.msra.mxu1 %v906_v32  ;;  %v732_v31 = vld [vmem:[#allocation5 + $0x2e0] sm:$0xff]  ;;  %v964_v32 = vunpack.c.l.s8.bf16 %v730_v30 }
 0x16c   : > { %1123 = vmatprep.subr.bf16.mxu0 %v911_v33  ;;  %1246 = vmatprep.subr.bf16.mxu1 %v913_v34  ;;  %v966_v33 = vunpack.c.l.s8.bf16 %v732_v31  ;;  %v971_v34 = vunpack.c.h.s8.bf16 %v731_v23 }
 0x16f   : > { %1124 = vmatpush1.bf16.msra.mxu0 %v910_v37  ;;  %1247 = vmatpush1.bf16.msra.mxu1 %v912_v38  ;;  %v739_v37 = vld [vmem:[#allocation5 + $0x318] sm:$0xff] }
 0x170   : > { %1125 = vmatprep.subr.bf16.mxu0 %v917_v39  ;;  %1248 = vmatprep.subr.bf16.mxu1 %v919_v40  ;;  %v4478_v38 = vld [vmem:[%s4398_s28 + $0x10] sm:$0xff]  ;;  %v970_v39 = vunpack.c.h.s8.bf16 %v730_v30  ;;  %v972_v40 = vunpack.c.h.s8.bf16 %v732_v31  ;;  %v979_v42 = vunpack.c.l.s8.bf16 %v739_v37 }
 0x173   : > { %1126 = vmatpush1.bf16.msra.mxu0 %v916_v43  ;;  %1249 = vmatpush1.bf16.msra.mxu1 %v918_v44  ;;  %v736_v43 = vld [vmem:[#allocation5 + $0x300] sm:$0xff]  ;;  %v738_v44 = vld [vmem:[#allocation5 + $0x310] sm:$0xff] }
 0x174   : > { %1127 = vmatprep.subr.bf16.mxu0 %v923_v45  ;;  %1250 = vmatprep.subr.bf16.mxu1 %v925_v46  ;;  %v620_v45 = vcombine.high %v4478_v38, %v4478_v38  ;;  %v4484_v46 = vpack.c.bf16 %v4463_v61, %v4463_v61  ;;  %v976_v47 = vunpack.c.l.s8.bf16 %v736_v43  ;;  %v978_v48 = vunpack.c.l.s8.bf16 %v738_v44 }
 0x175   : > { %v982_v61 = vunpack.c.h.s8.bf16 %v736_v43  ;;  %v984_v55 = vunpack.c.h.s8.bf16 %v738_v44 }
 0x176   : > { %v4486_v54 = vpack.c.bf16 %v620_v45, %v620_v45 }
 0x177   : > { %1128 = vmatpush1.bf16.msra.mxu0 %v922_v49  ;;  %1251 = vmatpush1.bf16.msra.mxu1 %v924_v50  ;;  %v983_v49 = vunpack.c.h.s8.bf16 %v737_v36  ;;  %v985_v50 = vunpack.c.h.s8.bf16 %v739_v37 }
 0x178   : > { %1129 = vmatprep.subr.bf16.mxu0 %v929_v51  ;;  %1252 = vmatprep.subr.bf16.mxu1 %v931_v53  ;;  %v743_v51 = vld [vmem:[#allocation5 + $0x338] sm:$0xff]  ;;  %v745_v53 = vld [vmem:[#allocation5 + $0x348] sm:$0xff] }
 0x17b   : > { %1130 = vmatpush1.bf16.msra.mxu0 %v928_v56  ;;  %1253 = vmatpush1.bf16.msra.mxu1 %v930_v57  ;;  %v989_v56 = vunpack.c.l.s8.bf16 %v743_v51  ;;  %v991_v57 = vunpack.c.l.s8.bf16 %v745_v53 }
 0x17c   : > { %1131 = vmatprep.subr.bf16.mxu0 %v935_v58  ;;  %1254 = vmatprep.subr.bf16.mxu1 %v937_v59  ;;  %v742_v58 = vld [vmem:[#allocation5 + $0x330] sm:$0xff]  ;;  %v744_v59 = vld [vmem:[#allocation5 + $0x340] sm:$0xff] }
 0x17d   : > { %v988_v62 = vunpack.c.l.s8.bf16 %v742_v58  ;;  %v990_v63 = vunpack.c.l.s8.bf16 %v744_v59  ;;  %v994_v4 = vunpack.c.h.s8.bf16 %v742_v58  ;;  %v996_v6 = vunpack.c.h.s8.bf16 %v744_v59 }
 0x17f   : > { %1132 = vmatpush1.bf16.msra.mxu0 %v934_v0  ;;  %1255 = vmatpush1.bf16.msra.mxu1 %v936_v1  ;;  %v995_v0 = vunpack.c.h.s8.bf16 %v743_v51  ;;  %v997_v1 = vunpack.c.h.s8.bf16 %v745_v53 }
 0x180   : > { %1133 = vmatprep.subr.bf16.mxu0 %v941_v2  ;;  %1256 = vmatprep.subr.bf16.mxu1 %v943_v3  ;;  %v749_v2 = vld [vmem:[#allocation5 + $0x368] sm:$0xff]  ;;  %v751_v3 = vld [vmem:[#allocation5 + $0x378] sm:$0xff] }
 0x183   : > { %1134 = vmatpush1.bf16.msra.mxu0 %v940_v7  ;;  %1257 = vmatpush1.bf16.msra.mxu1 %v942_v8  ;;  %v1001_v7 = vunpack.c.l.s8.bf16 %v749_v2  ;;  %v1003_v8 = vunpack.c.l.s8.bf16 %v751_v3 }
 0x184   : > { %1135 = vmatprep.subr.bf16.mxu0 %v947_v9  ;;  %1258 = vmatprep.subr.bf16.mxu1 %v949_v10  ;;  %v748_v9 = vld [vmem:[#allocation5 + $0x360] sm:$0xff]  ;;  %v750_v10 = vld [vmem:[#allocation5 + $0x370] sm:$0xff] }
 0x185   : > { %v1000_v11 = vunpack.c.l.s8.bf16 %v748_v9  ;;  %v1002_v52 = vunpack.c.l.s8.bf16 %v750_v10  ;;  %v1006_v17 = vunpack.c.h.s8.bf16 %v748_v9  ;;  %v1008_v18 = vunpack.c.h.s8.bf16 %v750_v10 }
 0x187   : > { %1136 = vmatpush1.bf16.msra.mxu0 %v946_v13  ;;  %1259 = vmatpush1.bf16.msra.mxu1 %v948_v14  ;;  %v1007_v13 = vunpack.c.h.s8.bf16 %v749_v2  ;;  %v1009_v14 = vunpack.c.h.s8.bf16 %v751_v3 }
 0x188   : > { %1137 = vmatprep.subr.bf16.mxu0 %v953_v15  ;;  %1260 = vmatprep.subr.bf16.mxu1 %v955_v16  ;;  %v755_v15 = vld [vmem:[#allocation5 + $0x398] sm:$0xff]  ;;  %v757_v16 = vld [vmem:[#allocation5 + $0x3a8] sm:$0xff] }
 0x18b   : > { %1138 = vmatpush1.bf16.msra.mxu0 %v952_v19  ;;  %1261 = vmatpush1.bf16.msra.mxu1 %v954_v20  ;;  %v1013_v19 = vunpack.c.l.s8.bf16 %v755_v15  ;;  %v1015_v20 = vunpack.c.l.s8.bf16 %v757_v16 }
 0x18c   : > { %1139 = vmatprep.subr.bf16.mxu0 %v959_v21  ;;  %1262 = vmatprep.subr.bf16.mxu1 %v961_v22  ;;  %v754_v21 = vld [vmem:[#allocation5 + $0x390] sm:$0xff]  ;;  %v756_v22 = vld [vmem:[#allocation5 + $0x3a0] sm:$0xff] }
 0x18d   : > { %v1012_v23 = vunpack.c.l.s8.bf16 %v754_v21  ;;  %v1014_v24 = vunpack.c.l.s8.bf16 %v756_v22  ;;  %v1018_v30 = vunpack.c.h.s8.bf16 %v754_v21  ;;  %v1020_v31 = vunpack.c.h.s8.bf16 %v756_v22 }
 0x18f   : > { %1140 = vmatpush1.bf16.msra.mxu0 %v958_v25  ;;  %1263 = vmatpush1.bf16.msra.mxu1 %v960_v26  ;;  %v1019_v25 = vunpack.c.h.s8.bf16 %v755_v15  ;;  %v1021_v26 = vunpack.c.h.s8.bf16 %v757_v16 }
 0x190   : > { %1141 = vmatprep.subr.bf16.mxu0 %v965_v27  ;;  %1264 = vmatprep.subr.bf16.mxu1 %v967_v29  ;;  %v761_v27 = vld [vmem:[#allocation5 + $0x3c8] sm:$0xff]  ;;  %v763_v29 = vld [vmem:[#allocation5 + $0x3d8] sm:$0xff] }
 0x193   : > { %1142 = vmatpush1.bf16.msra.mxu0 %v964_v32  ;;  %1265 = vmatpush1.bf16.msra.mxu1 %v966_v33  ;;  %v1025_v32 = vunpack.c.l.s8.bf16 %v761_v27  ;;  %v1027_v33 = vunpack.c.l.s8.bf16 %v763_v29 }
 0x194   : > { %1143 = vmatprep.subr.bf16.mxu0 %v971_v34  ;;  %1266 = vmatprep.subr.bf16.mxu1 %v973_v35  ;;  %v760_v34 = vld [vmem:[#allocation5 + $0x3c0] sm:$0xff]  ;;  %v762_v35 = vld [vmem:[#allocation5 + $0x3d0] sm:$0xff] }
 0x195   : > { %v1024_v36 = vunpack.c.l.s8.bf16 %v760_v34  ;;  %v1026_v37 = vunpack.c.l.s8.bf16 %v762_v35  ;;  %v1030_v43 = vunpack.c.h.s8.bf16 %v760_v34  ;;  %v1032_v44 = vunpack.c.h.s8.bf16 %v762_v35  ;;  %v651_v34 = vld [vmem:[#allocation5 + $0x58] sm:$0xff] }
 0x197   : > { %1144 = vmatpush1.bf16.msra.mxu0 %v970_v39  ;;  %1267 = vmatpush1.bf16.msra.mxu1 %v972_v40  ;;  %v1031_v39 = vunpack.c.h.s8.bf16 %v761_v27  ;;  %v1033_v40 = vunpack.c.h.s8.bf16 %v763_v29  ;;  %v4495_v27 = vpack.c.bf16 %v4478_v38, %v4478_v38  ;;  %v3694_v29 = vld [vmem:[#allocation8] ss:$24 sps:$4 sm:$0xff]   ;;  %v4043_v38 = vmov 0.0  }
 0x198   : > { %1154 = vmatprep.subr.bf16.mxu0 %v977_v41  ;;  %1277 = vmatprep.subr.bf16.mxu1 %v979_v42  ;;  %v767_v41 = vld [vmem:[#allocation5 + $0x3f8] sm:$0xff]  ;;  %v769_v42 = vld [vmem:[#allocation5 + $0x408] sm:$0xff] }
 0x199   : > { %v1037_v45 = vunpack.c.l.s8.bf16 %v767_v41  ;;  %v1043_v53 = vunpack.c.h.s8.bf16 %v767_v41  ;;  %v650_v41 = vld [vmem:[#allocation5 + $0x50] sm:$0xff] }
 0x19a   : > { %1146 = vmatmul.mubr.bf16.vlgmr.msra.gmra.mrb[0].mxu0 %v4484_v46  ;;  %1269 = vmatmul.mubr.bf16.vlgmr.msra.gmra.mrb[0].mxu1 %v4484_v46 }
 0x19b   : > { %1155 = vmatpush1.bf16.msra.mxu0 %v976_v47  ;;  %1278 = vmatpush1.bf16.msra.mxu1 %v978_v48  ;;  %v1039_v47 = vunpack.c.l.s8.bf16 %v769_v42  ;;  %v766_v48 = vld [vmem:[#allocation5 + $0x3f0] sm:$0xff] }
 0x19c   : > { %1156 = vmatprep.subr.bf16.mxu0 %v983_v49  ;;  %1279 = vmatprep.subr.bf16.mxu1 %v985_v50  ;;  %v768_v49 = vld [vmem:[#allocation5 + $0x400] sm:$0xff]  ;;  %v1036_v50 = vunpack.c.l.s8.bf16 %v766_v48 }
 0x19d   : > { %1186 = vmatprep.mubr.bf16.mxu0 %v4486_v54  ;;  %1309 = vmatprep.mubr.bf16.mxu1 %v4486_v54  ;;  %v1038_v51 = vunpack.c.l.s8.bf16 %v768_v49  ;;  %v1044_v58 = vunpack.c.h.s8.bf16 %v768_v49  ;;  %v657_v49 = vld [vmem:[#allocation5 + $0x88] sm:$0xff] }
 0x19f   : > { %1157 = vmatpush1.bf16.msra.mxu0 %v982_v61  ;;  %1280 = vmatpush1.bf16.msra.mxu1 %v984_v55  ;;  %v1045_v61 = vunpack.c.h.s8.bf16 %v769_v42  ;;  %v773_v55 = vld [vmem:[#allocation5 + $0x428] sm:$0xff] }
 0x1a0   : > { %1158 = vmatprep.subr.bf16.mxu0 %v989_v56  ;;  %1281 = vmatprep.subr.bf16.mxu1 %v991_v57  ;;  %v775_v56 = vld [vmem:[#allocation5 + $0x438] sm:$0xff]  ;;  %v1042_v57 = vunpack.c.h.s8.bf16 %v766_v48  ;;  %v1049_v59 = vunpack.c.l.s8.bf16 %v773_v55  ;;  %v1055_v3 = vunpack.c.h.s8.bf16 %v773_v55 }
 0x1a1   : > { %v3705_v48 = vld [vmem:[#allocation8 + $0x38] ss:$24 sps:$4 sm:$0x1f]  }
 0x1a3   : > { %1159 = vmatpush1.bf16.msra.mxu0 %v988_v62  ;;  %1282 = vmatpush1.bf16.msra.mxu1 %v990_v63  ;;  %v1051_v62 = vunpack.c.l.s8.bf16 %v775_v56  ;;  %v772_v63 = vld [vmem:[#allocation5 + $0x420] sm:$0xff] }
 0x1a4   : > { %1160 = vmatprep.subr.bf16.mxu0 %v995_v0  ;;  %1283 = vmatprep.subr.bf16.mxu1 %v997_v1  ;;  %v774_v0 = vld [vmem:[#allocation5 + $0x430] sm:$0xff]  ;;  %v1048_v1 = vunpack.c.l.s8.bf16 %v772_v63 }
 0x1a5   : > { %v1050_v2 = vunpack.c.l.s8.bf16 %v774_v0  ;;  %v1056_v9 = vunpack.c.h.s8.bf16 %v774_v0 }
 0x1a7   : > { %1161 = vmatpush1.bf16.msra.mxu0 %v994_v4  ;;  %1284 = vmatpush1.bf16.msra.mxu1 %v996_v6  ;;  %v1057_v4 = vunpack.c.h.s8.bf16 %v775_v56  ;;  %v779_v6 = vld [vmem:[#allocation5 + $0x458] sm:$0xff] }
 0x1a8   : > { %1162 = vmatprep.subr.bf16.mxu0 %v1001_v7  ;;  %1285 = vmatprep.subr.bf16.mxu1 %v1003_v8  ;;  %v781_v7 = vld [vmem:[#allocation5 + $0x468] sm:$0xff]  ;;  %v1054_v8 = vunpack.c.h.s8.bf16 %v772_v63  ;;  %v1061_v10 = vunpack.c.l.s8.bf16 %v779_v6  ;;  %v1067_v16 = vunpack.c.h.s8.bf16 %v779_v6 }
 0x1a9   : > { %v3706_v56 = vld [vmem:[#allocation8 + $0x10] ss:$24 sps:$4 sm:$0xff]  }
 0x1aa   : > { %v669_v6 = vld [vmem:[#allocation5 + $0xe8] sm:$0xff] }
 0x1ab   : > { %1163 = vmatpush1.bf16.msra.mxu0 %v1000_v11  ;;  %1286 = vmatpush1.bf16.msra.mxu1 %v1002_v52  ;;  %v1063_v11 = vunpack.c.l.s8.bf16 %v781_v7  ;;  %v778_v52 = vld [vmem:[#allocation5 + $0x450] sm:$0xff] }
 0x1ac   : > { %1164 = vmatprep.subr.bf16.mxu0 %v1007_v13  ;;  %1287 = vmatprep.subr.bf16.mxu1 %v1009_v14  ;;  %v780_v13 = vld [vmem:[#allocation5 + $0x460] sm:$0xff]  ;;  %v1060_v14 = vunpack.c.l.s8.bf16 %v778_v52 }
 0x1ad   : > { %v1062_v15 = vunpack.c.l.s8.bf16 %v780_v13  ;;  %v1068_v21 = vunpack.c.h.s8.bf16 %v780_v13 }
 0x1af   : > { %1165 = vmatpush1.bf16.msra.mxu0 %v1006_v17  ;;  %1288 = vmatpush1.bf16.msra.mxu1 %v1008_v18  ;;  %v1069_v17 = vunpack.c.h.s8.bf16 %v781_v7  ;;  %v631_v18 = vlaneseq }
 0x1b0   : > { %1166 = vmatprep.subr.bf16.mxu0 %v1013_v19  ;;  %1289 = vmatprep.subr.bf16.mxu1 %v1015_v20  ;;  %v645_v19 = vld [vmem:[#allocation5 + $0x28] sm:$0xff]  ;;  %v1066_v20 = vunpack.c.h.s8.bf16 %v778_v52 }
 0x1b1   : > { %v789_v22 = vunpack.c.l.s8.bf16 %v645_v19  ;;  %v1719_v52 = vld [vmem:[%s4412_s12 + $0x8] sm:$0xff] }
 0x1b3   : > { %1167 = vmatpush1.bf16.msra.mxu0 %v1012_v23  ;;  %1290 = vmatpush1.bf16.msra.mxu1 %v1014_v24  ;;  %v3696_v23 = vld [vmem:[#allocation8 + $0x4] ss:$24 sps:$4 sm:$0xff]  }
 0x1b4   : > { %1168 = vmatprep.subr.bf16.mxu0 %v1019_v25  ;;  %1291 = vmatprep.subr.bf16.mxu1 %v1021_v26  ;;  %v644_v24 = vld [vmem:[#allocation5 + $0x20] sm:$0xff]  ;;  %v632_v25 = vand.u32 127, %v631_v18  ;;  %v635_v26 = vpop.permute.xlu0 %634 }
 0x1b6   : > { %vm636_vm1 = vcmp.eq.s32.totalorder %v635_v26, %v632_v25  ;;  %v1725_v25 = vld [vmem:[%s4412_s12 + $0x38] sm:$0xff] }
 0x1b7   : > { %1169 = vmatpush1.bf16.msra.mxu0 %v1018_v30  ;;  %1292 = vmatpush1.bf16.msra.mxu1 %v1020_v31  ;;  %v788_v30 = vunpack.c.l.s8.bf16 %v644_v24  ;;  %v795_v31 = vunpack.c.h.s8.bf16 %v645_v19  ;;  %v3379_v35 = vsel %vm636_vm1, 1.0, %v4043_v38  ;;  %v1881_v38 = vunpack.c.h.s8.bf16 %v1725_v25 }
 0x1b8   : > { %1170 = vmatprep.subr.bf16.mxu0 %v1025_v32  ;;  %1293 = vmatprep.subr.bf16.mxu1 %v1027_v33  ;;  %v3697_v32 = vld [vmem:[#allocation8 + $0x34] ss:$24 sps:$4 sm:$0x1f]   ;;  %v3699_v33 = vld [vmem:[#allocation8 + $0x30] ss:$24 sps:$4 sm:$0x1f]   ;;  %v639_v42 = vpack.c.bf16 %v3379_v35, %v3379_v35 }
 0x1bb   : > { %1171 = vmatpush1.bf16.msra.mxu0 %v1024_v36  ;;  %1294 = vmatpush1.bf16.msra.mxu1 %v1026_v37  ;;  %v794_v36 = vunpack.c.h.s8.bf16 %v644_v24  ;;  %v1551_v37 = vsel %vm1549_vm2, %v3699_v33, 0  ;;  %v681_v24 = vld [vmem:[#allocation5 + $0x148] sm:$0xff] }
 0x1bc   : > { %1172 = vmatprep.subr.bf16.mxu0 %v1031_v39  ;;  %1295 = vmatprep.subr.bf16.mxu1 %v1033_v40  ;;  %v801_v39 = vunpack.c.l.s8.bf16 %v651_v34  ;;  %v3702_v40 = vld [vmem:[#allocation8 + $0xc] ss:$24 sps:$4 sm:$0xff]   ;;  %v867_v35 = vunpack.c.h.s8.bf16 %v681_v24 }
 0x1bf   : > { %1173 = vmatpush1.bf16.msra.mxu0 %v1030_v43  ;;  %1296 = vmatpush1.bf16.msra.mxu1 %v1032_v44  ;;  %v3700_v43 = vld [vmem:[#allocation8 + $0x8] ss:$24 sps:$4 sm:$0xff]   ;;  %v800_v44 = vunpack.c.l.s8.bf16 %v650_v41 }
 0x1c0   : > { %1174 = vmatprep.subr.bf16.mxu0 %v1037_v45  ;;  %1297 = vmatprep.subr.bf16.mxu1 %v1039_v47  ;;  %v807_v45 = vunpack.c.h.s8.bf16 %v651_v34  ;;  %v3703_v47 = vld [vmem:[#allocation8 + $0x3c] ss:$24 sps:$4 sm:$0x1f]  }
 0x1c3   : > { %1175 = vmatpush1.bf16.msra.mxu0 %v1036_v50  ;;  %1298 = vmatpush1.bf16.msra.mxu1 %v1038_v51  ;;  %v806_v50 = vunpack.c.h.s8.bf16 %v650_v41  ;;  %v813_v51 = vunpack.c.l.s8.bf16 %v657_v49 }
 0x1c4   : > { %1176 = vmatprep.subr.bf16.mxu0 %v1043_v53  ;;  %1299 = vmatprep.subr.bf16.mxu1 %v1045_v61  ;;  %v656_v53 = vld [vmem:[#allocation5 + $0x80] sm:$0xff]  ;;  %v3708_v61 = vld [vmem:[#allocation8 + $0x14] ss:$24 sps:$4 sm:$0xff]  }
 0x1c5   : > { %v812_v55 = vunpack.c.l.s8.bf16 %v656_v53  ;;  %v818_v63 = vunpack.c.h.s8.bf16 %v656_v53 }
 0x1c7   : > { %1177 = vmatpush1.bf16.msra.mxu0 %v1042_v57  ;;  %1300 = vmatpush1.bf16.msra.mxu1 %v1044_v58  ;;  %v819_v57 = vunpack.c.h.s8.bf16 %v657_v49  ;;  %v3709_v58 = vld [vmem:[#allocation8 + $0x44] ss:$24 sps:$4 sm:$0x1f]  }
 0x1c8   : > { %1178 = vmatprep.subr.bf16.mxu0 %v1049_v59  ;;  %1301 = vmatprep.subr.bf16.mxu1 %v1051_v62  ;;  %v3711_v59 = vld [vmem:[#allocation8 + $0x40] ss:$24 sps:$4 sm:$0x1f]  }
 0x1c9   : > { %v663_v62 = vld [vmem:[#allocation5 + $0xb8] sm:$0xff] }
 0x1ca   : > { %v825_v0 = vunpack.c.l.s8.bf16 %v663_v62 }
 0x1cb   : > { %1179 = vmatpush1.bf16.msra.mxu0 %v1048_v1  ;;  %1302 = vmatpush1.bf16.msra.mxu1 %v1050_v2  ;;  %v662_v1 = vld [vmem:[#allocation5 + $0xb0] sm:$0xff]  ;;  %v1563_v2 = vsel %vm1549_vm2, %v3711_v59, 0 }
 0x1cc   : > { %1180 = vmatprep.subr.bf16.mxu0 %v1055_v3  ;;  %1303 = vmatprep.subr.bf16.mxu1 %v1057_v4  ;;  %v824_v3 = vunpack.c.l.s8.bf16 %v662_v1  ;;  %v831_v4 = vunpack.c.h.s8.bf16 %v663_v62  ;;  %v830_v7 = vunpack.c.h.s8.bf16 %v662_v1  ;;  %v699_v1 = vld [vmem:[#allocation5 + $0x1d8] sm:$0xff] }
 0x1cf   : > { %1181 = vmatpush1.bf16.msra.mxu0 %v1054_v8  ;;  %1304 = vmatpush1.bf16.msra.mxu1 %v1056_v9  ;;  %v837_v8 = vunpack.c.l.s8.bf16 %v669_v6  ;;  %v668_v9 = vld [vmem:[#allocation5 + $0xe0] sm:$0xff] }
 0x1d0   : > { %1182 = vmatprep.subr.bf16.mxu0 %v1061_v10  ;;  %1305 = vmatprep.subr.bf16.mxu1 %v1063_v11  ;;  %v836_v10 = vunpack.c.l.s8.bf16 %v668_v9  ;;  %v843_v11 = vunpack.c.h.s8.bf16 %v669_v6  ;;  %v842_v13 = vunpack.c.h.s8.bf16 %v668_v9  ;;  %v1742_v6 = vld [vmem:[%s4412_s12 + $0xc0] sm:$0xff] }
 0x1d1   : > { %v1910_v9 = vunpack.c.l.s8.bf16 %v1742_v6 }
 0x1d3   : > { %1183 = vmatpush1.bf16.msra.mxu0 %v1060_v14  ;;  %1306 = vmatpush1.bf16.msra.mxu1 %v1062_v15  ;;  %v1863_v14 = vunpack.c.l.s8.bf16 %v1719_v52  ;;  %v1718_v15 = vld [vmem:[%s4412_s12] sm:$0xff] }
 0x1d4   : > { %1184 = vmatprep.subr.bf16.mxu0 %v1067_v16  ;;  %1307 = vmatprep.subr.bf16.mxu1 %v1069_v17  ;;  %v674_v17 = vld [vmem:[#allocation5 + $0x110] sm:$0xff]  ;;  %v1862_v19 = vunpack.c.l.s8.bf16 %v1718_v15 }
 0x1d5   : > { %v854_v26 = vunpack.c.h.s8.bf16 %v674_v17 }
 0x1d7   : > { %1185 = vmatpush1.bf16.msra.mxu0 %v1066_v20  ;;  %1308 = vmatpush1.bf16.msra.mxu1 %v1068_v21  ;;  %v848_v20 = vunpack.c.l.s8.bf16 %v674_v17  ;;  %v1869_v21 = vunpack.c.h.s8.bf16 %v1719_v52  ;;  %v705_v52 = vld [vmem:[#allocation5 + $0x208] sm:$0xff]  ;;  %v704_v17 = vld [vmem:[#allocation5 + $0x200] sm:$0xff] }
 0x1d8   : > { %1318 = vmatprep.subr.bf16.mxu0 %v789_v22  ;;  %1568 = vmatprep.subr.bf16.mxu1 %v3696_v23  ;;  %v1868_v23 = vunpack.c.h.s8.bf16 %v1718_v15  ;;  %v1748_v15 = vld [vmem:[%s4412_s12 + $0xf0] sm:$0xff] }
 0x1da   : > { %1187 = vmatmul.mubr.bf16.vlgmr.msra.gmra.mrb[0].mxu0 %v4495_v27  ;;  %1310 = vmatmul.mubr.bf16.vlgmr.msra.gmra.mrb[0].mxu1 %v4495_v27 }
 0x1db   : > { %1319 = vmatpush1.bf16.msra.mxu0 %v788_v30  ;;  %1569 = vmatpush1.bf16.msra.mxu1 %v3694_v29  ;;  %v1875_v29 = vunpack.c.l.s8.bf16 %v1725_v25  ;;  %v1724_v30 = vld [vmem:[%s4412_s12 + $0x30] sm:$0xff]  ;;  %v1755_v25 = vld [vmem:[%s4412_s12 + $0x128] sm:$0xff] }
 0x1dc   : > { %1320 = vmatprep.subr.bf16.mxu0 %v795_v31  ;;  %3392 = vmatprep.subr.msk.bf16.mxu1 %vm1549_vm2, %v3697_v32  ;;  %v861_v31 = vunpack.c.l.s8.bf16 %v681_v24  ;;  %v680_v32 = vld [vmem:[#allocation5 + $0x140] sm:$0xff]  ;;  %v1874_v33 = vunpack.c.l.s8.bf16 %v1724_v30  ;;  %v711_v24 = vld [vmem:[#allocation5 + $0x238] sm:$0xff] }
 0x1dd   : > { %1600 = vmatprep.mubr.bf16.mxu1 %v4042_v28  ;;  %1350 = vmatprep.mubr.bf16.mxu0 %v4457_v60  ;;  %v1557_v60 = vsel %vm1549_vm2, %v3705_v48, 0  ;;  %v860_v34 = vunpack.c.l.s8.bf16 %v680_v32 }
 0x1df   : > { %1321 = vmatpush1.bf16.msra.mxu0 %v794_v36  ;;  %1571 = vmatpush1.bf16.msra.mxu1 %v1551_v37  ;;  %v1880_v36 = vunpack.c.h.s8.bf16 %v1724_v30  ;;  %v687_v37 = vld [vmem:[#allocation5 + $0x178] sm:$0xff]  ;;  %v1754_v30 = vld [vmem:[%s4412_s12 + $0x120] sm:$0xff] }
 0x1e0   : > { %1322 = vmatprep.subr.bf16.mxu0 %v801_v39  ;;  %1609 = vmatprep.subr.bf16.mxu1 %v3702_v40  ;;  %v1731_v39 = vld [vmem:[%s4412_s12 + $0x68] sm:$0xff]  ;;  %v866_v40 = vunpack.c.h.s8.bf16 %v680_v32  ;;  %v879_v49 = vunpack.c.h.s8.bf16 %v687_v37 }
 0x1e1   : > { %v1887_v41 = vunpack.c.l.s8.bf16 %v1731_v39  ;;  %v1893_v48 = vunpack.c.h.s8.bf16 %v1731_v39  ;;  %v710_v32 = vld [vmem:[#allocation5 + $0x230] sm:$0xff]  ;;  %v1761_v39 = vld [vmem:[%s4412_s12 + $0x158] sm:$0xff] }
 0x1e2   : > { %3393 = vmatmul.mubr.msk.bf16.vlgmr.msra.gmra.mrb[4].mxu1 %vm1545_vm3, %v639_v42 }
 0x1e3   : > { %1323 = vmatpush1.bf16.msra.mxu0 %v800_v44  ;;  %1610 = vmatpush1.bf16.msra.mxu1 %v3700_v43  ;;  %v873_v43 = vunpack.c.l.s8.bf16 %v687_v37  ;;  %v686_v44 = vld [vmem:[#allocation5 + $0x170] sm:$0xff]  ;;  %v717_v37 = vld [vmem:[#allocation5 + $0x268] sm:$0xff] }
 0x1e4   : > { %1324 = vmatprep.subr.bf16.mxu0 %v807_v45  ;;  %3394 = vmatprep.subr.msk.bf16.mxu1 %vm1549_vm2, %v3703_v47  ;;  %v872_v47 = vunpack.c.l.s8.bf16 %v686_v44  ;;  %v878_v53 = vunpack.c.h.s8.bf16 %v686_v44  ;;  %v716_v44 = vld [vmem:[#allocation5 + $0x260] sm:$0xff] }
 0x1e5   : > { %1641 = vmatprep.mubr.bf16.mxu1 %v4042_v28 }
 0x1e7   : > { %1325 = vmatpush1.bf16.msra.mxu0 %v806_v50  ;;  %1612 = vmatpush1.bf16.msra.mxu1 %v1557_v60  ;;  %v693_v60 = vld [vmem:[#allocation5 + $0x1a8] sm:$0xff] }
 0x1e8   : > { %1326 = vmatprep.subr.bf16.mxu0 %v813_v51  ;;  %1650 = vmatprep.subr.bf16.mxu1 %v3708_v61  ;;  %v1737_v51 = vld [vmem:[%s4412_s12 + $0x98] sm:$0xff] }
 0x1e9   : > { %v1899_v61 = vunpack.c.l.s8.bf16 %v1737_v51  ;;  %v1905_v62 = vunpack.c.h.s8.bf16 %v1737_v51  ;;  %v4531_v51 = vld [vmem:[%s4412_s12 + $0x188] sm:$0xff] }
 0x1ea   : > { %3395 = vmatmul.mubr.msk.bf16.vlgmr.msra.gmra.mrb[8].mxu1 %vm1545_vm3, %v639_v42 }
 0x1eb   : > { %1327 = vmatpush1.bf16.msra.mxu0 %v812_v55  ;;  %1651 = vmatpush1.bf16.msra.mxu1 %v3706_v56  ;;  %v1736_v55 = vld [vmem:[%s4412_s12 + $0x90] sm:$0xff]  ;;  %v885_v56 = vunpack.c.l.s8.bf16 %v693_v60 }
 0x1ec   : > { %1328 = vmatprep.subr.bf16.mxu0 %v819_v57  ;;  %3396 = vmatprep.subr.msk.bf16.mxu1 %vm1549_vm2, %v3709_v58  ;;  %v692_v57 = vld [vmem:[#allocation5 + $0x1a0] sm:$0xff]  ;;  %v1898_v58 = vunpack.c.l.s8.bf16 %v1736_v55 }
 0x1ed   : > { %1682 = vmatprep.mubr.bf16.mxu1 %v4042_v28  ;;  %v675_v28 = vld [vmem:[#allocation5 + $0x118] sm:$0xff]  ;;  %v884_v59 = vunpack.c.l.s8.bf16 %v692_v57 }
 0x1ee   : > { %v849_v16 = vunpack.c.l.s8.bf16 %v675_v28  ;;  %v855_v22 = vunpack.c.h.s8.bf16 %v675_v28  ;;  %v903_v28 = vunpack.c.h.s8.bf16 %v699_v1 }
 0x1ef   : > { %1329 = vmatpush1.bf16.msra.mxu0 %v818_v63  ;;  %1653 = vmatpush1.bf16.msra.mxu1 %v1563_v2  ;;  %v891_v63 = vunpack.c.h.s8.bf16 %v693_v60  ;;  %v1743_v2 = vld [vmem:[%s4412_s12 + $0xc8] sm:$0xff]  ;;  %v723_v60 = vld [vmem:[#allocation5 + $0x298] sm:$0xff] }
 0x1f0   : > { %1330 = vmatprep.subr.bf16.mxu0 %v825_v0  ;;  %2150 = vmatprep.subr.bf16.mxu1 %v1863_v14  ;;  %v1904_v0 = vunpack.c.h.s8.bf16 %v1736_v55  ;;  %v945_v55 = vunpack.c.l.s8.bf16 %v723_v60 }
 0x1f2   : > { %3397 = vmatmul.mubr.msk.bf16.vlgmr.msra.gmra.mrb[12].mxu1 %vm1545_vm3, %v639_v42  ;;  %v1730_v42 = vld [vmem:[%s4412_s12 + $0x60] sm:$0xff] }
 0x1f3   : > { %1331 = vmatpush1.bf16.msra.mxu0 %v824_v3  ;;  %2151 = vmatpush1.bf16.msra.mxu1 %v1862_v19  ;;  %v1886_v45 = vunpack.c.l.s8.bf16 %v1730_v42  ;;  %v1892_v50 = vunpack.c.h.s8.bf16 %v1730_v42  ;;  %v890_v3 = vunpack.c.h.s8.bf16 %v692_v57  ;;  %v1922_v19 = vunpack.c.l.s8.bf16 %v1748_v15  ;;  %v1760_v42 = vld [vmem:[%s4412_s12 + $0x150] sm:$0xff] }
 0x1f4   : > { %1332 = vmatprep.subr.bf16.mxu0 %v831_v4  ;;  %2152 = vmatprep.subr.bf16.mxu1 %v1869_v21  ;;  %v1911_v4 = vunpack.c.l.s8.bf16 %v1743_v2 }
 0x1f7   : > { %1333 = vmatpush1.bf16.msra.mxu0 %v830_v7  ;;  %2153 = vmatpush1.bf16.msra.mxu1 %v1868_v23  ;;  %v897_v7 = vunpack.c.l.s8.bf16 %v699_v1  ;;  %v915_v23 = vunpack.c.h.s8.bf16 %v705_v52 }
 0x1f8   : > { %1334 = vmatprep.subr.bf16.mxu0 %v837_v8  ;;  %2154 = vmatprep.subr.bf16.mxu1 %v1875_v29  ;;  %v698_v8 = vld [vmem:[#allocation5 + $0x1d0] sm:$0xff]  ;;  %v1935_v29 = vunpack.c.l.s8.bf16 %v1755_v25 }
 0x1fb   : > { %1335 = vmatpush1.bf16.msra.mxu0 %v836_v10  ;;  %2155 = vmatpush1.bf16.msra.mxu1 %v1874_v33  ;;  %v896_v10 = vunpack.c.l.s8.bf16 %v698_v8  ;;  %v1934_v33 = vunpack.c.l.s8.bf16 %v1754_v30 }
 0x1fc   : > { %1336 = vmatprep.subr.bf16.mxu0 %v843_v11  ;;  %2156 = vmatprep.subr.bf16.mxu1 %v1881_v38  ;;  %v1917_v11 = vunpack.c.h.s8.bf16 %v1743_v2  ;;  %v1941_v38 = vunpack.c.h.s8.bf16 %v1755_v25  ;;  %v759_v25 = vld [vmem:[#allocation5 + $0x3b8] sm:$0xff] }
 0x1ff   : > { %1337 = vmatpush1.bf16.msra.mxu0 %v842_v13  ;;  %2157 = vmatpush1.bf16.msra.mxu1 %v1880_v36  ;;  %v902_v13 = vunpack.c.h.s8.bf16 %v698_v8  ;;  %v1940_v36 = vunpack.c.h.s8.bf16 %v1754_v30 }
 0x200   : > { %1338 = vmatprep.subr.bf16.mxu0 %v849_v16  ;;  %2158 = vmatprep.subr.bf16.mxu1 %v1887_v41  ;;  %v909_v16 = vunpack.c.l.s8.bf16 %v705_v52  ;;  %v1947_v41 = vunpack.c.l.s8.bf16 %v1761_v39 }
 0x203   : > { %1339 = vmatpush1.bf16.msra.mxu0 %v848_v20  ;;  %2159 = vmatpush1.bf16.msra.mxu1 %v1886_v45  ;;  %v908_v20 = vunpack.c.l.s8.bf16 %v704_v17  ;;  %v1946_v45 = vunpack.c.l.s8.bf16 %v1760_v42 }
 0x204   : > { %1340 = vmatprep.subr.bf16.mxu0 %v855_v22  ;;  %2160 = vmatprep.subr.bf16.mxu1 %v1893_v48  ;;  %v1928_v22 = vunpack.c.h.s8.bf16 %v1748_v15  ;;  %v1953_v48 = vunpack.c.h.s8.bf16 %v1761_v39 }
 0x207   : > { %1341 = vmatpush1.bf16.msra.mxu0 %v854_v26  ;;  %2161 = vmatpush1.bf16.msra.mxu1 %v1892_v50  ;;  %v914_v26 = vunpack.c.h.s8.bf16 %v704_v17  ;;  %v1952_v50 = vunpack.c.h.s8.bf16 %v1760_v42 }
 0x208   : > { %1342 = vmatprep.subr.bf16.mxu0 %v861_v31  ;;  %2162 = vmatprep.subr.bf16.mxu1 %v1899_v61  ;;  %v921_v31 = vunpack.c.l.s8.bf16 %v711_v24  ;;  %v1959_v61 = vunpack.c.l.s8.bf16 %v4531_v51 }
 0x20b   : > { %1343 = vmatpush1.bf16.msra.mxu0 %v860_v34  ;;  %2163 = vmatpush1.bf16.msra.mxu1 %v1898_v58  ;;  %v920_v34 = vunpack.c.l.s8.bf16 %v710_v32  ;;  %v951_v58 = vunpack.c.h.s8.bf16 %v723_v60  ;;  %v783_v60 = vld [vmem:[#allocation5 + $0x478] sm:$0xff] }
 0x20c   : > { %1344 = vmatprep.subr.bf16.mxu0 %v867_v35  ;;  %2164 = vmatprep.subr.bf16.mxu1 %v1905_v62  ;;  %v927_v35 = vunpack.c.h.s8.bf16 %v711_v24 }
 0x20f   : > { %1345 = vmatpush1.bf16.msra.mxu0 %v866_v40  ;;  %2165 = vmatpush1.bf16.msra.mxu1 %v1904_v0  ;;  %v926_v40 = vunpack.c.h.s8.bf16 %v710_v32  ;;  %v728_v0 = vld [vmem:[#allocation5 + $0x2c0] sm:$0xff]  ;;  %v765_v32 = vld [vmem:[#allocation5 + $0x3e8] sm:$0xff] }
 0x210   : > { %1346 = vmatprep.subr.bf16.mxu0 %v873_v43  ;;  %2166 = vmatprep.subr.bf16.mxu1 %v1911_v4  ;;  %v933_v43 = vunpack.c.l.s8.bf16 %v717_v37  ;;  %v956_v1 = vunpack.c.l.s8.bf16 %v728_v0  ;;  %v962_v4 = vunpack.c.h.s8.bf16 %v728_v0 }
 0x213   : > { %1347 = vmatpush1.bf16.msra.mxu0 %v872_v47  ;;  %2167 = vmatpush1.bf16.msra.mxu1 %v1910_v9  ;;  %v932_v47 = vunpack.c.l.s8.bf16 %v716_v44 }
 0x214   : > { %1348 = vmatprep.subr.bf16.mxu0 %v879_v49  ;;  %2168 = vmatprep.subr.bf16.mxu1 %v1917_v11  ;;  %v939_v49 = vunpack.c.h.s8.bf16 %v717_v37  ;;  %v771_v37 = vld [vmem:[#allocation5 + $0x418] sm:$0xff] }
 0x217   : > { %1349 = vmatpush1.bf16.msra.mxu0 %v878_v53  ;;  %v938_v53 = vunpack.c.h.s8.bf16 %v716_v44  ;;  %v777_v44 = vld [vmem:[#allocation5 + $0x448] sm:$0xff] }
 0x218   : > { %1359 = vmatprep.subr.bf16.mxu0 %v885_v56  ;;  %v722_v56 = vld [vmem:[#allocation5 + $0x290] sm:$0xff] }
 0x219   : > { %v944_v57 = vunpack.c.l.s8.bf16 %v722_v56  ;;  %v950_v62 = vunpack.c.h.s8.bf16 %v722_v56 }
 0x21a   : > { %1351 = vmatmul.mubr.bf16.vlgmr.msra.gmra.mrb[4].mxu0 %v4469_v5  ;;  %v1916_v5 = vunpack.c.h.s8.bf16 %v1742_v6 }
 0x21b   : > { %1360 = vmatpush1.bf16.msra.mxu0 %v884_v59  ;;  %1391 = vmatprep.mubr.bf16.mxu0 %v4471_v12  ;;  %v1749_v12 = vld [vmem:[%s4412_s12 + $0xf8] sm:$0xff]  ;;  %v729_v59 = vld [vmem:[#allocation5 + $0x2c8] sm:$0xff] }
 0x21c   : > { %1361 = vmatprep.subr.bf16.mxu0 %v891_v63  ;;  %2169 = vmatpush1.bf16.msra.mxu1 %v1916_v5  ;;  %v1923_v14 = vunpack.c.l.s8.bf16 %v1749_v12  ;;  %v1929_v21 = vunpack.c.h.s8.bf16 %v1749_v12  ;;  %v957_v63 = vunpack.c.l.s8.bf16 %v729_v59  ;;  %v963_v2 = vunpack.c.h.s8.bf16 %v729_v59 }
 0x21e   : > { %2170 = vmatprep.subr.bf16.mxu1 %v1923_v14 }
 0x21f   : > { %1362 = vmatpush1.bf16.msra.mxu0 %v890_v3  ;;  %v735_v3 = vld [vmem:[#allocation5 + $0x2f8] sm:$0xff] }
 0x220   : > { %1363 = vmatprep.subr.bf16.mxu0 %v897_v7  ;;  %2171 = vmatpush1.bf16.msra.mxu1 %v1922_v19  ;;  %v969_v6 = vunpack.c.l.s8.bf16 %v735_v3  ;;  %v734_v7 = vld [vmem:[#allocation5 + $0x2f0] sm:$0xff]  ;;  %v975_v9 = vunpack.c.h.s8.bf16 %v735_v3 }
 0x221   : > { %2172 = vmatprep.subr.bf16.mxu1 %v1929_v21  ;;  %v968_v8 = vunpack.c.l.s8.bf16 %v734_v7  ;;  %v974_v11 = vunpack.c.h.s8.bf16 %v734_v7 }
 0x223   : > { %1364 = vmatpush1.bf16.msra.mxu0 %v896_v10  ;;  %v741_v10 = vld [vmem:[#allocation5 + $0x328] sm:$0xff] }
 0x224   : > { %1365 = vmatprep.subr.bf16.mxu0 %v903_v28  ;;  %2173 = vmatpush1.bf16.msra.mxu1 %v1928_v22  ;;  %v981_v5 = vunpack.c.l.s8.bf16 %v741_v10  ;;  %v740_v28 = vld [vmem:[#allocation5 + $0x320] sm:$0xff]  ;;  %v987_v12 = vunpack.c.h.s8.bf16 %v741_v10 }
 0x225   : > { %2174 = vmatprep.subr.bf16.mxu1 %v1935_v29  ;;  %v980_v52 = vunpack.c.l.s8.bf16 %v740_v28  ;;  %v986_v14 = vunpack.c.h.s8.bf16 %v740_v28  ;;  %v758_v29 = vld [vmem:[#allocation5 + $0x3b0] sm:$0xff] }
 0x226   : > { %v1016_v30 = vunpack.c.l.s8.bf16 %v758_v29 }
 0x227   : > { %1366 = vmatpush1.bf16.msra.mxu0 %v902_v13  ;;  %v747_v13 = vld [vmem:[#allocation5 + $0x358] sm:$0xff] }
 0x228   : > { %1367 = vmatprep.subr.bf16.mxu0 %v909_v16  ;;  %2175 = vmatpush1.bf16.msra.mxu1 %v1934_v33  ;;  %v993_v15 = vunpack.c.l.s8.bf16 %v747_v13  ;;  %v746_v16 = vld [vmem:[#allocation5 + $0x350] sm:$0xff]  ;;  %v999_v19 = vunpack.c.h.s8.bf16 %v747_v13  ;;  %v1022_v33 = vunpack.c.h.s8.bf16 %v758_v29 }
 0x229   : > { %2176 = vmatprep.subr.bf16.mxu1 %v1941_v38  ;;  %v992_v17 = vunpack.c.l.s8.bf16 %v746_v16  ;;  %v998_v21 = vunpack.c.h.s8.bf16 %v746_v16  ;;  %v764_v38 = vld [vmem:[#allocation5 + $0x3e0] sm:$0xff] }
 0x22a   : > { %v1034_v39 = vunpack.c.h.s8.bf16 %v764_v38  ;;  %v1738_v16 = vld [vmem:[%s4412_s12 + $0xa0] sm:$0xff] }
 0x22b   : > { %1368 = vmatpush1.bf16.msra.mxu0 %v908_v20  ;;  %v753_v20 = vld [vmem:[#allocation5 + $0x388] sm:$0xff] }
 0x22c   : > { %1369 = vmatprep.subr.bf16.mxu0 %v915_v23  ;;  %2177 = vmatpush1.bf16.msra.mxu1 %v1940_v36  ;;  %v1005_v22 = vunpack.c.l.s8.bf16 %v753_v20  ;;  %v752_v23 = vld [vmem:[#allocation5 + $0x380] sm:$0xff]  ;;  %v1035_v36 = vunpack.c.h.s8.bf16 %v765_v32 }
 0x22d   : > { %2178 = vmatprep.subr.bf16.mxu1 %v1947_v41  ;;  %v1004_v24 = vunpack.c.l.s8.bf16 %v752_v23  ;;  %v770_v41 = vld [vmem:[#allocation5 + $0x410] sm:$0xff] }
 0x22e   : > { %v1040_v42 = vunpack.c.l.s8.bf16 %v770_v41 }
 0x22f   : > { %1370 = vmatpush1.bf16.msra.mxu0 %v914_v26  ;;  %v1017_v26 = vunpack.c.l.s8.bf16 %v759_v25 }
 0x230   : > { %1371 = vmatprep.subr.bf16.mxu0 %v921_v31  ;;  %2179 = vmatpush1.bf16.msra.mxu1 %v1946_v45  ;;  %v1023_v31 = vunpack.c.h.s8.bf16 %v759_v25  ;;  %v1046_v45 = vunpack.c.h.s8.bf16 %v770_v41 }
 0x231   : > { %2180 = vmatprep.subr.bf16.mxu1 %v1953_v48  ;;  %v776_v48 = vld [vmem:[#allocation5 + $0x440] sm:$0xff] }
 0x233   : > { %1372 = vmatpush1.bf16.msra.mxu0 %v920_v34  ;;  %v1029_v34 = vunpack.c.l.s8.bf16 %v765_v32  ;;  %v1906_v32 = vunpack.c.h.s8.bf16 %v1738_v16 }
 0x234   : > { %1373 = vmatprep.subr.bf16.mxu0 %v927_v35  ;;  %2181 = vmatpush1.bf16.msra.mxu1 %v1952_v50  ;;  %v1028_v35 = vunpack.c.l.s8.bf16 %v764_v38  ;;  %v1059_v50 = vunpack.c.h.s8.bf16 %v777_v44 }
 0x235   : > { %2191 = vmatprep.subr.bf16.mxu1 %v1959_v61  ;;  %v1065_v61 = vunpack.c.l.s8.bf16 %v783_v60 }
 0x237   : > { %1374 = vmatpush1.bf16.msra.mxu0 %v926_v40  ;;  %v1041_v40 = vunpack.c.l.s8.bf16 %v771_v37 }
 0x238   : > { %1375 = vmatprep.subr.bf16.mxu0 %v933_v43  ;;  %v1047_v43 = vunpack.c.h.s8.bf16 %v771_v37 }
 0x23b   : > { %1376 = vmatpush1.bf16.msra.mxu0 %v932_v47  ;;  %v1053_v47 = vunpack.c.l.s8.bf16 %v777_v44 }
 0x23c   : > { %1377 = vmatprep.subr.bf16.mxu0 %v939_v49  ;;  %v1052_v49 = vunpack.c.l.s8.bf16 %v776_v48 }
 0x23f   : > { %1378 = vmatpush1.bf16.msra.mxu0 %v938_v53  ;;  %v1058_v53 = vunpack.c.h.s8.bf16 %v776_v48 }
 0x240   : > { %1379 = vmatprep.subr.bf16.mxu0 %v945_v55  ;;  %v782_v55 = vld [vmem:[#allocation5 + $0x470] sm:$0xff] }
 0x241   : > { %v1064_v56 = vunpack.c.l.s8.bf16 %v782_v55  ;;  %v1070_v59 = vunpack.c.h.s8.bf16 %v782_v55  ;;  %v1751_v55 = vld [vmem:[%s4412_s12 + $0x108] sm:$0xff] }
 0x243   : > { %1380 = vmatpush1.bf16.msra.mxu0 %v944_v57  ;;  %v1071_v57 = vunpack.c.h.s8.bf16 %v783_v60 }
 0x244   : > { %1381 = vmatprep.subr.bf16.mxu0 %v951_v58  ;;  %v1721_v58 = vld [vmem:[%s4412_s12 + $0x18] sm:$0xff] }
 0x247   : > { %1382 = vmatpush1.bf16.msra.mxu0 %v950_v62  ;;  %v1865_v62 = vunpack.c.l.s8.bf16 %v1721_v58 }
 0x248   : > { %1383 = vmatprep.subr.bf16.mxu0 %v957_v63  ;;  %v1720_v63 = vld [vmem:[%s4412_s12 + $0x10] sm:$0xff] }
 0x249   : > { %v1864_v0 = vunpack.c.l.s8.bf16 %v1720_v63  ;;  %v1870_v3 = vunpack.c.h.s8.bf16 %v1720_v63  ;;  %v1965_v63 = vunpack.c.h.s8.bf16 %v4531_v51 }
 0x24b   : > { %1384 = vmatpush1.bf16.msra.mxu0 %v956_v1  ;;  %v1871_v1 = vunpack.c.h.s8.bf16 %v1721_v58 }
 0x24c   : > { %1385 = vmatprep.subr.bf16.mxu0 %v963_v2  ;;  %v1727_v2 = vld [vmem:[%s4412_s12 + $0x48] sm:$0xff] }
 0x24f   : > { %1386 = vmatpush1.bf16.msra.mxu0 %v962_v4  ;;  %v1877_v4 = vunpack.c.l.s8.bf16 %v1727_v2 }
 0x250   : > { %1387 = vmatprep.subr.bf16.mxu0 %v969_v6  ;;  %v1726_v6 = vld [vmem:[%s4412_s12 + $0x40] sm:$0xff] }
 0x251   : > { %v1876_v7 = vunpack.c.l.s8.bf16 %v1726_v6  ;;  %v1882_v10 = vunpack.c.h.s8.bf16 %v1726_v6 }
 0x253   : > { %1388 = vmatpush1.bf16.msra.mxu0 %v968_v8  ;;  %v1883_v8 = vunpack.c.h.s8.bf16 %v1727_v2 }
 0x254   : > { %1389 = vmatprep.subr.bf16.mxu0 %v975_v9  ;;  %v1733_v9 = vld [vmem:[%s4412_s12 + $0x78] sm:$0xff] }
 0x257   : > { %1390 = vmatpush1.bf16.msra.mxu0 %v974_v11  ;;  %v1889_v11 = vunpack.c.l.s8.bf16 %v1733_v9 }
 0x258   : > { %1400 = vmatprep.subr.bf16.mxu0 %v981_v5  ;;  %v1732_v5 = vld [vmem:[%s4412_s12 + $0x70] sm:$0xff] }
 0x259   : > { %v1888_v28 = vunpack.c.l.s8.bf16 %v1732_v5  ;;  %v1894_v13 = vunpack.c.h.s8.bf16 %v1732_v5  ;;  %v1772_v5 = vld [vmem:[%s4412_s12 + $0x1b0] sm:$0xff] }
 0x25a   : > { %1392 = vmatmul.mubr.bf16.vlgmr.msra.gmra.mrb[4].mxu0 %v4484_v46  ;;  %v1011_v46 = vunpack.c.h.s8.bf16 %v753_v20 }
 0x25b   : > { %1401 = vmatpush1.bf16.msra.mxu0 %v980_v52  ;;  %1432 = vmatprep.mubr.bf16.mxu0 %v4486_v54  ;;  %v1010_v54 = vunpack.c.h.s8.bf16 %v752_v23  ;;  %v1895_v52 = vunpack.c.h.s8.bf16 %v1733_v9 }
 0x25c   : > { %1402 = vmatprep.subr.bf16.mxu0 %v987_v12  ;;  %v1739_v12 = vld [vmem:[%s4412_s12 + $0xa8] sm:$0xff] }
 0x25d   : > { %v1907_v29 = vunpack.c.h.s8.bf16 %v1739_v12 }
 0x25f   : > { %1403 = vmatpush1.bf16.msra.mxu0 %v986_v14 }
 0x260   : > { %1404 = vmatprep.subr.bf16.mxu0 %v993_v15  ;;  %v1901_v15 = vunpack.c.l.s8.bf16 %v1739_v12 }
 0x263   : > { %1405 = vmatpush1.bf16.msra.mxu0 %v992_v17 }
 0x264   : > { %1406 = vmatprep.subr.bf16.mxu0 %v999_v19  ;;  %v4549_v19 = vld [vmem:[#allocation7] sm:$0x3f] }
 0x267   : > { %1407 = vmatpush1.bf16.msra.mxu0 %v998_v21 }
 0x268   : > { %1408 = vmatprep.subr.bf16.mxu0 %v1005_v22 }
 0x26b   : > { %1409 = vmatpush1.bf16.msra.mxu0 %v1004_v24 }
 0x26c   : > { %1410 = vmatprep.subr.bf16.mxu0 %v1011_v46  ;;  %v1900_v46 = vunpack.c.l.s8.bf16 %v1738_v16  ;;  %v1970_v16 = vunpack.c.l.s8.bf16 %v1772_v5 }
 0x26f   : > { %1411 = vmatpush1.bf16.msra.mxu0 %v1010_v54 }
 0x270   : > { %1412 = vmatprep.subr.bf16.mxu0 %v1017_v26 }
 0x273   : > { %1413 = vmatpush1.bf16.msra.mxu0 %v1016_v30 }
 0x274   : > { %1414 = vmatprep.subr.bf16.mxu0 %v1023_v31  ;;  %v1745_v31 = vld [vmem:[%s4412_s12 + $0xd8] sm:$0xff] }
 0x275   : > { %v1913_v38 = vunpack.c.l.s8.bf16 %v1745_v31  ;;  %v1919_v60 = vunpack.c.h.s8.bf16 %v1745_v31 }
 0x277   : > { %1415 = vmatpush1.bf16.msra.mxu0 %v1022_v33 }
 0x278   : > { %1416 = vmatprep.subr.bf16.mxu0 %v1029_v34 }
 0x27b   : > { %1417 = vmatpush1.bf16.msra.mxu0 %v1028_v35  ;;  %v1744_v35 = vld [vmem:[%s4412_s12 + $0xd0] sm:$0xff] }
 0x27c   : > { %1418 = vmatprep.subr.bf16.mxu0 %v1035_v36  ;;  %v1918_v58 = vunpack.c.h.s8.bf16 %v1744_v35 }
 0x27f   : > { %1419 = vmatpush1.bf16.msra.mxu0 %v1034_v39 }
 0x280   : > { %1420 = vmatprep.subr.bf16.mxu0 %v1041_v40 }
 0x283   : > { %1421 = vmatpush1.bf16.msra.mxu0 %v1040_v42  ;;  %v4562_v42 = vpop.permute.xlu0 %1700 }
 0x284   : > { %1422 = vmatprep.subr.bf16.mxu0 %v1047_v43 }
 0x287   : > { %1423 = vmatpush1.bf16.msra.mxu0 %v1046_v45  ;;  %v1912_v45 = vunpack.c.l.s8.bf16 %v1744_v35 }
 0x288   : > { %1424 = vmatprep.subr.bf16.mxu0 %v1053_v47 }
 0x28b   : > { %1425 = vmatpush1.bf16.msra.mxu0 %v1052_v49 }
 0x28c   : > { %1426 = vmatprep.subr.bf16.mxu0 %v1059_v50  ;;  %v1766_v50 = vld [vmem:[%s4412_s12 + $0x180] sm:$0xff] }
 0x28d   : > { %v1964_v51 = vunpack.c.h.s8.bf16 %v1766_v50 }
 0x28f   : > { %1427 = vmatpush1.bf16.msra.mxu0 %v1058_v53 }
 0x290   : > { %1428 = vmatprep.subr.bf16.mxu0 %v1065_v61 }
 0x293   : > { %1429 = vmatpush1.bf16.msra.mxu0 %v1064_v56 }
 0x294   : > { %1430 = vmatprep.subr.bf16.mxu0 %v1071_v57  ;;  %v1958_v57 = vunpack.c.l.s8.bf16 %v1766_v50 }
 0x297   : > { %1431 = vmatpush1.bf16.msra.mxu0 %v1070_v59 }
 0x298   : > { %2273 = vmatprep.subr.bf16.mxu0 %v1865_v62 }
 0x29a   : > { %1433 = vmatmul.mubr.bf16.vlgmr.msra.gmra.mrb[4].mxu0 %v4495_v27  ;;  %v4544_v27 = vshrl.u32 %v631_v18, 7 }
 0x29b   : > { %2274 = vmatpush1.bf16.msra.mxu0 %v1864_v0  ;;  %v1925_v0 = vunpack.c.l.s8.bf16 %v1751_v55 }
 0x29c   : > { %2275 = vmatprep.subr.bf16.mxu0 %v1871_v1  ;;  %v1445_v14 = vsub.s32 0, %v4544_v27  ;;  %v1449_v21 = vsub.s32 1, %v4544_v27  ;;  %v1453_v34 = vsub.s32 2, %v4544_v27  ;;  %v1457_v37 = vsub.s32 3, %v4544_v27  ;;  %v1750_v1 = vld [vmem:[%s4412_s12 + $0x100] sm:$0xff] }
 0x29d   : > { %v1924_v9 = vunpack.c.l.s8.bf16 %v1750_v1 }
 0x29e   : > { %v1446_v25 = vrot.slane %v4549_v19, %v1445_v14  ;;  %v1450_v30 = vrot.slane %v4549_v19, %v1449_v21  ;;  %v1454_v47 = vrot.slane %v4549_v19, %v1453_v34  ;;  %v1458_v53 = vrot.slane %v4549_v19, %v1457_v37 }
 0x29f   : > { %2276 = vmatpush1.bf16.msra.mxu0 %v1870_v3 }
 0x2a0   : > { %2277 = vmatprep.subr.bf16.mxu0 %v1877_v4  ;;  %v1773_v4 = vld [vmem:[%s4412_s12 + $0x1b8] sm:$0xff] }
 0x2a3   : > { %2278 = vmatpush1.bf16.msra.mxu0 %v1876_v7 }
 0x2a4   : > { %2279 = vmatprep.subr.bf16.mxu0 %v1883_v8 }
 0x2a7   : > { %2280 = vmatpush1.bf16.msra.mxu0 %v1882_v10 }
 0x2a8   : > { %2281 = vmatprep.subr.bf16.mxu0 %v1889_v11  ;;  %v1971_v11 = vunpack.c.l.s8.bf16 %v1773_v4 }
 0x2ab   : > { %2282 = vmatpush1.bf16.msra.mxu0 %v1888_v28  ;;  %v1931_v28 = vunpack.c.h.s8.bf16 %v1751_v55  ;;  %v1768_v55 = vld [vmem:[%s4412_s12 + $0x190] sm:$0xff] }
 0x2ac   : > { %2283 = vmatprep.subr.bf16.mxu0 %v1895_v52 }
 0x2ad   : > { %v1188_v17 = vpop.f32.mrb[0].mxu0  ;;  %v1311_v20 = vpop.f32.mrb[0].mxu1 }
 0x2ae   : > { %v1190_v22 = vpop.f32.mrb[1].mxu0  ;;  %v1313_v18 = vpop.f32.mrb[1].mxu1  ;;  %v1473_v33 = vmul.f32 %v1446_v25, %v1188_v17  ;;  %v1475_v59 = vmul.f32 %v1454_v47, %v1311_v20  ;;  %v1930_v17 = vunpack.c.h.s8.bf16 %v1750_v1  ;;  %v1977_v20 = vunpack.c.h.s8.bf16 %v1773_v4  ;;  %v1784_v47 = vld [vmem:[%s4412_s12 + $0x210] sm:$0xff] }
 0x2af   : > { %v1192_v23 = vpop.f32.mrb[2].mxu0  ;;  %v1315_v24 = vpop.f32.mrb[2].mxu1  ;;  %2284 = vmatpush1.bf16.msra.mxu0 %v1894_v13  ;;  %v1474_v36 = vmul.f32 %v1450_v30, %v1190_v22  ;;  %v1476_v2 = vmul.f32 %v1458_v53, %v1313_v18  ;;  %v1757_v13 = vld [vmem:[%s4412_s12 + $0x138] sm:$0xff]  ;;  %v1756_v18 = vld [vmem:[%s4412_s12 + $0x130] sm:$0xff]  ;;  %v1976_v25 = vunpack.c.h.s8.bf16 %v1772_v5  ;;  %v1778_v30 = vld [vmem:[%s4412_s12 + $0x1e0] sm:$0xff]  ;;  %v1994_v50 = vunpack.c.l.s8.bf16 %v1784_v47 }
 0x2b0   : > { %v1193_v54 = vpop.f32.mrb[3].mxu0  ;;  %v1316_v26 = vpop.f32.mrb[3].mxu1  ;;  %2285 = vmatprep.subr.bf16.mxu0 %v1901_v15  ;;  %v1937_v22 = vunpack.c.l.s8.bf16 %v1757_v13  ;;  %v1779_v23 = vld [vmem:[%s4412_s12 + $0x1e8] sm:$0xff]  ;;  %v1943_v31 = vunpack.c.h.s8.bf16 %v1757_v13  ;;  %v1942_v35 = vunpack.c.h.s8.bf16 %v1756_v18  ;;  %v1966_v4 = vunpack.c.h.s8.bf16 %v1768_v55 }
 0x2b1   : > { %v1936_v54 = vunpack.c.l.s8.bf16 %v1756_v18  ;;  %v1803_v18 = vld [vmem:[%s4412_s12 + $0x2a8] sm:$0xff] }
 0x2b3   : > { %2286 = vmatpush1.bf16.msra.mxu0 %v1900_v46 }
 0x2b4   : > { %2287 = vmatprep.subr.bf16.mxu0 %v1907_v29  ;;  %v1983_v29 = vunpack.c.l.s8.bf16 %v1779_v23 }
 0x2b5   : > { %v1602_v39 = vpop.f32.mrb[4].mxu1 }
 0x2b6   : > { %v1691_v40 = vadd.f32 %v1602_v39, %v1473_v33  ;;  %v1604_v41 = vpop.f32.mrb[5].mxu1  ;;  %v1763_v33 = vld [vmem:[%s4412_s12 + $0x168] sm:$0xff] }
 0x2b7   : > { %v1692_v43 = vadd.f32 %v1604_v41, %v1474_v36  ;;  %2288 = vmatpush1.bf16.msra.mxu0 %v1906_v32  ;;  %v1606_v44 = vpop.f32.mrb[6].mxu1  ;;  %v1989_v36 = vunpack.c.h.s8.bf16 %v1779_v23  ;;  %v1949_v39 = vunpack.c.l.s8.bf16 %v1763_v33  ;;  %v1785_v41 = vld [vmem:[%s4412_s12 + $0x218] sm:$0xff] }
 0x2b8   : > { %v1703_v48 = vmul.f32 %v4562_v42, %v1691_v40  ;;  %2289 = vmatprep.subr.bf16.mxu0 %v1913_v38  ;;  %v1607_v49 = vpop.f32.mrb[7].mxu1  ;;  %v1982_v38 = vunpack.c.l.s8.bf16 %v1778_v30  ;;  %v1762_v40 = vld [vmem:[%s4412_s12 + $0x160] sm:$0xff]  ;;  %v2001_v53 = vunpack.c.h.s8.bf16 %v1785_v41 }
 0x2b9   : > { %v1704_v61 = vmul.f32 %v4562_v42, %v1692_v43  ;;  %v1988_v43 = vunpack.c.h.s8.bf16 %v1778_v30  ;;  %v1948_v44 = vunpack.c.l.s8.bf16 %v1762_v40  ;;  %v1769_v49 = vld [vmem:[%s4412_s12 + $0x198] sm:$0xff]  ;;  %v1787_v30 = vld [vmem:[%s4412_s12 + $0x228] sm:$0xff] }
 0x2ba   : > { %v4576_v62 = vpack.c.bf16 %v1703_v48, %v1703_v48  ;;  %v1955_v48 = vunpack.c.h.s8.bf16 %v1763_v33  ;;  %v1967_v1 = vunpack.c.h.s8.bf16 %v1769_v49  ;;  %v2037_v33 = vunpack.c.h.s8.bf16 %v1803_v18 }
 0x2bb   : > { %v4574_v56 = vpack.c.bf16 %v1704_v61, %v1704_v61  ;;  %2290 = vmatpush1.bf16.msra.mxu0 %v1912_v45  ;;  %v1995_v45 = vunpack.c.l.s8.bf16 %v1785_v41  ;;  %v1961_v61 = vunpack.c.l.s8.bf16 %v1769_v49 }
 0x2bc   : > { %2291 = vmatprep.subr.bf16.mxu0 %v1919_v60  ;;  %v1954_v60 = vunpack.c.h.s8.bf16 %v1762_v40 }
 0x2bd   : > { %v1643_v3 = vpop.f32.mrb[8].mxu1  ;;  %2182 = vmatprep.mubr.bf16.mxu1 %v4574_v56  ;;  %2305 = vmatprep.mubr.bf16.mxu0 %v4574_v56 }
 0x2be   : > { %v4583_v6 = vadd.f32 %v1643_v3, %v1475_v59  ;;  %v1645_v7 = vpop.f32.mrb[9].mxu1  ;;  %2183 = vmatmul.mubr.bf16.vlgmr.msra.gmra.mrb[16].mxu1 %v4576_v62  ;;  %v1960_v59 = vunpack.c.l.s8.bf16 %v1768_v55 }
 0x2bf   : > { %v1694_v8 = vadd.f32 %v1645_v7, %v1476_v2  ;;  %2192 = vmatpush1.bf16.msra.mxu1 %v1958_v57  ;;  %2292 = vmatpush1.bf16.msra.mxu0 %v1918_v58  ;;  %v1647_v10 = vpop.f32.mrb[10].mxu1  ;;  %v1791_v57 = vld [vmem:[%s4412_s12 + $0x248] sm:$0xff]  ;;  %v2000_v58 = vunpack.c.h.s8.bf16 %v1784_v47 }
 0x2c0   : > { %2193 = vmatprep.subr.bf16.mxu1 %v1965_v63  ;;  %2293 = vmatprep.subr.bf16.mxu0 %v1925_v0  ;;  %v1648_v52 = vpop.f32.mrb[11].mxu1  ;;  %v2007_v63 = vunpack.c.l.s8.bf16 %v1791_v57  ;;  %v1790_v0 = vld [vmem:[%s4412_s12 + $0x240] sm:$0xff]  ;;  %v1775_v2 = vld [vmem:[%s4412_s12 + $0x1c8] sm:$0xff]  ;;  %v2013_v7 = vunpack.c.h.s8.bf16 %v1791_v57  ;;  %v1705_v57 = vmul.f32 %v4562_v42, %v4583_v6 }
 0x2c1   : > { %v1706_v12 = vmul.f32 %v4562_v42, %v1694_v8  ;;  %v2006_v3 = vunpack.c.l.s8.bf16 %v1790_v0  ;;  %v1973_v8 = vunpack.c.l.s8.bf16 %v1775_v2  ;;  %v2012_v10 = vunpack.c.h.s8.bf16 %v1790_v0  ;;  %v1799_v0 = vld [vmem:[%s4412_s12 + $0x288] sm:$0xff] }
 0x2c2   : > { %v1979_v52 = vunpack.c.h.s8.bf16 %v1775_v2 }
 0x2c3   : > { %v4589_v15 = vpack.c.bf16 %v1706_v12, %v1706_v12  ;;  %2194 = vmatpush1.bf16.msra.mxu1 %v1964_v51  ;;  %2294 = vmatpush1.bf16.msra.mxu0 %v1924_v9  ;;  %v1774_v51 = vld [vmem:[%s4412_s12 + $0x1c0] sm:$0xff]  ;;  %v1797_v9 = vld [vmem:[%s4412_s12 + $0x278] sm:$0xff] }
 0x2c4   : > { %2195 = vmatprep.subr.bf16.mxu1 %v1971_v11  ;;  %2295 = vmatprep.subr.bf16.mxu0 %v1931_v28  ;;  %v1972_v11 = vunpack.c.l.s8.bf16 %v1774_v51  ;;  %v2019_v5 = vunpack.c.l.s8.bf16 %v1797_v9  ;;  %v1796_v28 = vld [vmem:[%s4412_s12 + $0x270] sm:$0xff]  ;;  %v1781_v12 = vld [vmem:[%s4412_s12 + $0x1f8] sm:$0xff] }
 0x2c5   : > { %2223 = vmatprep.mubr.bf16.mxu1 %v4589_v15  ;;  %v4594_v24 = vpop.f32.mrb[12].mxu1  ;;  %v2018_v13 = vunpack.c.l.s8.bf16 %v1796_v28  ;;  %v2024_v23 = vunpack.c.h.s8.bf16 %v1796_v28  ;;  %v1805_v28 = vld [vmem:[%s4412_s12 + $0x2b8] sm:$0xff] }
 0x2c6   : > { %v4596_v46 = vpop.f32.mrb[13].mxu1 }
 0x2c7   : > { %2196 = vmatpush1.bf16.msra.mxu1 %v1970_v16  ;;  %2296 = vmatpush1.bf16.msra.mxu0 %v1930_v17  ;;  %v1688_v26 = vpop.f32.mrb[14].mxu1  ;;  %v1978_v16 = vunpack.c.h.s8.bf16 %v1774_v51  ;;  %v2025_v17 = vunpack.c.h.s8.bf16 %v1797_v9 }
 0x2c8   : > { %2197 = vmatprep.subr.bf16.mxu1 %v1977_v20  ;;  %2297 = vmatprep.subr.bf16.mxu0 %v1937_v22  ;;  %v1689_v32 = vpop.f32.mrb[15].mxu1  ;;  %v1985_v20 = vunpack.c.l.s8.bf16 %v1781_v12  ;;  %v1780_v22 = vld [vmem:[%s4412_s12 + $0x1f0] sm:$0xff]  ;;  %v1802_v26 = vld [vmem:[%s4412_s12 + $0x2a0] sm:$0xff] }
 0x2c9   : > { %v1990_v32 = vunpack.c.h.s8.bf16 %v1780_v22 }
 0x2cb   : > { %2198 = vmatpush1.bf16.msra.mxu1 %v1976_v25  ;;  %2298 = vmatpush1.bf16.msra.mxu0 %v1936_v54  ;;  %v1984_v25 = vunpack.c.l.s8.bf16 %v1780_v22  ;;  %v2031_v54 = vunpack.c.l.s8.bf16 %v1803_v18 }
 0x2cc   : > { %2199 = vmatprep.subr.bf16.mxu1 %v1983_v29  ;;  %2299 = vmatprep.subr.bf16.mxu0 %v1943_v31  ;;  %v1991_v29 = vunpack.c.h.s8.bf16 %v1781_v12  ;;  %v2030_v31 = vunpack.c.l.s8.bf16 %v1802_v26 }
 0x2cf   : > { %2200 = vmatpush1.bf16.msra.mxu1 %v1982_v38  ;;  %2300 = vmatpush1.bf16.msra.mxu0 %v1942_v35  ;;  %v1997_v38 = vunpack.c.l.s8.bf16 %v1787_v30  ;;  %v1786_v35 = vld [vmem:[%s4412_s12 + $0x220] sm:$0xff] }
 0x2d0   : > { %2201 = vmatprep.subr.bf16.mxu1 %v1989_v36  ;;  %2301 = vmatprep.subr.bf16.mxu0 %v1949_v39  ;;  %v1809_v36 = vld [vmem:[%s4412_s12 + $0x2d8] sm:$0xff]  ;;  %v2036_v39 = vunpack.c.h.s8.bf16 %v1802_v26  ;;  %v1996_v40 = vunpack.c.l.s8.bf16 %v1786_v35  ;;  %v1811_v26 = vld [vmem:[%s4412_s12 + $0x2e8] sm:$0xff] }
 0x2d1   : > { %v2043_v41 = vunpack.c.l.s8.bf16 %v1809_v36  ;;  %v2049_v49 = vunpack.c.h.s8.bf16 %v1809_v36 }
 0x2d3   : > { %2202 = vmatpush1.bf16.msra.mxu1 %v1988_v43  ;;  %2302 = vmatpush1.bf16.msra.mxu0 %v1948_v44  ;;  %v1808_v43 = vld [vmem:[%s4412_s12 + $0x2d0] sm:$0xff]  ;;  %v2003_v44 = vunpack.c.h.s8.bf16 %v1787_v30 }
 0x2d4   : > { %2203 = vmatprep.subr.bf16.mxu1 %v1995_v45  ;;  %2303 = vmatprep.subr.bf16.mxu0 %v1955_v48  ;;  %v1793_v45 = vld [vmem:[%s4412_s12 + $0x258] sm:$0xff]  ;;  %v2042_v47 = vunpack.c.l.s8.bf16 %v1808_v43  ;;  %v2002_v48 = vunpack.c.h.s8.bf16 %v1786_v35 }
 0x2d7   : > { %2204 = vmatpush1.bf16.msra.mxu1 %v1994_v50  ;;  %2304 = vmatpush1.bf16.msra.mxu0 %v1954_v60  ;;  %v2009_v50 = vunpack.c.l.s8.bf16 %v1793_v45  ;;  %v1792_v60 = vld [vmem:[%s4412_s12 + $0x250] sm:$0xff] }
 0x2d8   : > { %2205 = vmatprep.subr.bf16.mxu1 %v2001_v53  ;;  %2314 = vmatprep.subr.bf16.mxu0 %v1961_v61  ;;  %v1815_v53 = vld [vmem:[%s4412_s12 + $0x308] sm:$0xff]  ;;  %v2048_v61 = vunpack.c.h.s8.bf16 %v1808_v43  ;;  %v2008_v55 = vunpack.c.l.s8.bf16 %v1792_v60  ;;  %v1817_v43 = vld [vmem:[%s4412_s12 + $0x318] sm:$0xff] }
 0x2d9   : > { %v2061_v6 = vunpack.c.h.s8.bf16 %v1815_v53 }
 0x2da   : > { %2306 = vmatmul.mubr.bf16.vlgmr.msra.gmra.mrb[8].mxu0 %v4576_v62 }
 0x2db   : > { %2206 = vmatpush1.bf16.msra.mxu1 %v2000_v58  ;;  %2315 = vmatpush1.bf16.msra.mxu0 %v1960_v59  ;;  %v2015_v58 = vunpack.c.h.s8.bf16 %v1793_v45  ;;  %v2055_v59 = vunpack.c.l.s8.bf16 %v1815_v53 }
 0x2dc   : > { %2346 = vmatprep.mubr.bf16.mxu0 %v4589_v15  ;;  %2207 = vmatprep.subr.bf16.mxu1 %v2007_v63  ;;  %v1814_v63 = vld [vmem:[%s4412_s12 + $0x300] sm:$0xff] }
 0x2dd   : > { %2316 = vmatprep.subr.bf16.mxu0 %v1967_v1  ;;  %v2014_v1 = vunpack.c.h.s8.bf16 %v1792_v60  ;;  %v2054_v2 = vunpack.c.l.s8.bf16 %v1814_v63  ;;  %v2060_v9 = vunpack.c.h.s8.bf16 %v1814_v63 }
 0x2df   : > { %2208 = vmatpush1.bf16.msra.mxu1 %v2006_v3  ;;  %2317 = vmatpush1.bf16.msra.mxu0 %v1966_v4  ;;  %v4628_v3 = vpack.c.bf16 %v1705_v57, %v1705_v57  ;;  %v2021_v4 = vunpack.c.l.s8.bf16 %v1799_v0  ;;  %v1838_v57 = vld [vmem:[%s4412_s12 + $0x3c0] sm:$0xff] }
 0x2e0   : > { %2209 = vmatprep.subr.bf16.mxu1 %v2013_v7  ;;  %2318 = vmatprep.subr.bf16.mxu0 %v1973_v8  ;;  %v1798_v7 = vld [vmem:[%s4412_s12 + $0x280] sm:$0xff]  ;;  %v1821_v8 = vld [vmem:[%s4412_s12 + $0x338] sm:$0xff]  ;;  %v2102_v63 = vunpack.c.l.s8.bf16 %v1838_v57 }
 0x2e1   : > { %v2020_v51 = vunpack.c.l.s8.bf16 %v1798_v7 }
 0x2e3   : > { %2210 = vmatpush1.bf16.msra.mxu1 %v2012_v10  ;;  %2319 = vmatpush1.bf16.msra.mxu0 %v1972_v11  ;;  %v2027_v10 = vunpack.c.h.s8.bf16 %v1799_v0  ;;  %v2067_v11 = vunpack.c.l.s8.bf16 %v1821_v8 }
 0x2e4   : > { %2211 = vmatprep.subr.bf16.mxu1 %v2019_v5  ;;  %2320 = vmatprep.subr.bf16.mxu0 %v1979_v52  ;;  %v1820_v5 = vld [vmem:[%s4412_s12 + $0x330] sm:$0xff]  ;;  %v2026_v52 = vunpack.c.h.s8.bf16 %v1798_v7 }
 0x2e5   : > { %v2066_v12 = vunpack.c.l.s8.bf16 %v1820_v5  ;;  %v2072_v18 = vunpack.c.h.s8.bf16 %v1820_v5 }
 0x2e7   : > { %2212 = vmatpush1.bf16.msra.mxu1 %v2018_v13  ;;  %2321 = vmatpush1.bf16.msra.mxu0 %v1978_v16  ;;  %v2033_v13 = vunpack.c.l.s8.bf16 %v1805_v28  ;;  %v1804_v16 = vld [vmem:[%s4412_s12 + $0x2b0] sm:$0xff] }
 0x2e8   : > { %2213 = vmatprep.subr.bf16.mxu1 %v2025_v17  ;;  %2322 = vmatprep.subr.bf16.mxu0 %v1985_v20  ;;  %v2073_v17 = vunpack.c.h.s8.bf16 %v1821_v8  ;;  %v1827_v20 = vld [vmem:[%s4412_s12 + $0x368] sm:$0xff]  ;;  %v2032_v22 = vunpack.c.l.s8.bf16 %v1804_v16 }
 0x2eb   : > { %2214 = vmatpush1.bf16.msra.mxu1 %v2024_v23  ;;  %2323 = vmatpush1.bf16.msra.mxu0 %v1984_v25  ;;  %v2039_v23 = vunpack.c.h.s8.bf16 %v1805_v28  ;;  %v2079_v25 = vunpack.c.l.s8.bf16 %v1827_v20 }
 0x2ec   : > { %2215 = vmatprep.subr.bf16.mxu1 %v2031_v54  ;;  %2324 = vmatprep.subr.bf16.mxu0 %v1991_v29  ;;  %v1826_v54 = vld [vmem:[%s4412_s12 + $0x360] sm:$0xff]  ;;  %v2038_v29 = vunpack.c.h.s8.bf16 %v1804_v16 }
 0x2ed   : > { %v2078_v30 = vunpack.c.l.s8.bf16 %v1826_v54  ;;  %v2084_v36 = vunpack.c.h.s8.bf16 %v1826_v54 }
 0x2ef   : > { %2216 = vmatpush1.bf16.msra.mxu1 %v2030_v31  ;;  %2325 = vmatpush1.bf16.msra.mxu0 %v1990_v32  ;;  %v2045_v31 = vunpack.c.l.s8.bf16 %v1811_v26  ;;  %v1810_v32 = vld [vmem:[%s4412_s12 + $0x2e0] sm:$0xff] }
 0x2f0   : > { %2217 = vmatprep.subr.bf16.mxu1 %v2037_v33  ;;  %2326 = vmatprep.subr.bf16.mxu0 %v1997_v38  ;;  %v2085_v33 = vunpack.c.h.s8.bf16 %v1827_v20  ;;  %v1833_v38 = vld [vmem:[%s4412_s12 + $0x398] sm:$0xff]  ;;  %v2044_v35 = vunpack.c.l.s8.bf16 %v1810_v32 }
 0x2f3   : > { %2218 = vmatpush1.bf16.msra.mxu1 %v2036_v39  ;;  %2327 = vmatpush1.bf16.msra.mxu0 %v1996_v40  ;;  %v2051_v39 = vunpack.c.h.s8.bf16 %v1811_v26  ;;  %v2091_v40 = vunpack.c.l.s8.bf16 %v1833_v38 }
 0x2f4   : > { %2219 = vmatprep.subr.bf16.mxu1 %v2043_v41  ;;  %2328 = vmatprep.subr.bf16.mxu0 %v2003_v44  ;;  %v1832_v41 = vld [vmem:[%s4412_s12 + $0x390] sm:$0xff]  ;;  %v2050_v44 = vunpack.c.h.s8.bf16 %v1810_v32 }
 0x2f5   : > { %v2090_v45 = vunpack.c.l.s8.bf16 %v1832_v41  ;;  %v2096_v53 = vunpack.c.h.s8.bf16 %v1832_v41 }
 0x2f7   : > { %2220 = vmatpush1.bf16.msra.mxu1 %v2042_v47  ;;  %2329 = vmatpush1.bf16.msra.mxu0 %v2002_v48  ;;  %v2057_v47 = vunpack.c.l.s8.bf16 %v1817_v43  ;;  %v1816_v48 = vld [vmem:[%s4412_s12 + $0x310] sm:$0xff] }
 0x2f8   : > { %2221 = vmatprep.subr.bf16.mxu1 %v2049_v49  ;;  %2330 = vmatprep.subr.bf16.mxu0 %v2009_v50  ;;  %v2097_v49 = vunpack.c.h.s8.bf16 %v1833_v38  ;;  %v1839_v50 = vld [vmem:[%s4412_s12 + $0x3c8] sm:$0xff]  ;;  %v2056_v60 = vunpack.c.l.s8.bf16 %v1816_v48 }
 0x2fb   : > { %2222 = vmatpush1.bf16.msra.mxu1 %v2048_v61  ;;  %2331 = vmatpush1.bf16.msra.mxu0 %v2008_v55  ;;  %v2063_v61 = vunpack.c.h.s8.bf16 %v1817_v43  ;;  %v2103_v55 = vunpack.c.l.s8.bf16 %v1839_v50 }
 0x2fc   : > { %2332 = vmatprep.subr.bf16.mxu0 %v2015_v58  ;;  %2232 = vmatprep.subr.bf16.mxu1 %v2055_v59  ;;  %v1823_v58 = vld [vmem:[%s4412_s12 + $0x348] sm:$0xff]  ;;  %v2062_v59 = vunpack.c.h.s8.bf16 %v1816_v48 }
 0x2fd   : > { %v2069_v0 = vunpack.c.l.s8.bf16 %v1823_v58  ;;  %v2075_v8 = vunpack.c.h.s8.bf16 %v1823_v58 }
 0x2fe   : > { %2224 = vmatmul.mubr.bf16.vlgmr.msra.gmra.mrb[16].mxu1 %v4628_v3 }
 0x2ff   : > { %2333 = vmatpush1.bf16.msra.mxu0 %v2014_v1  ;;  %2233 = vmatpush1.bf16.msra.mxu1 %v2054_v2  ;;  %v1822_v1 = vld [vmem:[%s4412_s12 + $0x340] sm:$0xff]  ;;  %v2109_v2 = vunpack.c.h.s8.bf16 %v1839_v50 }
 0x300   : > { %2334 = vmatprep.subr.bf16.mxu0 %v2021_v4  ;;  %2234 = vmatprep.subr.bf16.mxu1 %v2061_v6  ;;  %v1845_v4 = vld [vmem:[%s4412_s12 + $0x3f8] sm:$0xff]  ;;  %v2068_v7 = vunpack.c.l.s8.bf16 %v1822_v1  ;;  %v2108_v6 = vunpack.c.h.s8.bf16 %v1838_v57  ;;  %v1846_v57 = vld [vmem:[%s4412_s12 + $0x400] sm:$0xff] }
 0x301   : > { %v2116_v58 = vunpack.c.l.s8.bf16 %v1846_v57 }
 0x303   : > { %2335 = vmatpush1.bf16.msra.mxu0 %v2020_v51  ;;  %2235 = vmatpush1.bf16.msra.mxu1 %v2060_v9  ;;  %v2115_v51 = vunpack.c.l.s8.bf16 %v1845_v4  ;;  %v1844_v9 = vld [vmem:[%s4412_s12 + $0x3f0] sm:$0xff] }
 0x304   : > { %2336 = vmatprep.subr.bf16.mxu0 %v2027_v10  ;;  %2236 = vmatprep.subr.bf16.mxu1 %v2067_v11  ;;  %v1829_v10 = vld [vmem:[%s4412_s12 + $0x378] sm:$0xff]  ;;  %v2074_v11 = vunpack.c.h.s8.bf16 %v1822_v1  ;;  %v2114_v5 = vunpack.c.l.s8.bf16 %v1844_v9 }
 0x305   : > { %v2081_v28 = vunpack.c.l.s8.bf16 %v1829_v10  ;;  %v2087_v20 = vunpack.c.h.s8.bf16 %v1829_v10  ;;  %v2592_v10 = vld [vmem:[%s4446_s16 + $0x20] sm:$0x3] }
 0x307   : > { %2337 = vmatpush1.bf16.msra.mxu0 %v2026_v52  ;;  %2237 = vmatpush1.bf16.msra.mxu1 %v2066_v12  ;;  %v1828_v52 = vld [vmem:[%s4412_s12 + $0x370] sm:$0xff]  ;;  %v2121_v12 = vunpack.c.h.s8.bf16 %v1845_v4 }
 0x308   : > { %2338 = vmatprep.subr.bf16.mxu0 %v2033_v13  ;;  %2238 = vmatprep.subr.bf16.mxu1 %v2073_v17  ;;  %v1851_v13 = vld [vmem:[%s4412_s12 + $0x428] sm:$0xff]  ;;  %v2080_v16 = vunpack.c.l.s8.bf16 %v1828_v52  ;;  %v2120_v17 = vunpack.c.h.s8.bf16 %v1844_v9  ;;  %v1858_v9 = vld [vmem:[%s4412_s12 + $0x460] sm:$0xff] }
 0x30b   : > { %2339 = vmatpush1.bf16.msra.mxu0 %v2032_v22  ;;  %2239 = vmatpush1.bf16.msra.mxu1 %v2072_v18  ;;  %v2127_v22 = vunpack.c.l.s8.bf16 %v1851_v13  ;;  %v1850_v18 = vld [vmem:[%s4412_s12 + $0x420] sm:$0xff] }
 0x30c   : > { %2340 = vmatprep.subr.bf16.mxu0 %v2039_v23  ;;  %2240 = vmatprep.subr.bf16.mxu1 %v2079_v25  ;;  %v1835_v23 = vld [vmem:[%s4412_s12 + $0x3a8] sm:$0xff]  ;;  %v2086_v25 = vunpack.c.h.s8.bf16 %v1828_v52  ;;  %v2126_v54 = vunpack.c.l.s8.bf16 %v1850_v18  ;;  %v2688_v52 = vunpack.c.l.s8.bf16 %v2592_v10 }
 0x30d   : > { %v2093_v26 = vunpack.c.l.s8.bf16 %v1835_v23  ;;  %v2099_v38 = vunpack.c.h.s8.bf16 %v1835_v23 }
 0x30f   : > { %2341 = vmatpush1.bf16.msra.mxu0 %v2038_v29  ;;  %2241 = vmatpush1.bf16.msra.mxu1 %v2078_v30  ;;  %v1834_v29 = vld [vmem:[%s4412_s12 + $0x3a0] sm:$0xff]  ;;  %v2133_v30 = vunpack.c.h.s8.bf16 %v1851_v13  ;;  %v2146_v13 = vunpack.c.h.s8.bf16 %v1858_v9 }
 0x310   : > { %2342 = vmatprep.subr.bf16.mxu0 %v2045_v31  ;;  %2242 = vmatprep.subr.bf16.mxu1 %v2085_v33  ;;  %v1857_v31 = vld [vmem:[%s4412_s12 + $0x458] sm:$0xff]  ;;  %v2092_v32 = vunpack.c.l.s8.bf16 %v1834_v29  ;;  %v2132_v33 = vunpack.c.h.s8.bf16 %v1850_v18 }
 0x313   : > { %2343 = vmatpush1.bf16.msra.mxu0 %v2044_v35  ;;  %2243 = vmatpush1.bf16.msra.mxu1 %v2084_v36  ;;  %v2139_v35 = vunpack.c.l.s8.bf16 %v1857_v31  ;;  %v1856_v36 = vld [vmem:[%s4412_s12 + $0x450] sm:$0xff] }
 0x314   : > { %2344 = vmatprep.subr.bf16.mxu0 %v2051_v39  ;;  %2244 = vmatprep.subr.bf16.mxu1 %v2091_v40  ;;  %v1841_v39 = vld [vmem:[%s4412_s12 + $0x3d8] sm:$0xff]  ;;  %v2098_v40 = vunpack.c.h.s8.bf16 %v1834_v29  ;;  %v2138_v41 = vunpack.c.l.s8.bf16 %v1856_v36  ;;  %v2577_v29 = vld [vmem:[%s4446_s16 + $0x2] sm:$0x3] }
 0x315   : > { %v2105_v43 = vunpack.c.l.s8.bf16 %v1841_v39  ;;  %v2111_v50 = vunpack.c.h.s8.bf16 %v1841_v39  ;;  %v1722_v39 = vld [vmem:[%s4412_s12 + $0x20] sm:$0xff] }
 0x317   : > { %2345 = vmatpush1.bf16.msra.mxu0 %v2050_v44  ;;  %2245 = vmatpush1.bf16.msra.mxu1 %v2090_v45  ;;  %v1840_v44 = vld [vmem:[%s4412_s12 + $0x3d0] sm:$0xff]  ;;  %v2145_v45 = vunpack.c.h.s8.bf16 %v1857_v31 }
 0x318   : > { %2355 = vmatprep.subr.bf16.mxu0 %v2057_v47  ;;  %2246 = vmatprep.subr.bf16.mxu1 %v2097_v49  ;;  %v4662_v47 = vld [vmem:[%s4412_s12 + $0x28] sm:$0xff]  ;;  %v2104_v48 = vunpack.c.l.s8.bf16 %v1840_v44  ;;  %v2144_v49 = vunpack.c.h.s8.bf16 %v1856_v36 }
 0x31a   : > { %2347 = vmatmul.mubr.bf16.vlgmr.msra.gmra.mrb[8].mxu0 %v4628_v3 }
 0x31b   : > { %2356 = vmatpush1.bf16.msra.mxu0 %v2056_v60  ;;  %2247 = vmatpush1.bf16.msra.mxu1 %v2096_v53  ;;  %v1867_v60 = vunpack.c.l.s8.bf16 %v4662_v47  ;;  %v1847_v53 = vld [vmem:[%s4412_s12 + $0x408] sm:$0xff] }
 0x31c   : > { %2357 = vmatprep.subr.bf16.mxu0 %v2063_v61  ;;  %2248 = vmatprep.subr.bf16.mxu1 %v2103_v55  ;;  %v2110_v61 = vunpack.c.h.s8.bf16 %v1840_v44  ;;  %v2117_v55 = vunpack.c.l.s8.bf16 %v1847_v53  ;;  %v2579_v44 = vld [vmem:[%s4446_s16 + $0x6] sm:$0x3] }
 0x31f   : > { %2358 = vmatpush1.bf16.msra.mxu0 %v2062_v59  ;;  %2249 = vmatpush1.bf16.msra.mxu1 %v2102_v63  ;;  %v2123_v59 = vunpack.c.h.s8.bf16 %v1847_v53  ;;  %v1853_v63 = vld [vmem:[%s4412_s12 + $0x438] sm:$0xff] }
 0x320   : > { %2359 = vmatprep.subr.bf16.mxu0 %v2069_v0  ;;  %2250 = vmatprep.subr.bf16.mxu1 %v2109_v2  ;;  %v2122_v0 = vunpack.c.h.s8.bf16 %v1846_v57  ;;  %v2129_v1 = vunpack.c.l.s8.bf16 %v1853_v63  ;;  %v1852_v2 = vld [vmem:[%s4412_s12 + $0x430] sm:$0xff] }
 0x321   : > { %v2128_v4 = vunpack.c.l.s8.bf16 %v1852_v2 }
 0x323   : > { %2360 = vmatpush1.bf16.msra.mxu0 %v2068_v7  ;;  %2251 = vmatpush1.bf16.msra.mxu1 %v2108_v6  ;;  %v2135_v7 = vunpack.c.h.s8.bf16 %v1853_v63  ;;  %v1859_v6 = vld [vmem:[%s4412_s12 + $0x468] sm:$0xff]  ;;  %v2580_v63 = vld [vmem:[%s4446_s16 + $0x8] sm:$0x3] }
 0x324   : > { %2361 = vmatprep.subr.bf16.mxu0 %v2075_v8  ;;  %2252 = vmatprep.subr.bf16.mxu1 %v2115_v51  ;;  %v2134_v8 = vunpack.c.h.s8.bf16 %v1852_v2  ;;  %v2141_v51 = vunpack.c.l.s8.bf16 %v1859_v6  ;;  %v1729_v2 = vld [vmem:[%s4412_s12 + $0x58] sm:$0xff] }
 0x327   : > { %2362 = vmatpush1.bf16.msra.mxu0 %v2074_v11  ;;  %2253 = vmatpush1.bf16.msra.mxu1 %v2114_v5  ;;  %v2593_v11 = vld [vmem:[%s4446_s16 + $0x22] sm:$0x3]  ;;  %v2140_v5 = vunpack.c.l.s8.bf16 %v1858_v9 }
 0x328   : > { %2363 = vmatprep.subr.bf16.mxu0 %v2081_v28  ;;  %2254 = vmatprep.subr.bf16.mxu1 %v2121_v12  ;;  %v2147_v28 = vunpack.c.h.s8.bf16 %v1859_v6  ;;  %v2689_v12 = vunpack.c.l.s8.bf16 %v2593_v11  ;;  %v1872_v6 = vunpack.c.h.s8.bf16 %v1722_v39  ;;  %v1728_v11 = vld [vmem:[%s4412_s12 + $0x50] sm:$0xff] }
 0x32b   : > { %2364 = vmatpush1.bf16.msra.mxu0 %v2080_v16  ;;  %2255 = vmatpush1.bf16.msra.mxu1 %v2120_v17  ;;  %v3406_v16 = vcombine.low %v2688_v52, %v2689_v12  ;;  %v1461_v17 = vsub.s32 4, %v4544_v27  ;;  %v2582_v52 = vld [vmem:[%s4446_s16 + $0xc] sm:$0x3]  ;;  %v2583_v12 = vld [vmem:[%s4446_s16 + $0xe] sm:$0x3] }
 0x32c   : > { %2365 = vmatprep.subr.bf16.mxu0 %v2087_v20  ;;  %2256 = vmatprep.subr.bf16.mxu1 %v2127_v22  ;;  %v1465_v20 = vsub.s32 5, %v4544_v27 }
 0x32d   : > { %v1462_v22 = vrot.slane %v4549_v19, %v1461_v17 }
 0x32e   : > { %v1466_v18 = vrot.slane %v4549_v19, %v1465_v20 }
 0x32f   : > { %2366 = vmatpush1.bf16.msra.mxu0 %v2086_v25  ;;  %2257 = vmatpush1.bf16.msra.mxu1 %v2126_v54 }
 0x330   : > { %2367 = vmatprep.subr.bf16.mxu0 %v2093_v26  ;;  %2258 = vmatprep.subr.bf16.mxu1 %v2133_v30  ;;  %v2576_v26 = vld [vmem:[%s4446_s16] sm:$0x3] }
 0x331   : > { %v2672_v19 = vunpack.c.l.s8.bf16 %v2576_v26 }
 0x333   : > { %2368 = vmatpush1.bf16.msra.mxu0 %v2092_v32  ;;  %2259 = vmatpush1.bf16.msra.mxu1 %v2132_v33 }
 0x334   : > { %2369 = vmatprep.subr.bf16.mxu0 %v2099_v38  ;;  %2260 = vmatprep.subr.bf16.mxu1 %v2139_v35  ;;  %v2594_v38 = vld [vmem:[%s4446_s16 + $0x24] sm:$0x3]  ;;  %v2595_v35 = vld [vmem:[%s4446_s16 + $0x26] sm:$0x3] }
 0x337   : > { %2370 = vmatpush1.bf16.msra.mxu0 %v2098_v40  ;;  %2261 = vmatpush1.bf16.msra.mxu1 %v2138_v41  ;;  %v2673_v40 = vunpack.c.l.s8.bf16 %v2577_v29 }
 0x338   : > { %2371 = vmatprep.subr.bf16.mxu0 %v2105_v43  ;;  %2262 = vmatprep.subr.bf16.mxu1 %v2145_v45  ;;  %v2578_v43 = vld [vmem:[%s4446_s16 + $0x4] sm:$0x3] }
 0x339   : > { %v3398_v53 = vcombine.low %v2672_v19, %v2673_v40 }
 0x33b   : > { %2372 = vmatpush1.bf16.msra.mxu0 %v2104_v48  ;;  %2263 = vmatpush1.bf16.msra.mxu1 %v2144_v49  ;;  %v2690_v48 = vunpack.c.l.s8.bf16 %v2594_v38  ;;  %v2691_v49 = vunpack.c.l.s8.bf16 %v2595_v35  ;;  %v2603_v38 = vld [vmem:[%s4446_s16 + $0x36] sm:$0x3]  ;;  %v1884_v35 = vunpack.c.h.s8.bf16 %v1728_v11 }
 0x33c   : > { %2373 = vmatprep.subr.bf16.mxu0 %v2111_v50  ;;  %2396 = vmatprep.subr.bf16.mxu1 %v1867_v60  ;;  %v2596_v50 = vld [vmem:[%s4446_s16 + $0x28] sm:$0x3]  ;;  %v1866_v60 = vunpack.c.l.s8.bf16 %v1722_v39 }
 0x33f   : > { %2374 = vmatpush1.bf16.msra.mxu0 %v2110_v61  ;;  %v2674_v61 = vunpack.c.l.s8.bf16 %v2578_v43  ;;  %v1734_v43 = vld [vmem:[%s4412_s12 + $0x80] sm:$0xff] }
 0x340   : > { %2375 = vmatprep.subr.bf16.mxu0 %v2117_v55  ;;  %v2675_v55 = vunpack.c.l.s8.bf16 %v2579_v44 }
 0x343   : > { %2376 = vmatpush1.bf16.msra.mxu0 %v2116_v58  ;;  %v2692_v58 = vunpack.c.l.s8.bf16 %v2596_v50  ;;  %v2604_v50 = vld [vmem:[%s4446_s16 + $0x38] sm:$0x3] }
 0x344   : > { %2377 = vmatprep.subr.bf16.mxu0 %v2123_v59 }
 0x347   : > { %2378 = vmatpush1.bf16.msra.mxu0 %v2122_v0  ;;  %v2581_v0 = vld [vmem:[%s4446_s16 + $0xa] sm:$0x3] }
 0x348   : > { %2379 = vmatprep.subr.bf16.mxu0 %v2129_v1  ;;  %v3407_v1 = vcombine.low %v2690_v48, %v2691_v49  ;;  %v2677_v9 = vunpack.c.l.s8.bf16 %v2581_v0  ;;  %v2586_v48 = vld [vmem:[%s4446_s16 + $0x14] sm:$0x3]  ;;  %v2587_v49 = vld [vmem:[%s4446_s16 + $0x16] sm:$0x3] }
 0x34b   : > { %2380 = vmatpush1.bf16.msra.mxu0 %v2128_v4  ;;  %v2598_v4 = vld [vmem:[%s4446_s16 + $0x2c] sm:$0x3] }
 0x34c   : > { %2381 = vmatprep.subr.bf16.mxu0 %v2135_v7  ;;  %v2599_v7 = vld [vmem:[%s4446_s16 + $0x2e] sm:$0x3] }
 0x34f   : > { %2382 = vmatpush1.bf16.msra.mxu0 %v2134_v8  ;;  %v3399_v8 = vcombine.low %v2674_v61, %v2675_v55  ;;  %v2682_v61 = vunpack.c.l.s8.bf16 %v2586_v48  ;;  %v2683_v55 = vunpack.c.l.s8.bf16 %v2587_v49 }
 0x350   : > { %2383 = vmatprep.subr.bf16.mxu0 %v2141_v51  ;;  %v2676_v51 = vunpack.c.l.s8.bf16 %v2580_v63  ;;  %v2700_v63 = vunpack.c.l.s8.bf16 %v2604_v50  ;;  %v2660_v50 = vld [vmem:[%s4446_s16 + $0xa8] sm:$0x3] }
 0x353   : > { %2384 = vmatpush1.bf16.msra.mxu0 %v2140_v5  ;;  %v2694_v5 = vunpack.c.l.s8.bf16 %v2598_v4  ;;  %v2606_v4 = vld [vmem:[%s4446_s16 + $0x3c] sm:$0x3] }
 0x354   : > { %2385 = vmatprep.subr.bf16.mxu0 %v2147_v28  ;;  %v2695_v28 = vunpack.c.l.s8.bf16 %v2599_v7  ;;  %v2607_v7 = vld [vmem:[%s4446_s16 + $0x3e] sm:$0x3] }
 0x357   : > { %2386 = vmatpush1.bf16.msra.mxu0 %v2146_v13  ;;  %v2600_v13 = vld [vmem:[%s4446_s16 + $0x30] sm:$0x3] }
 0x358   : > { %3451 = vmatprep.subr.bf16.mxu0 %v3406_v16  ;;  %v2601_v16 = vld [vmem:[%s4446_s16 + $0x32] sm:$0x3]  ;;  %v2696_v26 = vunpack.c.l.s8.bf16 %v2600_v13  ;;  %v2656_v13 = vld [vmem:[%s4446_s16 + $0xa0] sm:$0x3] }
 0x359   : > { %v2697_v29 = vunpack.c.l.s8.bf16 %v2601_v16  ;;  %v2657_v16 = vld [vmem:[%s4446_s16 + $0xa2] sm:$0x3] }
 0x36d   : > { %v1434_v23 = vpop.f32.mrb[4].mxu0 }
 0x36e   : > { %v1477_v25 = vmul.f32 %v1462_v22, %v1434_v23  ;;  %v1436_v54 = vpop.f32.mrb[5].mxu0  ;;  %v1878_v22 = vunpack.c.l.s8.bf16 %v1728_v11  ;;  %v2679_v23 = vunpack.c.l.s8.bf16 %v2583_v12  ;;  %v1740_v11 = vld [vmem:[%s4412_s12 + $0xb0] sm:$0xff]  ;;  %v2591_v12 = vld [vmem:[%s4446_s16 + $0x1e] sm:$0x3] }
 0x36f   : > { %v1478_v30 = vmul.f32 %v1466_v18, %v1436_v54  ;;  %v1438_v31 = vpop.f32.mrb[6].mxu0  ;;  %v2678_v18 = vunpack.c.l.s8.bf16 %v2582_v52  ;;  %v3409_v54 = vcombine.low %v2694_v5, %v2695_v28  ;;  %v2702_v5 = vunpack.c.l.s8.bf16 %v2606_v4  ;;  %v2590_v52 = vld [vmem:[%s4446_s16 + $0x1c] sm:$0x3]  ;;  %v2662_v4 = vld [vmem:[%s4446_s16 + $0xac] sm:$0x3] }
 0x370   : > { %v1695_v32 = vadd.f32 %v4594_v24, %v1477_v25  ;;  %v1439_v33 = vpop.f32.mrb[7].mxu0  ;;  %v2597_v24 = vld [vmem:[%s4446_s16 + $0x2a] sm:$0x3]  ;;  %v1885_v25 = vunpack.c.h.s8.bf16 %v1729_v2  ;;  %v2585_v31 = vld [vmem:[%s4446_s16 + $0x12] sm:$0x3]  ;;  %v2703_v28 = vunpack.c.l.s8.bf16 %v2607_v7 }
 0x371   : > { %v1696_v36 = vadd.f32 %v4596_v46, %v1478_v30  ;;  %v2693_v59 = vunpack.c.l.s8.bf16 %v2597_v24  ;;  %v2584_v30 = vld [vmem:[%s4446_s16 + $0x10] sm:$0x3]  ;;  %v2602_v33 = vld [vmem:[%s4446_s16 + $0x34] sm:$0x3]  ;;  %v2681_v19 = vunpack.c.l.s8.bf16 %v2585_v31  ;;  %v2605_v24 = vld [vmem:[%s4446_s16 + $0x3a] sm:$0x3] }
 0x372   : > { %v1707_v41 = vmul.f32 %v4562_v42, %v1695_v32  ;;  %v1735_v32 = vld [vmem:[%s4412_s12 + $0x88] sm:$0xff]  ;;  %v2680_v39 = vunpack.c.l.s8.bf16 %v2584_v30  ;;  %v2698_v44 = vunpack.c.l.s8.bf16 %v2602_v33  ;;  %v2701_v0 = vunpack.c.l.s8.bf16 %v2605_v24  ;;  %v2661_v24 = vld [vmem:[%s4446_s16 + $0xaa] sm:$0x3]  ;;  %v2663_v7 = vld [vmem:[%s4446_s16 + $0xae] sm:$0x3] }
 0x373   : > { %v1708_v45 = vmul.f32 %v4562_v42, %v1696_v36  ;;  %v1873_v42 = vunpack.c.h.s8.bf16 %v4662_v47  ;;  %v1879_v47 = vunpack.c.l.s8.bf16 %v1729_v2  ;;  %v3408_v10 = vcombine.low %v2692_v58, %v2693_v59  ;;  %v1741_v2 = vld [vmem:[%s4412_s12 + $0xb8] sm:$0xff]  ;;  %v2640_v30 = vld [vmem:[%s4446_s16 + $0x80] sm:$0x3]  ;;  %v2641_v31 = vld [vmem:[%s4446_s16 + $0x82] sm:$0x3] }
 0x374   : > { %v4696_v57 = vpack.c.bf16 %v1707_v41, %v1707_v41  ;;  %v3401_v36 = vcombine.low %v2678_v18, %v2679_v23  ;;  %v1891_v40 = vunpack.c.l.s8.bf16 %v1735_v32  ;;  %v3410_v41 = vcombine.low %v2696_v26, %v2697_v29  ;;  %v2658_v33 = vld [vmem:[%s4446_s16 + $0xa4] sm:$0x3] }
 0x375   : > { %v4694_v46 = vpack.c.bf16 %v1708_v45, %v1708_v45  ;;  %v2699_v45 = vunpack.c.l.s8.bf16 %v2603_v38  ;;  %v1897_v58 = vunpack.c.h.s8.bf16 %v1735_v32  ;;  %v2686_v18 = vunpack.c.l.s8.bf16 %v2590_v52  ;;  %v1747_v32 = vld [vmem:[%s4412_s12 + $0xe8] sm:$0xff]  ;;  %v2659_v38 = vld [vmem:[%s4446_s16 + $0xa6] sm:$0x3]  ;;  %v2646_v52 = vld [vmem:[%s4446_s16 + $0x8c] sm:$0x3] }
 0x376   : > { %v2687_v23 = vunpack.c.l.s8.bf16 %v2591_v12  ;;  %v2752_v26 = vunpack.c.l.s8.bf16 %v2656_v13  ;;  %v2753_v29 = vunpack.c.l.s8.bf16 %v2657_v16  ;;  %v2754_v48 = vunpack.c.l.s8.bf16 %v2658_v33  ;;  %v2647_v12 = vld [vmem:[%s4446_s16 + $0x8e] sm:$0x3]  ;;  %v2664_v13 = vld [vmem:[%s4446_s16 + $0xb0] sm:$0x3]  ;;  %v2665_v16 = vld [vmem:[%s4446_s16 + $0xb2] sm:$0x3] }
 0x377   : > { %2264 = vmatprep.mubr.bf16.mxu1 %v4694_v46  ;;  %2387 = vmatprep.mubr.bf16.mxu0 %v4694_v46  ;;  %v3411_v59 = vcombine.low %v2698_v44, %v2699_v45  ;;  %v2642_v44 = vld [vmem:[%s4446_s16 + $0x84] sm:$0x3]  ;;  %v2643_v45 = vld [vmem:[%s4446_s16 + $0x86] sm:$0x3]  ;;  %v2755_v49 = vunpack.c.l.s8.bf16 %v2659_v38  ;;  %v2666_v33 = vld [vmem:[%s4446_s16 + $0xb4] sm:$0x3] }
 0x378   : > { %2265 = vmatmul.mubr.bf16.vlgmr.msra.gmra.mrb[16].mxu1 %v4696_v57  ;;  %2388 = vmatmul.mubr.bf16.vlgmr.msra.gmra.mrb[8].mxu0 %v4696_v57  ;;  %v2667_v38 = vld [vmem:[%s4446_s16 + $0xb6] sm:$0x3] }
 0x379   : > { %2397 = vmatpush1.bf16.msra.mxu1 %v1866_v60  ;;  %3452 = vmatpush3.bf16.msra.mxu0 %v3398_v53  ;;  %v1890_v60 = vunpack.c.l.s8.bf16 %v1734_v43  ;;  %v3402_v53 = vcombine.low %v2680_v39, %v2681_v19  ;;  %v2736_v39 = vunpack.c.l.s8.bf16 %v2640_v30  ;;  %v2737_v19 = vunpack.c.l.s8.bf16 %v2641_v31  ;;  %v2648_v30 = vld [vmem:[%s4446_s16 + $0x90] sm:$0x3]  ;;  %v2649_v31 = vld [vmem:[%s4446_s16 + $0x92] sm:$0x3] }
 0x37a   : > { %2428 = vmatprep.mubr.bf16.mxu1 %v4574_v56  ;;  %3088 = vmatprep.mubr.bf16.mxu0 %v4574_v56  ;;  %v3400_v56 = vcombine.low %v2676_v51, %v2677_v9 }
 0x37b   : > { %2398 = vmatprep.subr.bf16.mxu1 %v1873_v42  ;;  %3453 = vmatprep.subr.bf16.mxu0 %v3407_v1  ;;  %v2588_v42 = vld [vmem:[%s4446_s16 + $0x18] sm:$0x3]  ;;  %v2589_v1 = vld [vmem:[%s4446_s16 + $0x1a] sm:$0x3] }
 0x37c   : > { %v2684_v51 = vunpack.c.l.s8.bf16 %v2588_v42  ;;  %v2685_v9 = vunpack.c.l.s8.bf16 %v2589_v1  ;;  %v2645_v42 = vld [vmem:[%s4446_s16 + $0x8a] sm:$0x3]  ;;  %v3439_v1 = vcombine.low %v2754_v48, %v2755_v49  ;;  %v2650_v48 = vld [vmem:[%s4446_s16 + $0x94] sm:$0x3]  ;;  %v2651_v49 = vld [vmem:[%s4446_s16 + $0x96] sm:$0x3] }
 0x37d   : > { %2399 = vmatpush1.bf16.msra.mxu1 %v1872_v6  ;;  %3454 = vmatpush3.bf16.msra.mxu0 %v3399_v8  ;;  %v1896_v6 = vunpack.c.h.s8.bf16 %v1734_v43  ;;  %v3403_v8 = vcombine.low %v2682_v61, %v2683_v55  ;;  %v1746_v43 = vld [vmem:[%s4412_s12 + $0xe0] sm:$0xff]  ;;  %v2738_v61 = vunpack.c.l.s8.bf16 %v2642_v44  ;;  %v2739_v55 = vunpack.c.l.s8.bf16 %v2643_v45 }
 0x37e   : > { %2400 = vmatprep.subr.bf16.mxu1 %v1879_v47  ;;  %3455 = vmatprep.subr.bf16.mxu0 %v3408_v10  ;;  %v1903_v47 = vunpack.c.l.s8.bf16 %v1741_v2  ;;  %v3412_v10 = vcombine.low %v2700_v63, %v2701_v0  ;;  %v2757_v63 = vunpack.c.l.s8.bf16 %v2661_v24  ;;  %v2644_v0 = vld [vmem:[%s4446_s16 + $0x88] sm:$0x3]  ;;  %v2762_v44 = vunpack.c.l.s8.bf16 %v2666_v33  ;;  %v2669_v24 = vld [vmem:[%s4446_s16 + $0xba] sm:$0x3]  ;;  %v1777_v33 = vld [vmem:[%s4412_s12 + $0x1d8] sm:$0xff] }
 0x37f   : > { %v2763_v45 = vunpack.c.l.s8.bf16 %v2667_v38 }
 0x381   : > { %2401 = vmatpush1.bf16.msra.mxu1 %v1878_v22  ;;  %3456 = vmatpush3.bf16.msra.mxu0 %v3400_v56  ;;  %v1902_v22 = vunpack.c.l.s8.bf16 %v1740_v11  ;;  %v3404_v56 = vcombine.low %v2684_v51, %v2685_v9  ;;  %v2740_v51 = vunpack.c.l.s8.bf16 %v2644_v0  ;;  %v2741_v9 = vunpack.c.l.s8.bf16 %v2645_v42  ;;  %v2652_v42 = vld [vmem:[%s4446_s16 + $0x98] sm:$0x3] }
 0x382   : > { %2402 = vmatprep.subr.bf16.mxu1 %v1885_v25  ;;  %3457 = vmatprep.subr.bf16.mxu0 %v3409_v54  ;;  %v1909_v25 = vunpack.c.h.s8.bf16 %v1741_v2  ;;  %v3413_v54 = vcombine.low %v2702_v5, %v2703_v28  ;;  %v1753_v2 = vld [vmem:[%s4412_s12 + $0x118] sm:$0xff]  ;;  %v2758_v5 = vunpack.c.l.s8.bf16 %v2662_v4  ;;  %v2759_v28 = vunpack.c.l.s8.bf16 %v2663_v7  ;;  %v2670_v4 = vld [vmem:[%s4446_s16 + $0xbc] sm:$0x3]  ;;  %v2671_v7 = vld [vmem:[%s4446_s16 + $0xbe] sm:$0x3] }
 0x383   : > { %v2765_v0 = vunpack.c.l.s8.bf16 %v2669_v24  ;;  %v1788_v24 = vld [vmem:[%s4412_s12 + $0x230] sm:$0xff] }
 0x385   : > { %2403 = vmatpush1.bf16.msra.mxu1 %v1884_v35  ;;  %3458 = vmatpush3.bf16.msra.mxu0 %v3401_v36  ;;  %v1908_v35 = vunpack.c.h.s8.bf16 %v1740_v11  ;;  %v3405_v36 = vcombine.low %v2686_v18, %v2687_v23  ;;  %v1752_v11 = vld [vmem:[%s4412_s12 + $0x110] sm:$0xff]  ;;  %v2742_v18 = vunpack.c.l.s8.bf16 %v2646_v52  ;;  %v2743_v23 = vunpack.c.l.s8.bf16 %v2647_v12  ;;  %v2654_v52 = vld [vmem:[%s4446_s16 + $0x9c] sm:$0x3]  ;;  %v2655_v12 = vld [vmem:[%s4446_s16 + $0x9e] sm:$0x3] }
 0x386   : > { %2404 = vmatprep.subr.bf16.mxu1 %v1891_v40  ;;  %3459 = vmatprep.subr.bf16.mxu0 %v3410_v41  ;;  %v1915_v40 = vunpack.c.l.s8.bf16 %v1747_v32  ;;  %v3438_v41 = vcombine.low %v2752_v26, %v2753_v29  ;;  %v2760_v26 = vunpack.c.l.s8.bf16 %v2664_v13  ;;  %v2761_v29 = vunpack.c.l.s8.bf16 %v2665_v16 }
 0x389   : > { %2405 = vmatpush1.bf16.msra.mxu1 %v1890_v60  ;;  %3460 = vmatpush3.bf16.msra.mxu0 %v3402_v53  ;;  %v1914_v60 = vunpack.c.l.s8.bf16 %v1746_v43  ;;  %v3430_v53 = vcombine.low %v2736_v39, %v2737_v19  ;;  %v2744_v39 = vunpack.c.l.s8.bf16 %v2648_v30  ;;  %v2745_v19 = vunpack.c.l.s8.bf16 %v2649_v31  ;;  %v1770_v30 = vld [vmem:[%s4412_s12 + $0x1a0] sm:$0xff] }
 0x38a   : > { %2406 = vmatprep.subr.bf16.mxu1 %v1897_v58  ;;  %3461 = vmatprep.subr.bf16.mxu0 %v3411_v59  ;;  %v1921_v58 = vunpack.c.h.s8.bf16 %v1747_v32  ;;  %v2756_v59 = vunpack.c.l.s8.bf16 %v2660_v50  ;;  %v1759_v32 = vld [vmem:[%s4412_s12 + $0x148] sm:$0xff]  ;;  %v2668_v50 = vld [vmem:[%s4446_s16 + $0xb8] sm:$0x3]  ;;  %v1962_v31 = vunpack.c.l.s8.bf16 %v1770_v30  ;;  %v1968_v38 = vunpack.c.h.s8.bf16 %v1770_v30 }
 0x38d   : > { %2407 = vmatpush1.bf16.msra.mxu1 %v1896_v6  ;;  %3462 = vmatpush3.bf16.msra.mxu0 %v3403_v8  ;;  %v1920_v6 = vunpack.c.h.s8.bf16 %v1746_v43  ;;  %v3431_v8 = vcombine.low %v2738_v61, %v2739_v55  ;;  %v1758_v43 = vld [vmem:[%s4412_s12 + $0x140] sm:$0xff]  ;;  %v2746_v61 = vunpack.c.l.s8.bf16 %v2650_v48  ;;  %v2747_v55 = vunpack.c.l.s8.bf16 %v2651_v49  ;;  %v1789_v48 = vld [vmem:[%s4412_s12 + $0x238] sm:$0xff] }
 0x38e   : > { %2408 = vmatprep.subr.bf16.mxu1 %v1903_v47  ;;  %3463 = vmatprep.subr.bf16.mxu0 %v3412_v10  ;;  %v1927_v47 = vunpack.c.l.s8.bf16 %v1753_v2  ;;  %v3440_v10 = vcombine.low %v2756_v59, %v2757_v63  ;;  %v3443_v59 = vcombine.low %v2762_v44, %v2763_v45  ;;  %v2764_v63 = vunpack.c.l.s8.bf16 %v2668_v50 }
 0x38f   : > { %v1999_v50 = vunpack.c.l.s8.bf16 %v1789_v48 }
 0x391   : > { %2409 = vmatpush1.bf16.msra.mxu1 %v1902_v22  ;;  %3464 = vmatpush3.bf16.msra.mxu0 %v3404_v56  ;;  %v1926_v22 = vunpack.c.l.s8.bf16 %v1752_v11  ;;  %v3432_v56 = vcombine.low %v2740_v51, %v2741_v9  ;;  %v2748_v51 = vunpack.c.l.s8.bf16 %v2652_v42  ;;  %v1801_v42 = vld [vmem:[%s4412_s12 + $0x298] sm:$0xff] }
 0x392   : > { %2410 = vmatprep.subr.bf16.mxu1 %v1909_v25  ;;  %3465 = vmatprep.subr.bf16.mxu0 %v3413_v54  ;;  %v1933_v25 = vunpack.c.h.s8.bf16 %v1753_v2  ;;  %v3441_v54 = vcombine.low %v2758_v5, %v2759_v28  ;;  %v1765_v2 = vld [vmem:[%s4412_s12 + $0x178] sm:$0xff]  ;;  %v2766_v5 = vunpack.c.l.s8.bf16 %v2670_v4  ;;  %v2767_v28 = vunpack.c.l.s8.bf16 %v2671_v7  ;;  %v1800_v4 = vld [vmem:[%s4412_s12 + $0x290] sm:$0xff] }
 0x393   : > { %v2022_v7 = vunpack.c.l.s8.bf16 %v1800_v4 }
 0x395   : > { %2411 = vmatpush1.bf16.msra.mxu1 %v1908_v35  ;;  %3466 = vmatpush3.bf16.msra.mxu0 %v3405_v36  ;;  %v1932_v35 = vunpack.c.h.s8.bf16 %v1752_v11  ;;  %v3433_v36 = vcombine.low %v2742_v18, %v2743_v23  ;;  %v1764_v11 = vld [vmem:[%s4412_s12 + $0x170] sm:$0xff]  ;;  %v1957_v18 = vunpack.c.h.s8.bf16 %v1765_v2  ;;  %v3445_v23 = vcombine.low %v2766_v5, %v2767_v28  ;;  %v1813_v5 = vld [vmem:[%s4412_s12 + $0x2f8] sm:$0xff] }
 0x396   : > { %2412 = vmatprep.subr.bf16.mxu1 %v1915_v40  ;;  %3495 = vmatprep.subr.bf16.mxu0 %v3438_v41  ;;  %v1939_v40 = vunpack.c.l.s8.bf16 %v1759_v32  ;;  %v3442_v41 = vcombine.low %v2760_v26, %v2761_v29  ;;  %v1950_v13 = vunpack.c.l.s8.bf16 %v1764_v11 }
 0x398   : > { %3089 = vmatmul.mubr.bf16.vlgmr.msra.gmra.mrb[12].mxu0 %v4576_v62 }
 0x399   : > { %2413 = vmatpush1.bf16.msra.mxu1 %v1914_v60  ;;  %3496 = vmatpush3.bf16.msra.mxu0 %v3430_v53  ;;  %v1938_v60 = vunpack.c.l.s8.bf16 %v1758_v43  ;;  %v3434_v53 = vcombine.low %v2744_v39, %v2745_v19  ;;  %v1981_v19 = vunpack.c.h.s8.bf16 %v1777_v33 }
 0x39a   : > { %3168 = vmatprep.mubr.bf16.mxu0 %v4694_v46  ;;  %2414 = vmatprep.subr.bf16.mxu1 %v1921_v58  ;;  %v1945_v58 = vunpack.c.h.s8.bf16 %v1759_v32 }
 0x39b   : > { %3497 = vmatprep.subr.bf16.mxu0 %v3439_v1  ;;  %v2653_v1 = vld [vmem:[%s4446_s16 + $0x9a] sm:$0x3] }
 0x39c   : > { %v2749_v9 = vunpack.c.l.s8.bf16 %v2653_v1 }
 0x39d   : > { %2415 = vmatpush1.bf16.msra.mxu1 %v1920_v6  ;;  %3498 = vmatpush3.bf16.msra.mxu0 %v3431_v8  ;;  %v1944_v6 = vunpack.c.h.s8.bf16 %v1758_v43  ;;  %v3435_v8 = vcombine.low %v2746_v61, %v2747_v55  ;;  %v1782_v43 = vld [vmem:[%s4412_s12 + $0x200] sm:$0xff]  ;;  %v1795_v61 = vld [vmem:[%s4412_s12 + $0x268] sm:$0xff]  ;;  %v2004_v55 = vunpack.c.h.s8.bf16 %v1788_v24 }
 0x39e   : > { %2416 = vmatprep.subr.bf16.mxu1 %v1927_v47  ;;  %3499 = vmatprep.subr.bf16.mxu0 %v3440_v10  ;;  %v1951_v47 = vunpack.c.l.s8.bf16 %v1765_v2  ;;  %v3444_v10 = vcombine.low %v2764_v63, %v2765_v0  ;;  %v3436_v16 = vcombine.low %v2748_v51, %v2749_v9  ;;  %v1986_v44 = vunpack.c.l.s8.bf16 %v1782_v43 }
 0x39f   : > { %v1992_v49 = vunpack.c.h.s8.bf16 %v1782_v43  ;;  %v2017_v0 = vunpack.c.h.s8.bf16 %v1795_v61  ;;  %v2023_v2 = vunpack.c.l.s8.bf16 %v1801_v42  ;;  %v2028_v51 = vunpack.c.h.s8.bf16 %v1800_v4  ;;  %v1836_v43 = vld [vmem:[%s4412_s12 + $0x3b0] sm:$0xff]  ;;  %v1854_v4 = vld [vmem:[%s4412_s12 + $0x440] sm:$0xff] }
 0x3a1   : > { %2417 = vmatpush1.bf16.msra.mxu1 %v1926_v22  ;;  %3500 = vmatpush3.bf16.msra.mxu0 %v3432_v56  ;;  %v2750_v22 = vunpack.c.l.s8.bf16 %v2654_v52  ;;  %v2751_v56 = vunpack.c.l.s8.bf16 %v2655_v12  ;;  %v2047_v52 = vunpack.c.l.s8.bf16 %v1813_v5  ;;  %v1812_v12 = vld [vmem:[%s4412_s12 + $0x2f0] sm:$0xff] }
 0x3a2   : > { %2418 = vmatprep.subr.bf16.mxu1 %v1933_v25  ;;  %3501 = vmatprep.subr.bf16.mxu0 %v3441_v54  ;;  %v1771_v25 = vld [vmem:[%s4412_s12 + $0x1a8] sm:$0xff]  ;;  %v1956_v54 = vunpack.c.h.s8.bf16 %v1764_v11 }
 0x3a3   : > { %v3437_v26 = vcombine.low %v2750_v22, %v2751_v56  ;;  %v1963_v29 = vunpack.c.l.s8.bf16 %v1771_v25  ;;  %v1969_v32 = vunpack.c.h.s8.bf16 %v1771_v25  ;;  %v1819_v22 = vld [vmem:[%s4412_s12 + $0x328] sm:$0xff]  ;;  %v2052_v56 = vunpack.c.h.s8.bf16 %v1812_v12 }
 0x3a5   : > { %2419 = vmatpush1.bf16.msra.mxu1 %v1932_v35  ;;  %3502 = vmatpush3.bf16.msra.mxu0 %v3433_v36  ;;  %v1975_v35 = vunpack.c.l.s8.bf16 %v1777_v33  ;;  %v1776_v36 = vld [vmem:[%s4412_s12 + $0x1d0] sm:$0xff] }
 0x3a6   : > { %2420 = vmatprep.subr.bf16.mxu1 %v1939_v40  ;;  %3503 = vmatprep.subr.bf16.mxu0 %v3442_v41  ;;  %v1974_v39 = vunpack.c.l.s8.bf16 %v1776_v36  ;;  %v1783_v40 = vld [vmem:[%s4412_s12 + $0x208] sm:$0xff]  ;;  %v1980_v41 = vunpack.c.h.s8.bf16 %v1776_v36 }
 0x3a7   : > { %v1993_v45 = vunpack.c.h.s8.bf16 %v1783_v40 }
 0x3a9   : > { %2421 = vmatpush1.bf16.msra.mxu1 %v1938_v60  ;;  %3504 = vmatpush3.bf16.msra.mxu0 %v3434_v53  ;;  %v1998_v60 = vunpack.c.l.s8.bf16 %v1788_v24  ;;  %v2005_v53 = vunpack.c.h.s8.bf16 %v1789_v48  ;;  %v1843_v48 = vld [vmem:[%s4412_s12 + $0x3e8] sm:$0xff]  ;;  %v1842_v24 = vld [vmem:[%s4412_s12 + $0x3e0] sm:$0xff] }
 0x3aa   : > { %2422 = vmatprep.subr.bf16.mxu1 %v1945_v58  ;;  %3505 = vmatprep.subr.bf16.mxu0 %v3443_v59  ;;  %v2011_v58 = vunpack.c.l.s8.bf16 %v1795_v61  ;;  %v1794_v59 = vld [vmem:[%s4412_s12 + $0x260] sm:$0xff]  ;;  %v1849_v61 = vld [vmem:[%s4412_s12 + $0x418] sm:$0xff] }
 0x3ab   : > { %v2010_v63 = vunpack.c.l.s8.bf16 %v1794_v59  ;;  %v2016_v1 = vunpack.c.h.s8.bf16 %v1794_v59  ;;  %v1848_v59 = vld [vmem:[%s4412_s12 + $0x410] sm:$0xff] }
 0x3ad   : > { %2423 = vmatpush1.bf16.msra.mxu1 %v1944_v6  ;;  %3506 = vmatpush3.bf16.msra.mxu0 %v3435_v8  ;;  %v2029_v6 = vunpack.c.h.s8.bf16 %v1801_v42  ;;  %v1807_v8 = vld [vmem:[%s4412_s12 + $0x2c8] sm:$0xff] }
 0x3ae   : > { %2424 = vmatprep.subr.bf16.mxu1 %v1951_v47  ;;  %3507 = vmatprep.subr.bf16.mxu0 %v3444_v10  ;;  %v2035_v9 = vunpack.c.l.s8.bf16 %v1807_v8  ;;  %v1806_v47 = vld [vmem:[%s4412_s12 + $0x2c0] sm:$0xff]  ;;  %v2041_v11 = vunpack.c.h.s8.bf16 %v1807_v8  ;;  %v1855_v42 = vld [vmem:[%s4412_s12 + $0x448] sm:$0xff]  ;;  %v1861_v8 = vld [vmem:[%s4412_s12 + $0x478] sm:$0xff] }
 0x3af   : > { %v2034_v10 = vunpack.c.l.s8.bf16 %v1806_v47  ;;  %v2040_v28 = vunpack.c.h.s8.bf16 %v1806_v47  ;;  %v1860_v47 = vld [vmem:[%s4412_s12 + $0x470] sm:$0xff] }
 0x3b1   : > { %2425 = vmatpush1.bf16.msra.mxu1 %v1950_v13  ;;  %3508 = vmatpush3.bf16.msra.mxu0 %v3436_v16  ;;  %v2046_v13 = vunpack.c.l.s8.bf16 %v1812_v12  ;;  %v2053_v16 = vunpack.c.h.s8.bf16 %v1813_v5  ;;  %v2142_v5 = vunpack.c.l.s8.bf16 %v1860_v47 }
 0x3b2   : > { %2426 = vmatprep.subr.bf16.mxu1 %v1957_v18  ;;  %3509 = vmatprep.subr.bf16.mxu0 %v3445_v23  ;;  %v2059_v18 = vunpack.c.l.s8.bf16 %v1819_v22  ;;  %v1818_v23 = vld [vmem:[%s4412_s12 + $0x320] sm:$0xff] }
 0x3b3   : > { %v2058_v25 = vunpack.c.l.s8.bf16 %v1818_v23 }
 0x3b5   : > { %2427 = vmatpush1.bf16.msra.mxu1 %v1956_v54  ;;  %3510 = vmatpush3.bf16.msra.mxu0 %v3437_v26  ;;  %v2065_v54 = vunpack.c.h.s8.bf16 %v1819_v22  ;;  %v1825_v26 = vld [vmem:[%s4412_s12 + $0x358] sm:$0xff]  ;;  %v2626_v22 = vld [vmem:[%s4446_s16 + $0x64] sm:$0x3] }
 0x3b6   : > { %2437 = vmatprep.subr.bf16.mxu1 %v1963_v29  ;;  %v2064_v29 = vunpack.c.h.s8.bf16 %v1818_v23  ;;  %v2071_v30 = vunpack.c.l.s8.bf16 %v1825_v26  ;;  %v2077_v33 = vunpack.c.h.s8.bf16 %v1825_v26  ;;  %v2722_v26 = vunpack.c.l.s8.bf16 %v2626_v22  ;;  %v2620_v22 = vld [vmem:[%s4446_s16 + $0x58] sm:$0x3] }
 0x3b8   : > { %2429 = vmatmul.mubr.bf16.vlgmr.msra.gmra.mrb[20].mxu1 %v4576_v62  ;;  %3169 = vmatmul.mubr.bf16.vlgmr.msra.gmra.mrb[16].mxu0 %v4696_v57  ;;  %v1987_v62 = vunpack.c.l.s8.bf16 %v1783_v40  ;;  %v1837_v40 = vld [vmem:[%s4412_s12 + $0x3b8] sm:$0xff] }
 0x3b9   : > { %2438 = vmatpush1.bf16.msra.mxu1 %v1962_v31  ;;  %2469 = vmatprep.mubr.bf16.mxu1 %v4589_v15  ;;  %v1824_v31 = vld [vmem:[%s4412_s12 + $0x350] sm:$0xff] }
 0x3ba   : > { %2439 = vmatprep.subr.bf16.mxu1 %v1969_v32  ;;  %v2070_v32 = vunpack.c.l.s8.bf16 %v1824_v31 }
 0x3bd   : > { %2440 = vmatpush1.bf16.msra.mxu1 %v1968_v38  ;;  %v1831_v38 = vld [vmem:[%s4412_s12 + $0x388] sm:$0xff] }
 0x3be   : > { %2441 = vmatprep.subr.bf16.mxu1 %v1975_v35  ;;  %v2076_v35 = vunpack.c.h.s8.bf16 %v1824_v31  ;;  %v2083_v36 = vunpack.c.l.s8.bf16 %v1831_v38  ;;  %v2611_v31 = vld [vmem:[%s4446_s16 + $0x46] sm:$0x3] }
 0x3c1   : > { %2442 = vmatpush1.bf16.msra.mxu1 %v1974_v39  ;;  %v1830_v39 = vld [vmem:[%s4412_s12 + $0x380] sm:$0xff] }
 0x3c2   : > { %2443 = vmatprep.subr.bf16.mxu1 %v1981_v19  ;;  %v2082_v19 = vunpack.c.l.s8.bf16 %v1830_v39 }
 0x3c5   : > { %2444 = vmatpush1.bf16.msra.mxu1 %v1980_v41  ;;  %v2088_v41 = vunpack.c.h.s8.bf16 %v1830_v39 }
 0x3c6   : > { %2445 = vmatprep.subr.bf16.mxu1 %v1987_v62  ;;  %v2095_v62 = vunpack.c.l.s8.bf16 %v1837_v40 }
 0x3c9   : > { %2446 = vmatpush1.bf16.msra.mxu1 %v1986_v44  ;;  %v2094_v44 = vunpack.c.l.s8.bf16 %v1836_v43 }
 0x3ca   : > { %2447 = vmatprep.subr.bf16.mxu1 %v1993_v45  ;;  %v2101_v45 = vunpack.c.h.s8.bf16 %v1837_v40  ;;  %v2612_v40 = vld [vmem:[%s4446_s16 + $0x48] sm:$0x3] }
 0x3cd   : > { %2448 = vmatpush1.bf16.msra.mxu1 %v1992_v49  ;;  %v2100_v49 = vunpack.c.h.s8.bf16 %v1836_v43  ;;  %v2631_v43 = vld [vmem:[%s4446_s16 + $0x6e] sm:$0x3] }
 0x3ce   : > { %2449 = vmatprep.subr.bf16.mxu1 %v1999_v50  ;;  %v2107_v50 = vunpack.c.l.s8.bf16 %v1843_v48 }
 0x3d1   : > { %2450 = vmatpush1.bf16.msra.mxu1 %v1998_v60  ;;  %v2106_v60 = vunpack.c.l.s8.bf16 %v1842_v24 }
 0x3d2   : > { %2451 = vmatprep.subr.bf16.mxu1 %v2005_v53  ;;  %v2113_v53 = vunpack.c.h.s8.bf16 %v1843_v48 }
 0x3d5   : > { %2452 = vmatpush1.bf16.msra.mxu1 %v2004_v55  ;;  %v2112_v55 = vunpack.c.h.s8.bf16 %v1842_v24  ;;  %v2727_v24 = vunpack.c.l.s8.bf16 %v2631_v43 }
 0x3d6   : > { %2453 = vmatprep.subr.bf16.mxu1 %v2011_v58  ;;  %v2119_v58 = vunpack.c.l.s8.bf16 %v1849_v61 }
 0x3d9   : > { %2454 = vmatpush1.bf16.msra.mxu1 %v2010_v63  ;;  %v2118_v63 = vunpack.c.l.s8.bf16 %v1848_v59 }
 0x3da   : > { %2455 = vmatprep.subr.bf16.mxu1 %v2017_v0  ;;  %v2125_v0 = vunpack.c.h.s8.bf16 %v1849_v61  ;;  %v2632_v61 = vld [vmem:[%s4446_s16 + $0x70] sm:$0x3] }
 0x3dd   : > { %2456 = vmatpush1.bf16.msra.mxu1 %v2016_v1  ;;  %v2124_v1 = vunpack.c.h.s8.bf16 %v1848_v59 }
 0x3de   : > { %2457 = vmatprep.subr.bf16.mxu1 %v2023_v2  ;;  %v2131_v2 = vunpack.c.l.s8.bf16 %v1855_v42 }
 0x3e1   : > { %2458 = vmatpush1.bf16.msra.mxu1 %v2022_v7  ;;  %v2130_v7 = vunpack.c.l.s8.bf16 %v1854_v4 }
 0x3e2   : > { %2459 = vmatprep.subr.bf16.mxu1 %v2029_v6  ;;  %v2137_v6 = vunpack.c.h.s8.bf16 %v1855_v42  ;;  %v2616_v42 = vld [vmem:[%s4446_s16 + $0x50] sm:$0x3] }
 0x3e5   : > { %2460 = vmatpush1.bf16.msra.mxu1 %v2028_v51  ;;  %v2136_v51 = vunpack.c.h.s8.bf16 %v1854_v4  ;;  %v2635_v4 = vld [vmem:[%s4446_s16 + $0x76] sm:$0x3] }
 0x3e6   : > { %2461 = vmatprep.subr.bf16.mxu1 %v2035_v9  ;;  %v2143_v9 = vunpack.c.l.s8.bf16 %v1861_v8 }
 0x3e9   : > { %2462 = vmatpush1.bf16.msra.mxu1 %v2034_v10  ;;  %v2624_v10 = vld [vmem:[%s4446_s16 + $0x60] sm:$0x3] }
 0x3ea   : > { %2463 = vmatprep.subr.bf16.mxu1 %v2041_v11  ;;  %v2625_v11 = vld [vmem:[%s4446_s16 + $0x62] sm:$0x3] }
 0x3eb   : > { %v2721_v12 = vunpack.c.l.s8.bf16 %v2625_v11  ;;  %v2619_v11 = vld [vmem:[%s4446_s16 + $0x56] sm:$0x3] }
 0x3ed   : > { %2464 = vmatpush1.bf16.msra.mxu1 %v2040_v28  ;;  %v2149_v28 = vunpack.c.h.s8.bf16 %v1861_v8 }
 0x3ee   : > { %2465 = vmatprep.subr.bf16.mxu1 %v2047_v52  ;;  %v2720_v52 = vunpack.c.l.s8.bf16 %v2624_v10  ;;  %v2618_v10 = vld [vmem:[%s4446_s16 + $0x54] sm:$0x3] }
 0x3f1   : > { %2466 = vmatpush1.bf16.msra.mxu1 %v2046_v13  ;;  %v2608_v13 = vld [vmem:[%s4446_s16 + $0x40] sm:$0x3] }
 0x3f2   : > { %2467 = vmatprep.subr.bf16.mxu1 %v2053_v16  ;;  %v2609_v16 = vld [vmem:[%s4446_s16 + $0x42] sm:$0x3]  ;;  %v2704_v23 = vunpack.c.l.s8.bf16 %v2608_v13  ;;  %v2714_v13 = vunpack.c.l.s8.bf16 %v2618_v10 }
 0x3f5   : > { %2468 = vmatpush1.bf16.msra.mxu1 %v2052_v56  ;;  %v2627_v56 = vld [vmem:[%s4446_s16 + $0x66] sm:$0x3] }
 0x3f6   : > { %2478 = vmatprep.subr.bf16.mxu1 %v2059_v18  ;;  %v2148_v18 = vunpack.c.h.s8.bf16 %v1860_v47  ;;  %v2731_v47 = vunpack.c.l.s8.bf16 %v2635_v4 }
 0x3f8   : > { %2470 = vmatmul.mubr.bf16.vlgmr.msra.gmra.mrb[20].mxu1 %v4628_v3 }
 0x3f9   : > { %2479 = vmatpush1.bf16.msra.mxu1 %v2058_v25  ;;  %2510 = vmatprep.mubr.bf16.mxu1 %v4694_v46  ;;  %v2089_v46 = vunpack.c.h.s8.bf16 %v1831_v38  ;;  %v2705_v25 = vunpack.c.l.s8.bf16 %v2609_v16  ;;  %v2715_v16 = vunpack.c.l.s8.bf16 %v2619_v11 }
 0x3fa   : > { %2480 = vmatprep.subr.bf16.mxu1 %v2065_v54  ;;  %v3422_v54 = vcombine.low %v2720_v52, %v2721_v12  ;;  %v4840_v12 = vld [vmem:[#allocation11] sm:$0x3f] }
 0x3fb   : > { %v3414_v38 = vcombine.low %v2704_v23, %v2705_v25  ;;  %v2540_v10 = vrot.slane %v4840_v12, %v1461_v17  ;;  %v2544_v11 = vrot.slane %v4840_v12, %v1465_v20 }
 0x3fd   : > { %2481 = vmatpush1.bf16.msra.mxu1 %v2064_v29  ;;  %v2723_v29 = vunpack.c.l.s8.bf16 %v2627_v56  ;;  %v2621_v56 = vld [vmem:[%s4446_s16 + $0x5a] sm:$0x3] }
 0x3fe   : > { %2482 = vmatprep.subr.bf16.mxu1 %v2071_v30  ;;  %v2610_v30 = vld [vmem:[%s4446_s16 + $0x44] sm:$0x3] }
 0x3ff   : > { %v3423_v39 = vcombine.low %v2722_v26, %v2723_v29  ;;  %v2639_v26 = vld [vmem:[%s4446_s16 + $0x7e] sm:$0x3]  ;;  %v2524_v29 = vrot.slane %v4840_v12, %v1445_v14 }
 0x400   : > { %v2735_v14 = vunpack.c.l.s8.bf16 %v2639_v26 }
 0x401   : > { %2483 = vmatpush1.bf16.msra.mxu1 %v2070_v32  ;;  %v2628_v32 = vld [vmem:[%s4446_s16 + $0x68] sm:$0x3] }
 0x402   : > { %2484 = vmatprep.subr.bf16.mxu1 %v2077_v33  ;;  %v2629_v33 = vld [vmem:[%s4446_s16 + $0x6a] sm:$0x3] }
 0x405   : > { %2485 = vmatpush1.bf16.msra.mxu1 %v2076_v35  ;;  %v2706_v35 = vunpack.c.l.s8.bf16 %v2610_v30  ;;  %v2532_v30 = vrot.slane %v4840_v12, %v1453_v34 }
 0x406   : > { %2486 = vmatprep.subr.bf16.mxu1 %v2083_v36  ;;  %v2707_v36 = vunpack.c.l.s8.bf16 %v2611_v31  ;;  %v2716_v31 = vunpack.c.l.s8.bf16 %v2620_v22 }
 0x409   : > { %2487 = vmatpush1.bf16.msra.mxu1 %v2082_v19  ;;  %v2724_v19 = vunpack.c.l.s8.bf16 %v2628_v32  ;;  %v2717_v32 = vunpack.c.l.s8.bf16 %v2621_v56 }
 0x40a   : > { %2488 = vmatprep.subr.bf16.mxu1 %v2089_v46  ;;  %v2725_v46 = vunpack.c.l.s8.bf16 %v2629_v33  ;;  %v2528_v33 = vrot.slane %v4840_v12, %v1449_v21 }
 0x40d   : > { %2489 = vmatpush1.bf16.msra.mxu1 %v2088_v41  ;;  %v2613_v41 = vld [vmem:[%s4446_s16 + $0x4a] sm:$0x3] }
 0x40e   : > { %2490 = vmatprep.subr.bf16.mxu1 %v2095_v62  ;;  %v2630_v62 = vld [vmem:[%s4446_s16 + $0x6c] sm:$0x3]  ;;  %v2709_v48 = vunpack.c.l.s8.bf16 %v2613_v41 }
 0x411   : > { %2491 = vmatpush1.bf16.msra.mxu1 %v2094_v44  ;;  %v3415_v44 = vcombine.low %v2706_v35, %v2707_v36  ;;  %v3419_v35 = vcombine.low %v2714_v13, %v2715_v16  ;;  %v1717_v16 = vld [vmem:[#allocation15 + $0x10] sm:$0xff] }
 0x412   : > { %2492 = vmatprep.subr.bf16.mxu1 %v2101_v45  ;;  %v2708_v45 = vunpack.c.l.s8.bf16 %v2612_v40 }
 0x415   : > { %2493 = vmatpush1.bf16.msra.mxu1 %v2100_v49  ;;  %v3424_v49 = vcombine.low %v2724_v19, %v2725_v46  ;;  %v2622_v19 = vld [vmem:[%s4446_s16 + $0x5c] sm:$0x3]  ;;  %v2623_v46 = vld [vmem:[%s4446_s16 + $0x5e] sm:$0x3] }
 0x416   : > { %2494 = vmatprep.subr.bf16.mxu1 %v2107_v50  ;;  %v2726_v50 = vunpack.c.l.s8.bf16 %v2630_v62 }
 0x419   : > { %2495 = vmatpush1.bf16.msra.mxu1 %v2106_v60  ;;  %v2614_v60 = vld [vmem:[%s4446_s16 + $0x4c] sm:$0x3] }
 0x41a   : > { %2496 = vmatprep.subr.bf16.mxu1 %v2113_v53  ;;  %v2615_v53 = vld [vmem:[%s4446_s16 + $0x4e] sm:$0x3] }
 0x41b   : > { %v2711_v59 = vunpack.c.l.s8.bf16 %v2615_v53  ;;  %v1716_v53 = vld [vmem:[#allocation15 + $0x8] sm:$0xff] }
 0x41d   : > { %2497 = vmatpush1.bf16.msra.mxu1 %v2112_v55  ;;  %v2633_v55 = vld [vmem:[%s4446_s16 + $0x72] sm:$0x3] }
 0x41e   : > { %2498 = vmatprep.subr.bf16.mxu1 %v2119_v58  ;;  %v2710_v58 = vunpack.c.l.s8.bf16 %v2614_v60  ;;  %v1715_v60 = vld [vmem:[#allocation15] sm:$0xff] }
 0x421   : > { %2499 = vmatpush1.bf16.msra.mxu1 %v2118_v63  ;;  %v2728_v63 = vunpack.c.l.s8.bf16 %v2632_v61 }
 0x422   : > { %2500 = vmatprep.subr.bf16.mxu1 %v2125_v0  ;;  %v2729_v0 = vunpack.c.l.s8.bf16 %v2633_v55 }
 0x425   : > { %2501 = vmatpush1.bf16.msra.mxu1 %v2124_v1  ;;  %v2617_v1 = vld [vmem:[%s4446_s16 + $0x52] sm:$0x3] }
 0x426   : > { %2502 = vmatprep.subr.bf16.mxu1 %v2131_v2  ;;  %v2634_v2 = vld [vmem:[%s4446_s16 + $0x74] sm:$0x3]  ;;  %v2713_v8 = vunpack.c.l.s8.bf16 %v2617_v1 }
 0x429   : > { %2503 = vmatpush1.bf16.msra.mxu1 %v2130_v7  ;;  %v3417_v7 = vcombine.low %v2710_v58, %v2711_v59 }
 0x42a   : > { %2504 = vmatprep.subr.bf16.mxu1 %v2137_v6  ;;  %v2712_v6 = vunpack.c.l.s8.bf16 %v2616_v42 }
 0x42c   : > { %v3418_v52 = vcombine.low %v2712_v6, %v2713_v8 }
 0x42d   : > { %2505 = vmatpush1.bf16.msra.mxu1 %v2136_v51  ;;  %v3426_v51 = vcombine.low %v2728_v63, %v2729_v0 }
 0x42e   : > { %2506 = vmatprep.subr.bf16.mxu1 %v2143_v9  ;;  %v2730_v9 = vunpack.c.l.s8.bf16 %v2634_v2 }
 0x431   : > { %2507 = vmatpush1.bf16.msra.mxu1 %v2142_v5  ;;  %v2636_v5 = vld [vmem:[%s4446_s16 + $0x78] sm:$0x3] }
 0x432   : > { %2508 = vmatprep.subr.bf16.mxu1 %v2149_v28  ;;  %v2637_v28 = vld [vmem:[%s4446_s16 + $0x7a] sm:$0x3]  ;;  %v2732_v23 = vunpack.c.l.s8.bf16 %v2636_v5 }
 0x433   : > { %v2733_v25 = vunpack.c.l.s8.bf16 %v2637_v28 }
 0x435   : > { %2509 = vmatpush1.bf16.msra.mxu1 %v2148_v18  ;;  %v3427_v18 = vcombine.low %v2730_v9, %v2731_v47  ;;  %v3428_v36 = vcombine.low %v2732_v23, %v2733_v25 }
 0x436   : > { %3473 = vmatprep.subr.bf16.mxu1 %v3422_v54  ;;  %v2638_v54 = vld [vmem:[%s4446_s16 + $0x7c] sm:$0x3] }
 0x438   : > { %2511 = vmatmul.mubr.bf16.vlgmr.msra.gmra.mrb[20].mxu1 %v4696_v57  ;;  %v3416_v57 = vcombine.low %v2708_v45, %v2709_v48  ;;  %v3420_v45 = vcombine.low %v2716_v31, %v2717_v32 }
 0x439   : > { %3474 = vmatpush3.bf16.msra.mxu1 %v3414_v38  ;;  %3128 = vmatprep.mubr.bf16.mxu1 %v4589_v15  ;;  %v3425_v15 = vcombine.low %v2726_v50, %v2727_v24  ;;  %v2536_v38 = vrot.slane %v4840_v12, %v1457_v37  ;;  %v2718_v37 = vunpack.c.l.s8.bf16 %v2622_v19  ;;  %v2719_v24 = vunpack.c.l.s8.bf16 %v2623_v46  ;;  %v2575_v12 = vld [vmem:[#allocation15 + $0x18] sm:$0xf] }
 0x43a   : > { %3475 = vmatprep.subr.bf16.mxu1 %v3423_v39  ;;  %v2734_v39 = vunpack.c.l.s8.bf16 %v2638_v54 }
 0x43b   : > { %v3421_v0 = vcombine.low %v2718_v37, %v2719_v24 }
 0x43d   : > { %3476 = vmatpush3.bf16.msra.mxu1 %v3415_v44 }
 0x43e   : > { %3477 = vmatprep.subr.bf16.mxu1 %v3424_v49 }
 0x441   : > { %3478 = vmatpush3.bf16.msra.mxu1 %v3416_v57  ;;  %v3429_v57 = vcombine.low %v2734_v39, %v2735_v14 }
 0x442   : > { %3479 = vmatprep.subr.bf16.mxu1 %v3425_v15 }
 0x445   : > { %3480 = vmatpush3.bf16.msra.mxu1 %v3417_v7 }
 0x446   : > { %3481 = vmatprep.subr.bf16.mxu1 %v3426_v51 }
 0x449   : > { %3482 = vmatpush3.bf16.msra.mxu1 %v3418_v52 }
 0x44a   : > { %3483 = vmatprep.subr.bf16.mxu1 %v3427_v18 }
 0x44b   : > { %v2266_v40 = vpop.f32.mrb[16].mxu1  ;;  %v2389_v34 = vpop.f32.mrb[8].mxu0 }
 0x44c   : > { %v2551_v41 = vmul.f32 %v2524_v29, %v2266_v40  ;;  %v2553_v62 = vmul.f32 %v2532_v30, %v2389_v34  ;;  %v2268_v43 = vpop.f32.mrb[17].mxu1  ;;  %v2391_v44 = vpop.f32.mrb[9].mxu0  ;;  %v3446_v29 = vld [vmem:[#allocation12] ss:$0 sm:$0xff] }
 0x44d   : > { %v2552_v48 = vmul.f32 %v2528_v33, %v2268_v43  ;;  %v2554_v21 = vmul.f32 %v2536_v38, %v2391_v44  ;;  %3484 = vmatpush3.bf16.msra.mxu1 %v3419_v35  ;;  %v2270_v49 = vpop.f32.mrb[18].mxu1  ;;  %v2393_v50 = vpop.f32.mrb[10].mxu0 }
 0x44e   : > { %v2271_v61 = vpop.f32.mrb[19].mxu1  ;;  %v2394_v55 = vpop.f32.mrb[11].mxu0  ;;  %3485 = vmatprep.subr.bf16.mxu1 %v3428_v36 }
 0x44f   : > { %v2563_v58 = vcombine.low %v2551_v41, %v2552_v48  ;;  %v2564_v59 = vcombine.low %v2553_v62, %v2554_v21 }
 0x451   : > { %v2569_v15 = vadd.f32 %v2563_v58, %v1715_v60  ;;  %v2570_v63 = vadd.f32 %v2564_v59, %v1716_v53  ;;  %3486 = vmatpush3.bf16.msra.mxu1 %v3420_v45 }
 0x452   : > { %3487 = vmatprep.subr.bf16.mxu1 %v3429_v57 }
 0x453   : > { %2572 = vst [vmem:[#allocation15] sm:$0xff] %v2569_v15  ;;  %2573 = vst [vmem:[#allocation15 + $0x8] sm:$0xff] %v2570_v63 }
 0x455   : > { %3488 = vmatpush3.bf16.msra.mxu1 %v3421_v0 }
 0x458   : > { %3129 = vmatmul.mubr.bf16.vlgmr.msra.gmra.mrb[24].mxu1 %v4628_v3 }
 0x46b   : > { %v3467_v42 = vpop.f32.mrb[12].mxu0 }
 0x46c   : > { %v3468_v1 = vpop.f32.mrb[13].mxu0 }
 0x46d   : > { %v3469_v2 = vadd.f32 %v3468_v1, %v3467_v42  ;;  %v3470_v4 = vpop.f32.mrb[14].mxu0 }
 0x46e   : > { %v3471_v7 = vpop.f32.mrb[15].mxu0 }
 0x48b   : > { %v3511_v6 = vpop.f32.mrb[16].mxu0 }
 0x48c   : > { %v3512_v8 = vpop.f32.mrb[17].mxu0 }
 0x48d   : > { %v3513_v51 = vadd.f32 %v3512_v8, %v3511_v6  ;;  %v3514_v9 = vpop.f32.mrb[18].mxu0 }
 0x48e   : > { %v3515_v47 = vpop.f32.mrb[19].mxu0 }
 0x50b   : > { %v2512_v5 = vpop.f32.mrb[20].mxu1 }
 0x50c   : > { %v2555_v3 = vmul.f32 %v2540_v10, %v2512_v5  ;;  %v2514_v28 = vpop.f32.mrb[21].mxu1 }
 0x50d   : > { %v2556_v52 = vmul.f32 %v2544_v11, %v2514_v28  ;;  %v2516_v13 = vpop.f32.mrb[22].mxu1 }
 0x50e   : > { %v2517_v22 = vpop.f32.mrb[23].mxu1 }
 0x50f   : > { %v2565_v56 = vcombine.low %v2555_v3, %v2556_v52 }
 0x511   : > { %v2571_v18 = vadd.f32 %v2565_v56, %v1717_v16 }
 0x513   : > { %2574 = vst [vmem:[#allocation15 + $0x10] sm:$0xff] %v2571_v18 }
 0x52b   : > { %v3489_v23 = vpop.f32.mrb[24].mxu1 }
 0x52c   : > { %v3490_v25 = vpop.f32.mrb[25].mxu1 }
 0x52d   : > { %v3491_v54 = vadd.f32 %v3490_v25, %v3489_v23  ;;  %v3492_v26 = vpop.f32.mrb[26].mxu1 }
 0x52e   : > { %v3493_v17 = vpop.f32.mrb[27].mxu1 }
 0x52f   : > { %v3131_v27 = vadd.f32 %v3491_v54, %v3469_v2 }
 0x531   : > { %v3171_v20 = vadd.f32 %v3513_v51, %v3131_v27 }
 0x533   : > { %v3183_v30 = vmul.f32 %v3446_v29, %v3171_v20 }
 0x535   : > { %v3184_v31 = vadd.f32 %v3183_v30, %v2575_v12 }
 0x537   : > { %3186 = vst.msk [vmem:[#allocation15 + $0x18] sm:$0xf] %vm3185_vm4, %v3184_v31 }
 0x538   : > { %3953 = shalt.err (!%p3950_p7)
}
 0x539   : > { %s4963_s12 = sld [smem:[#allocation30_spill]] }
 0x53f   : > { %s3954_s26 = scalar_lea.hbm %s4963_s12, 448 }
 0x540   : > { %p3955_p8 = scmp.ne.s32.totalorder %s4963_s12, %s3954_s26  ;;  %p3960_p1 = scmp.lt.u32.totalorder %s3954_s26, %s4963_s12 }
 0x542   : > { %p3956_p4 = pnand %p3955_p8, %p3643_p0 }
 0x544   : > { %p3957_p6 = pneg %p3956_p4 }
 0x546   : > { %p3962_p3 = pnand %p3960_p1, %p3957_p6 }
 0x548   : > { %3965 = shalt.err (!%p3962_p3)
}
 0x549   : > { %3600 = dma.vmem_to_hbm [thread:$0]  (%p3643_p0), %s3195_s11, 448, %s4963_s12, [#allocation4]  }
 0x54a   : > { %4011 = dma.done.wait (%p3643_p0), [#allocation4], 448  }
 0x54b   : > { %4013 = vsyncadd (%p3643_p0), [#allocation4], 4294966848 }
 0x54c PF: > { %p25_p10 = scmp.ge.s32.totalorder %s4229_s13, 5   ;;  %s4964_s17 = smov %s4020_s18 }
 0x54d   : > { %s4965_s18 = smov %s4024_s19  ;;  %s4966_s19 = smov %s4241_s21 }
 0x54e   : > { %s4967_s20 = smov %s4229_s13  ;;  %27 = sbr.rel (!%p25_p10) target bundleno = 15 (0xf), region = 149 }
 0x555   :  { %3207 = vsyncpa [#allocation3], 1 }
 0x556   :  { %3209 = vsyncpa [#allocation3 + $0x1], 1 }
 0x557   :  { %3210 = vsyncpa [#allocation6], 1 }
 0x558   :  { %3211 = vsyncpa [#allocation9], 1 }
 0x559   :  { %3212 = vsyncpa [#allocation14], 1 }
 0x55a   :  { %3213 = vsyncpa [#allocation4], 1 }
 0x55b   :  { %3215 = vsyncpa [#allocation4 + $0x1], 1 }

</bundles_post_ra>
